<compile_context>
chip_gen: v6e
topology: v6e:2x2x1
jax: 0.10.0
libtpu: 0.0.40
codegen_flags: <defaults>
</compile_context>

<pallas_src>
import math

import jax
import jax.numpy as jnp
from jax import lax
from jax.experimental import pallas as pl
from jax.experimental.pallas import tpu as pltpu

EPS = 1e-5
MXU_DTYPE = jnp.bfloat16      # MXU operand dtype; accumulation stays float32
TM_GEMM = 256                 # target GEMM row tile (review: 64 -> 256-512)


def _round_up(x, m):
    return (x + m - 1) // m * m


def _largest_tile(n, candidates=(512, 256, 128, 64, 32, 16, 8)):
    for c in candidates:
        if n % c == 0:
            return c
    return n


# -----------------------------------------------------------------------------
# Kernel 1: conv-as-GEMM with fused per-channel sum / sum-of-squares
# -----------------------------------------------------------------------------
def conv_gemm_stats_kernel(a_ref, w_ref, y_ref, stat_ref):
    acc = jnp.dot(a_ref[...], w_ref[...], preferred_element_type=jnp.float32)
    y_ref[...] = acc
    s = jnp.sum(acc, axis=0, keepdims=True)
    sq = jnp.sum(acc * acc, axis=0, keepdims=True)
    pad = jnp.zeros((6, acc.shape[1]), jnp.float32)
    stat_ref[...] = jnp.concatenate([s, sq, pad], axis=0)[None]


def conv_gemm_stats(patches, w_mat, n_tiles, tm):
    m, kpad = patches.shape
    cout = w_mat.shape[1]
    return pl.pallas_call(
        conv_gemm_stats_kernel,
        out_shape=(
            jax.ShapeDtypeStruct((m, cout), jnp.float32),
            jax.ShapeDtypeStruct((n_tiles, 8, cout), jnp.float32),
        ),
        grid=(n_tiles,),
        in_specs=[
            pl.BlockSpec((tm, kpad), lambda i: (i, 0)),
            pl.BlockSpec((kpad, cout), lambda i: (0, 0)),   # weights stay resident
        ],
        out_specs=(
            pl.BlockSpec((tm, cout), lambda i: (i, 0)),
            pl.BlockSpec((1, 8, cout), lambda i: (i, 0, 0)),
        ),
        compiler_params=pltpu.CompilerParams(dimension_semantics=("parallel",)),
    )(patches, w_mat)


# -----------------------------------------------------------------------------
# Kernel 2: fused BatchNorm + ReLU + MaxPool 3x3 / stride 2 (one image / step)
# -----------------------------------------------------------------------------
def bn_relu_maxpool(y1_4d, scale, shift, n, ho, hop, wop, wop_p):
    nhpad, _, wh, c = y1_4d.shape

    def kernel(y_ref, sc_ref, sh_ref, p_ref):
        z = jnp.maximum(y_ref[...] * sc_ref[...] + sh_ref[...], 0.0)
        ze = z[:, 0]                         # even output columns (ho, wh, c)
        zo = z[:, 1]                         # odd  output columns
        # horizontal 3-window max at stride 2: cols 2k, 2k+1, 2k+2
        hm = jnp.maximum(jnp.maximum(ze[:, :wop, :], zo[:, :wop, :]),
                         ze[:, 1:wop + 1, :])            # (ho, wop, c)
        # vertical 3-window max at stride 2 via even/odd split of the lead dim
        hoe = ho + (ho % 2)
        if hoe != ho:
            hm = jnp.concatenate(
                [hm, jnp.zeros((hoe - ho, wop, c), hm.dtype)], axis=0)
        hr = hm.reshape(hoe // 2, 2, wop, c)
        he = hr[:, 0]
        hodd = hr[:, 1]
        v = jnp.maximum(jnp.maximum(he[:hop], hodd[:hop]), he[1:hop + 1])
        if wop_p != wop:
            v = jnp.concatenate(
                [v, jnp.zeros((hop, wop_p - wop, c), v.dtype)], axis=1)
        p_ref[...] = v.astype(p_ref.dtype)

    return pl.pallas_call(
        kernel,
        out_shape=jax.ShapeDtypeStruct((n * hop, wop_p, c), MXU_DTYPE),
        grid=(n,),
        in_specs=[
            pl.BlockSpec((ho, 2, wh, c), lambda i: (i, 0, 0, 0)),
            pl.BlockSpec((1, 1, 1, c), lambda i: (0, 0, 0, 0)),
            pl.BlockSpec((1, 1, 1, c), lambda i: (0, 0, 0, 0)),
        ],
        out_specs=pl.BlockSpec((hop, wop_p, c), lambda i: (i, 0, 0)),
        compiler_params=pltpu.CompilerParams(dimension_semantics=("parallel",)),
    )(y1_4d, scale.reshape(1, 1, 1, c), shift.reshape(1, 1, 1, c))


# -----------------------------------------------------------------------------
# Kernel 3: conv 3x3/s1 with implicit im2col (shifted windows from VMEM scratch)
#           + fused masked per-channel stats
# -----------------------------------------------------------------------------
def conv2_gemm_implicit(p_pad, w_taps, mask, wop_p, tm, n_tiles):
    _, c1 = p_pad.shape
    cout = w_taps.shape[2]
    offsets = [di * wop_p + dj for di in range(3) for dj in range(3)]
    assert max(offsets) < tm

    def kernel(a0_ref, a1_ref, w_ref, m_ref, y_ref, stat_ref, win_ref):
        # stage current tile + next tile (halo) into one contiguous window
        win_ref[0:tm, :] = a0_ref[...]
        win_ref[tm:2 * tm, :] = a1_ref[...]
        acc = jnp.zeros((tm, cout), jnp.float32)
        for t, off in enumerate(offsets):            # 9 static shifted windows
            acc = acc + jnp.dot(win_ref[off:off + tm, :], w_ref[t],
                                preferred_element_type=jnp.float32)
        y = jnp.where(m_ref[...] > 0.5, acc, 0.0)    # zero garbage / halo rows
        y_ref[...] = y
        s = jnp.sum(y, axis=0, keepdims=True)
        sq = jnp.sum(y * y, axis=0, keepdims=True)
        pad = jnp.zeros((6, cout), jnp.float32)
        stat_ref[...] = jnp.concatenate([s, sq, pad], axis=0)[None]

    return pl.pallas_call(
        kernel,
        out_shape=(
            jax.ShapeDtypeStruct((n_tiles * tm, cout), jnp.float32),
            jax.ShapeDtypeStruct((n_tiles, 8, cout), jnp.float32),
        ),
        grid=(n_tiles,),
        in_specs=[
            pl.BlockSpec((tm, c1), lambda i: (i, 0)),
            pl.BlockSpec((tm, c1), lambda i: (i + 1, 0)),          # halo block
            pl.BlockSpec((9, c1, cout), lambda i: (0, 0, 0)),      # weights resident
            pl.BlockSpec((tm, 1), lambda i: (i, 0)),
        ],
        out_specs=(
            pl.BlockSpec((tm, cout), lambda i: (i, 0)),
            pl.BlockSpec((1, 8, cout), lambda i: (i, 0, 0)),
        ),
        scratch_shapes=[pltpu.VMEM((2 * tm, c1), MXU_DTYPE)],
        compiler_params=pltpu.CompilerParams(dimension_semantics=("parallel",)),
    )(p_pad, p_pad, w_taps, mask)


# -----------------------------------------------------------------------------
# Kernel 4: lane-dense fused BatchNorm + ReLU
# -----------------------------------------------------------------------------
def bn_relu_kernel(x_ref, sc_ref, sh_ref, o_ref):
    o_ref[...] = jnp.maximum(x_ref[...] * sc_ref[...] + sh_ref[...], 0.0)


def bn_relu(x2d, scale, shift):
    rows, lanes = x2d.shape
    tm = _largest_tile(rows)
    return pl.pallas_call(
        bn_relu_kernel,
        out_shape=jax.ShapeDtypeStruct((rows, lanes), jnp.float32),
        grid=(rows // tm,),
        in_specs=[
            pl.BlockSpec((tm, lanes), lambda i: (i, 0)),
            pl.BlockSpec((1, lanes), lambda i: (0, 0)),
            pl.BlockSpec((1, lanes), lambda i: (0, 0)),
        ],
        out_specs=pl.BlockSpec((tm, lanes), lambda i: (i, 0)),
        compiler_params=pltpu.CompilerParams(dimension_semantics=("parallel",)),
    )(x2d, scale.reshape(1, lanes), shift.reshape(1, lanes))


# -----------------------------------------------------------------------------
# Forward pass (plain-JAX glue: transposes, conv1 im2col, tiny scalar folds)
# -----------------------------------------------------------------------------
def intro_block_forward(x_nchw, params):
    x = jnp.transpose(x_nchw, (0, 2, 3, 1)).astype(jnp.float32)       # NHWC
    n, h, w, cin = x.shape

    # ---------------- stage 1: conv 7x7 / s2 (GEMM + fused BN stats) ---------
    kh = kw = 7
    stride = 2
    ho1 = (h - kh) // stride + 1
    wo1 = (w - kw) // stride + 1
    assert ho1 >= 3 and wo1 >= 3, "input too small for the 7x7/s2 + 3x3/s2 stem"
    c1 = params["w1"].shape[3]                                        # 64

    k1 = kh * kw * cin
    k1p = _round_up(k1, 128)                       # K padded to 128 lanes
    wh = _round_up((wo1 + 1) // 2, 4)              # even/odd half-width (2*wh % 8 == 0)
    tr = max(1, TM_GEMM // (2 * wh))               # image rows per GEMM tile
    nh1p = _round_up(n * ho1, tr)
    tm1 = tr * 2 * wh

    # im2col + even/odd output-column split (layout only; rows ordered
    # (n, h, parity, w//2) so the pool kernel avoids strided accesses).
    cols = []
    for i in range(kh):
        for j in range(kw):
            cols.append(x[:, i:i + stride * ho1:stride,
                          j:j + stride * wo1:stride, :])
    p4 = jnp.stack(cols, axis=3).reshape(n, ho1, wo1, k1)
    pe = p4[:, :, 0::2, :]
    po = p4[:, :, 1::2, :]
    pe = jnp.pad(pe, ((0, 0), (0, 0), (0, wh - pe.shape[2]), (0, 0)))
    po = jnp.pad(po, ((0, 0), (0, 0), (0, wh - po.shape[2]), (0, 0)))
    pp = jnp.stack([pe, po], axis=2).reshape(n * ho1, 2 * wh, k1)
    pp = jnp.pad(pp, ((0, nh1p - n * ho1), (0, 0), (0, k1p - k1)))
    a1 = pp.reshape(nh1p * 2 * wh, k1p).astype(MXU_DTYPE)

    w1 = jnp.pad(params["w1"].reshape(k1, c1),
                 ((0, k1p - k1), (0, 0))).astype(MXU_DTYPE)
    n_tiles1 = (nh1p * 2 * wh) // tm1
    y1, stat1 = conv_gemm_stats(a1, w1, n_tiles1, tm1)

    m1 = n * ho1 * wo1                              # true BN sample count
    s1 = stat1[:, 0, :].sum(axis=0)
    sq1 = stat1[:, 1, :].sum(axis=0)
    mean1 = s1 / m1
    var1 = sq1 / m1 - mean1 * mean1                 # biased variance (train-mode BN)
    scale1 = params["g1"] / jnp.sqrt(var1 + EPS)
    shift1 = params["be1"] - mean1 * scale1         # conv bias dropped: BN absorbs it

    # ---------------- stage 2: fused BN + ReLU + MaxPool 3x3 / s2 ------------
    hop = (ho1 - 3) // 2 + 1
    wop = (wo1 - 3) // 2 + 1
    wop_p = _round_up(wop, 8)
    y1_4d = y1.reshape(nh1p, 2, wh, c1)
    p3 = bn_relu_maxpool(y1_4d, scale1, shift1, n, ho1, hop, wop, wop_p)

    # ---------------- stage 3: conv 3x3 / s1 with implicit im2col ------------
    cout = params["w2"].shape[3]
    ho2 = hop - 2
    wo2 = wop - 2
    assert ho2 >= 1 and wo2 >= 1
    m2 = n * hop * wop_p                            # flat rows incl. width pad
    tm2 = max(TM_GEMM, _round_up(2 * wop_p + 3, 8))
    n_tiles2 = pl.cdiv(m2, tm2)
    m2p = n_tiles2 * tm2

    p_flat = p3.reshape(m2, c1)
    p_pad = jnp.pad(p_flat, ((0, (n_tiles2 + 1) * tm2 - m2), (0, 0)))
    w2 = params["w2"].reshape(3 * 3, c1, cout).astype(MXU_DTYPE)

    hp_i = jnp.arange(hop)[:, None]
    wp_i = jnp.arange(wop_p)[None, :]
    valid = (hp_i < ho2) & (wp_i < wo2)
    mask = jnp.broadcast_to(valid[None], (n, hop, wop_p)).reshape(m2, 1)
    mask = jnp.pad(mask.astype(jnp.float32), ((0, m2p - m2), (0, 0)))

    y2, stat2 = conv2_gemm_implicit(p_pad, w2, mask, wop_p, tm2, n_tiles2)

    m2_real = n * ho2 * wo2
    s2 = stat2[:, 0, :].sum(axis=0)
    sq2 = stat2[:, 1, :].sum(axis=0)
    mean2 = s2 / m2_real
    var2 = sq2 / m2_real - mean2 * mean2
    scale2 = params["g2"] / jnp.sqrt(var2 + EPS)
    shift2 = params["be2"] - mean2 * scale2

    # ---------------- stage 4: lane-dense BN + ReLU epilogue -----------------
    lp = 128 // cout if (cout <= 128 and 128 % cout == 0) else 1
    y2v = y2.reshape(m2p // lp, lp * cout)
    out = bn_relu(y2v, jnp.tile(scale2, lp), jnp.tile(shift2, lp))
    out = out.reshape(m2p, cout)

    out = out[:m2].reshape(n, hop, wop_p, cout)[:, :ho2, :wo2, :]
    return jnp.transpose(out, (0, 3, 1, 2))                          # NCHW


# -----------------------------------------------------------------------------
# Pure-JAX reference (PyTorch-equivalent forward, optional bf16 operand cast)
# -----------------------------------------------------------------------------
def ref_forward(x_nchw, params, operand_dtype=jnp.float32):
    def cast(v):
        return v.astype(operand_dtype).astype(jnp.float32)

    def conv_bn_relu(x, w, b, g, be, stride):
        y = lax.conv_general_dilated(
            cast(x), cast(w), (stride, stride), "VALID",
            dimension_numbers=("NHWC", "HWIO", "NHWC")) + b
        mean = jnp.mean(y, axis=(0, 1, 2))
        var = jnp.var(y, axis=(0, 1, 2))
        return jnp.maximum((y - mean) / jnp.sqrt(var + EPS) * g + be, 0.0)

    x = jnp.transpose(x_nchw, (0, 2, 3, 1))
    y = conv_bn_relu(x, params["w1"], params["b1"], params["g1"], params["be1"], 2)
    y = lax.reduce_window(y, -jnp.inf, lax.max, (1, 3, 3, 1), (1, 2, 2, 1), "VALID")
    y = cast(y)   # the kernel stores the pooled map in the MXU operand dtype
    y = conv_bn_relu(y, params["w2"], params["b2"], params["g2"], params["be2"], 1)
    return jnp.transpose(y, (0, 3, 1, 2))


def make_params(key, in_channels, out_channels):
    ks = jax.random.split(key, 8)
    fan1 = 7 * 7 * in_channels
    fan2 = 3 * 3 * 64
    return {
        "w1": jax.random.normal(ks[0], (7, 7, in_channels, 64), jnp.float32)
        * (1.0 / math.sqrt(fan1)),
        "b1": 0.05 * jax.random.normal(ks[1], (64,), jnp.float32),
        "g1": 1.0 + 0.1 * jax.random.normal(ks[2], (64,), jnp.float32),
        "be1": 0.1 * jax.random.normal(ks[3], (64,), jnp.float32),
        "w2": jax.random.normal(ks[4], (3, 3, 64, out_channels), jnp.float32)
        * (1.0 / math.sqrt(fan2)),
        "b2": 0.05 * jax.random.normal(ks[5], (out_channels,), jnp.float32),
        "g2": 1.0 + 0.1 * jax.random.normal(ks[6], (out_channels,), jnp.float32),
        "be2": 0.1 * jax.random.normal(ks[7], (out_channels,), jnp.float32),
    }


if __name__ == "__main__":
    key = jax.random.PRNGKey(0)
    k_x, k_p = jax.random.split(key)

    in_channels, out_channels = 4, 32
    # spatial 32 so every stage has nonzero extent: 32 -conv7/2-> 13 -pool3/2-> 6 -conv3-> 4
    x = jax.random.normal(k_x, (2, in_channels, 32, 32), jnp.float32)
    params = make_params(k_p, in_channels, out_channels)

    fwd = jax.jit(intro_block_forward)
    out = jax.block_until_ready(fwd(x, params))
    assert out.shape == (2, out_channels, 4, 4), out.shape

    # Semantics check against a reference using the same bf16 MXU operand
    # precision (f32 accumulation on both sides) -> tight tolerance.
    ref_b = jax.block_until_ready(ref_forward(x, params, jnp.bfloat16))
    assert jnp.allclose(out, ref_b, atol=5e-3, rtol=5e-3), float(
        jnp.max(jnp.abs(out - ref_b)))

    # Sanity vs the full-f32 PyTorch-equivalent forward (bf16 operand rounding
    # is the only source of difference).
    ref_f = jax.block_until_ready(ref_forward(x, params, jnp.float32))
    assert jnp.allclose(out, ref_f, atol=1e-1, rtol=1e-1), float(
        jnp.max(jnp.abs(out - ref_f)))

    print("KERNEL_OK")
</pallas_src>

<mosaic_0001>
module attributes {stable_mosaic.version = 11 : i64} {
  func.func @conv_gemm_stats_kernel(%arg0: i32, %arg1: memref<256x256xbf16, #tpu.memory_space<vmem>>, %arg2: memref<256x64xbf16, #tpu.memory_space<vmem>>, %arg3: memref<256x64xf32, #tpu.memory_space<vmem>>, %arg4: memref<1x8x64xf32, #tpu.memory_space<vmem>>) attributes {dimension_semantics = [#tpu.dimension_semantics<parallel>], iteration_bounds = array<i64: 2>, scalar_prefetch = 0 : i64, scratch_operands = 0 : i64, tpu.core_type = #tpu.core_type<tc>, window_params = [{transform_indices = @transform_0, window_bounds = array<i64: 256, 256>}, {pipeline_mode = #tpu.pipeline_mode<synchronous>, transform_indices = @transform_1, window_bounds = array<i64: 256, 64>}, {transform_indices = @transform_2, window_bounds = array<i64: 256, 64>}, {transform_indices = @transform_3, window_bounds = array<i64: 1, 8, 64>}]} {
    %c0 = arith.constant 0 : index
    %c0_0 = arith.constant 0 : index
    %0 = vector.load %arg1[%c0, %c0_0] : memref<256x256xbf16, #tpu.memory_space<vmem>>, vector<256x256xbf16>
    %c0_1 = arith.constant 0 : index
    %c0_2 = arith.constant 0 : index
    %1 = vector.load %arg2[%c0_1, %c0_2] : memref<256x64xbf16, #tpu.memory_space<vmem>>, vector<256x64xbf16>
    %cst = arith.constant dense<0.000000e+00> : vector<256x64xf32>
    %2 = tpu.matmul %0, %1, %cst {dimension_numbers = #tpu.dot_dimension_numbers<[1], [0], [0], [1], [0, 0, 1, 1], [], []>} : vector<256x256xbf16>, vector<256x64xbf16>, vector<256x64xf32> -> vector<256x64xf32>
    %c0_3 = arith.constant 0 : index
    %c0_4 = arith.constant 0 : index
    %3 = vector.load %arg3[%c0_3, %c0_4] : memref<256x64xf32, #tpu.memory_space<vmem>>, vector<256x64xf32>
    tpu.vector_store %arg3[%c0_3, %c0_4], %2 {strides = array<i32>} : memref<256x64xf32, #tpu.memory_space<vmem>>, vector<256x64xf32>,
    %cst_5 = arith.constant dense<0.000000e+00> : vector<64xf32>
    %4 = vector.multi_reduction <add>, %2, %cst_5 [0] : vector<256x64xf32> to vector<64xf32>
    %5 = vector.shape_cast %4 : vector<64xf32> to vector<1x64xf32>
    %6 = arith.mulf %2, %2 : vector<256x64xf32>
    %cst_6 = arith.constant dense<0.000000e+00> : vector<64xf32>
    %7 = vector.multi_reduction <add>, %6, %cst_6 [0] : vector<256x64xf32> to vector<64xf32>
    %8 = vector.shape_cast %7 : vector<64xf32> to vector<1x64xf32>
    %cst_7 = arith.constant 0.000000e+00 : f32
    %9 = vector.broadcast %cst_7 : f32 to vector<6x64xf32>
    %10 = tpu.concatenate %5, %8, %9 in 0 : vector<1x64xf32>, vector<1x64xf32>, vector<6x64xf32> -> vector<8x64xf32>
    %11 = vector.shape_cast %10 : vector<8x64xf32> to vector<1x8x64xf32>
    %c0_8 = arith.constant 0 : index
    %c0_9 = arith.constant 0 : index
    %c0_10 = arith.constant 0 : index
    %12 = vector.load %arg4[%c0_8, %c0_9, %c0_10] : memref<1x8x64xf32, #tpu.memory_space<vmem>>, vector<1x8x64xf32>
    tpu.vector_store %arg4[%c0_8, %c0_9, %c0_10], %11 {strides = array<i32>} : memref<1x8x64xf32, #tpu.memory_space<vmem>>, vector<1x8x64xf32>,
    return
  }
  func.func @transform_0(%arg0: i32) -> (i32, i32) {
    %c0_i32 = arith.constant 0 : i32
    %c0_i32_0 = arith.constant 0 : i32
    return %arg0, %c0_i32 : i32, i32
  }
  func.func @transform_1(%arg0: i32) -> (i32, i32) {
    %c0_i32 = arith.constant 0 : i32
    %c0_i32_0 = arith.constant 0 : i32
    %c0_i32_1 = arith.constant 0 : i32
    return %c0_i32, %c0_i32_0 : i32, i32
  }
  func.func @transform_2(%arg0: i32) -> (i32, i32) {
    %c0_i32 = arith.constant 0 : i32
    %c0_i32_0 = arith.constant 0 : i32
    return %arg0, %c0_i32 : i32, i32
  }
  func.func @transform_3(%arg0: i32) -> (i32, i32, i32) {
    %c0_i32 = arith.constant 0 : i32
    %c0_i32_0 = arith.constant 0 : i32
    %c0_i32_1 = arith.constant 0 : i32
    return %arg0, %c0_i32, %c0_i32_0 : i32, i32, i32
  }
}

module attributes {stable_mosaic.version = 11 : i64} {
  func.func @kernel(%arg0: i32, %arg1: memref<13x2x8x64xf32, #tpu.memory_space<vmem>>, %arg2: memref<1x1x1x64xf32, #tpu.memory_space<vmem>>, %arg3: memref<1x1x1x64xf32, #tpu.memory_space<vmem>>, %arg4: memref<6x8x64xbf16, #tpu.memory_space<vmem>>) attributes {dimension_semantics = [#tpu.dimension_semantics<parallel>], iteration_bounds = array<i64: 2>, scalar_prefetch = 0 : i64, scratch_operands = 0 : i64, tpu.core_type = #tpu.core_type<tc>, window_params = [{transform_indices = @transform_0, window_bounds = array<i64: 13, 2, 8, 64>}, {pipeline_mode = #tpu.pipeline_mode<synchronous>, transform_indices = @transform_1, window_bounds = array<i64: 1, 1, 1, 64>}, {pipeline_mode = #tpu.pipeline_mode<synchronous>, transform_indices = @transform_2, window_bounds = array<i64: 1, 1, 1, 64>}, {transform_indices = @transform_3, window_bounds = array<i64: 6, 8, 64>}]} {
    %c0 = arith.constant 0 : index
    %c0_0 = arith.constant 0 : index
    %c0_1 = arith.constant 0 : index
    %c0_2 = arith.constant 0 : index
    %0 = vector.load %arg1[%c0, %c0_0, %c0_1, %c0_2] : memref<13x2x8x64xf32, #tpu.memory_space<vmem>>, vector<13x2x8x64xf32>
    %c0_3 = arith.constant 0 : index
    %c0_4 = arith.constant 0 : index
    %c0_5 = arith.constant 0 : index
    %c0_6 = arith.constant 0 : index
    %1 = vector.load %arg2[%c0_3, %c0_4, %c0_5, %c0_6] : memref<1x1x1x64xf32, #tpu.memory_space<vmem>>, vector<1x1x1x64xf32>
    %2 = vector.broadcast %1 : vector<1x1x1x64xf32> to vector<13x2x8x64xf32>
    %3 = arith.mulf %0, %2 : vector<13x2x8x64xf32>
    %c0_7 = arith.constant 0 : index
    %c0_8 = arith.constant 0 : index
    %c0_9 = arith.constant 0 : index
    %c0_10 = arith.constant 0 : index
    %4 = vector.load %arg3[%c0_7, %c0_8, %c0_9, %c0_10] : memref<1x1x1x64xf32, #tpu.memory_space<vmem>>, vector<1x1x1x64xf32>
    %5 = vector.broadcast %4 : vector<1x1x1x64xf32> to vector<13x2x8x64xf32>
    %6 = arith.addf %3, %5 : vector<13x2x8x64xf32>
    %cst = arith.constant 0.000000e+00 : f32
    %7 = vector.broadcast %cst : f32 to vector<13x2x8x64xf32>
    %8 = arith.maximumf %6, %7 : vector<13x2x8x64xf32>
    %9 = vector.extract_strided_slice %8 {offsets = [0, 0, 0, 0], sizes = [13, 1, 8, 64], strides = [1, 1, 1, 1]} : vector<13x2x8x64xf32> to vector<13x1x8x64xf32>
    %10 = vector.shape_cast %9 : vector<13x1x8x64xf32> to vector<13x8x64xf32>
    %11 = vector.extract_strided_slice %8 {offsets = [0, 1, 0, 0], sizes = [13, 1, 8, 64], strides = [1, 1, 1, 1]} : vector<13x2x8x64xf32> to vector<13x1x8x64xf32>
    %12 = vector.shape_cast %11 : vector<13x1x8x64xf32> to vector<13x8x64xf32>
    %13 = vector.extract_strided_slice %10 {offsets = [0, 0, 0], sizes = [13, 6, 64], strides = [1, 1, 1]} : vector<13x8x64xf32> to vector<13x6x64xf32>
    %14 = vector.extract_strided_slice %12 {offsets = [0, 0, 0], sizes = [13, 6, 64], strides = [1, 1, 1]} : vector<13x8x64xf32> to vector<13x6x64xf32>
    %15 = arith.maximumf %13, %14 : vector<13x6x64xf32>
    %16 = vector.extract_strided_slice %10 {offsets = [0, 1, 0], sizes = [13, 6, 64], strides = [1, 1, 1]} : vector<13x8x64xf32> to vector<13x6x64xf32>
    %17 = arith.maximumf %15, %16 : vector<13x6x64xf32>
    %cst_11 = arith.constant 0.000000e+00 : f32
    %18 = vector.broadcast %cst_11 : f32 to vector<1x6x64xf32>
    %19 = tpu.concatenate %17, %18 in 0 : vector<13x6x64xf32>, vector<1x6x64xf32> -> vector<14x6x64xf32>
    %20 = vector.shape_cast %19 : vector<14x6x64xf32> to vector<7x2x6x64xf32>
    %21 = vector.extract_strided_slice %20 {offsets = [0, 0, 0, 0], sizes = [7, 1, 6, 64], strides = [1, 1, 1, 1]} : vector<7x2x6x64xf32> to vector<7x1x6x64xf32>
    %22 = vector.shape_cast %21 : vector<7x1x6x64xf32> to vector<7x6x64xf32>
    %23 = vector.extract_strided_slice %20 {offsets = [0, 1, 0, 0], sizes = [7, 1, 6, 64], strides = [1, 1, 1, 1]} : vector<7x2x6x64xf32> to vector<7x1x6x64xf32>
    %24 = vector.shape_cast %23 : vector<7x1x6x64xf32> to vector<7x6x64xf32>
    %25 = vector.extract_strided_slice %22 {offsets = [0, 0, 0], sizes = [6, 6, 64], strides = [1, 1, 1]} : vector<7x6x64xf32> to vector<6x6x64xf32>
    %26 = vector.extract_strided_slice %24 {offsets = [0, 0, 0], sizes = [6, 6, 64], strides = [1, 1, 1]} : vector<7x6x64xf32> to vector<6x6x64xf32>
    %27 = arith.maximumf %25, %26 : vector<6x6x64xf32>
    %28 = vector.extract_strided_slice %22 {offsets = [1, 0, 0], sizes = [6, 6, 64], strides = [1, 1, 1]} : vector<7x6x64xf32> to vector<6x6x64xf32>
    %29 = arith.maximumf %27, %28 : vector<6x6x64xf32>
    %cst_12 = arith.constant 0.000000e+00 : f32
    %30 = vector.broadcast %cst_12 : f32 to vector<6x2x64xf32>
    %31 = tpu.concatenate %29, %30 in 1 : vector<6x6x64xf32>, vector<6x2x64xf32> -> vector<6x8x64xf32>
    %32 = arith.truncf %31 : vector<6x8x64xf32> to vector<6x8x64xbf16>
    %c0_13 = arith.constant 0 : index
    %c0_14 = arith.constant 0 : index
    %c0_15 = arith.constant 0 : index
    %33 = vector.load %arg4[%c0_13, %c0_14, %c0_15] : memref<6x8x64xbf16, #tpu.memory_space<vmem>>, vector<6x8x64xbf16>
    tpu.vector_store %arg4[%c0_13, %c0_14, %c0_15], %32 {strides = array<i32>} : memref<6x8x64xbf16, #tpu.memory_space<vmem>>, vector<6x8x64xbf16>,
    return
  }
  func.func @transform_0(%arg0: i32) -> (i32, i32, i32, i32) {
    %c0_i32 = arith.constant 0 : i32
    %c0_i32_0 = arith.constant 0 : i32
    %c0_i32_1 = arith.constant 0 : i32
    %c0_i32_2 = arith.constant 0 : i32
    return %arg0, %c0_i32, %c0_i32_0, %c0_i32_1 : i32, i32, i32, i32
  }
  func.func @transform_1(%arg0: i32) -> (i32, i32, i32, i32) {
    %c0_i32 = arith.constant 0 : i32
    %c0_i32_0 = arith.constant 0 : i32
    %c0_i32_1 = arith.constant 0 : i32
    %c0_i32_2 = arith.constant 0 : i32
    %c0_i32_3 = arith.constant 0 : i32
    return %c0_i32, %c0_i32_0, %c0_i32_1, %c0_i32_2 : i32, i32, i32, i32
  }
  func.func @transform_2(%arg0: i32) -> (i32, i32, i32, i32) {
    %c0_i32 = arith.constant 0 : i32
    %c0_i32_0 = arith.constant 0 : i32
    %c0_i32_1 = arith.constant 0 : i32
    %c0_i32_2 = arith.constant 0 : i32
    %c0_i32_3 = arith.constant 0 : i32
    return %c0_i32, %c0_i32_0, %c0_i32_1, %c0_i32_2 : i32, i32, i32, i32
  }
  func.func @transform_3(%arg0: i32) -> (i32, i32, i32) {
    %c0_i32 = arith.constant 0 : i32
    %c0_i32_0 = arith.constant 0 : i32
    %c0_i32_1 = arith.constant 0 : i32
    return %arg0, %c0_i32, %c0_i32_0 : i32, i32, i32
  }
}

module attributes {stable_mosaic.version = 11 : i64} {
  func.func @kernel(%arg0: i32, %arg1: memref<256x64xbf16, #tpu.memory_space<vmem>>, %arg2: memref<256x64xbf16, #tpu.memory_space<vmem>>, %arg3: memref<9x64x32xbf16, #tpu.memory_space<vmem>>, %arg4: memref<256x1xf32, #tpu.memory_space<vmem>>, %arg5: memref<256x32xf32, #tpu.memory_space<vmem>>, %arg6: memref<1x8x32xf32, #tpu.memory_space<vmem>>, %arg7: memref<512x64xbf16, #tpu.memory_space<vmem>>) attributes {dimension_semantics = [#tpu.dimension_semantics<parallel>], iteration_bounds = array<i64: 1>, scalar_prefetch = 0 : i64, scratch_operands = 1 : i64, tpu.core_type = #tpu.core_type<tc>, window_params = [{transform_indices = @transform_0, window_bounds = array<i64: 256, 64>}, {transform_indices = @transform_1, window_bounds = array<i64: 256, 64>}, {pipeline_mode = #tpu.pipeline_mode<synchronous>, transform_indices = @transform_2, window_bounds = array<i64: 9, 64, 32>}, {transform_indices = @transform_3, window_bounds = array<i64: 256, 1>}, {transform_indices = @transform_4, window_bounds = array<i64: 256, 32>}, {transform_indices = @transform_5, window_bounds = array<i64: 1, 8, 32>}]} {
    %c0 = arith.constant 0 : index
    %c0_0 = arith.constant 0 : index
    %0 = vector.load %arg1[%c0, %c0_0] : memref<256x64xbf16, #tpu.memory_space<vmem>>, vector<256x64xbf16>
    %c0_1 = arith.constant 0 : index
    %c0_2 = arith.constant 0 : index
    %1 = vector.load %arg7[%c0_1, %c0_2] : memref<512x64xbf16, #tpu.memory_space<vmem>>, vector<256x64xbf16>
    tpu.vector_store %arg7[%c0_1, %c0_2], %0 {strides = array<i32>} : memref<512x64xbf16, #tpu.memory_space<vmem>>, vector<256x64xbf16>,
    %c0_3 = arith.constant 0 : index
    %c0_4 = arith.constant 0 : index
    %2 = vector.load %arg2[%c0_3, %c0_4] : memref<256x64xbf16, #tpu.memory_space<vmem>>, vector<256x64xbf16>
    %c256 = arith.constant 256 : index
    %c0_5 = arith.constant 0 : index
    %3 = vector.load %arg7[%c256, %c0_5] : memref<512x64xbf16, #tpu.memory_space<vmem>>, vector<256x64xbf16>
    tpu.vector_store %arg7[%c256, %c0_5], %2 {strides = array<i32>} : memref<512x64xbf16, #tpu.memory_space<vmem>>, vector<256x64xbf16>,
    %cst = arith.constant 0.000000e+00 : f32
    %4 = vector.broadcast %cst : f32 to vector<256x32xf32>
    %c0_6 = arith.constant 0 : index
    %c0_7 = arith.constant 0 : index
    %5 = vector.load %arg7[%c0_6, %c0_7] : memref<512x64xbf16, #tpu.memory_space<vmem>>, vector<256x64xbf16>
    %c0_8 = arith.constant 0 : index
    %c0_9 = arith.constant 0 : index
    %c0_10 = arith.constant 0 : index
    %6 = vector.load %arg3[%c0_8, %c0_9, %c0_10] : memref<9x64x32xbf16, #tpu.memory_space<vmem>>, vector<1x64x32xbf16>
    %7 = vector.shape_cast %6 : vector<1x64x32xbf16> to vector<64x32xbf16>
    %cst_11 = arith.constant dense<0.000000e+00> : vector<256x32xf32>
    %8 = tpu.matmul %5, %7, %cst_11 {dimension_numbers = #tpu.dot_dimension_numbers<[1], [0], [0], [1], [0, 0, 1, 1], [], []>} : vector<256x64xbf16>, vector<64x32xbf16>, vector<256x32xf32> -> vector<256x32xf32>
    %9 = arith.addf %4, %8 : vector<256x32xf32>
    %c1 = arith.constant 1 : index
    %c0_12 = arith.constant 0 : index
    %10 = vector.load %arg7[%c1, %c0_12] : memref<512x64xbf16, #tpu.memory_space<vmem>>, vector<256x64xbf16>
    %c1_13 = arith.constant 1 : index
    %c0_14 = arith.constant 0 : index
    %c0_15 = arith.constant 0 : index
    %11 = vector.load %arg3[%c1_13, %c0_14, %c0_15] : memref<9x64x32xbf16, #tpu.memory_space<vmem>>, vector<1x64x32xbf16>
    %12 = vector.shape_cast %11 : vector<1x64x32xbf16> to vector<64x32xbf16>
    %cst_16 = arith.constant dense<0.000000e+00> : vector<256x32xf32>
    %13 = tpu.matmul %10, %12, %cst_16 {dimension_numbers = #tpu.dot_dimension_numbers<[1], [0], [0], [1], [0, 0, 1, 1], [], []>} : vector<256x64xbf16>, vector<64x32xbf16>, vector<256x32xf32> -> vector<256x32xf32>
    %14 = arith.addf %9, %13 : vector<256x32xf32>
    %c2 = arith.constant 2 : index
    %c0_17 = arith.constant 0 : index
    %15 = vector.load %arg7[%c2, %c0_17] : memref<512x64xbf16, #tpu.memory_space<vmem>>, vector<256x64xbf16>
    %c2_18 = arith.constant 2 : index
    %c0_19 = arith.constant 0 : index
    %c0_20 = arith.constant 0 : index
    %16 = vector.load %arg3[%c2_18, %c0_19, %c0_20] : memref<9x64x32xbf16, #tpu.memory_space<vmem>>, vector<1x64x32xbf16>
    %17 = vector.shape_cast %16 : vector<1x64x32xbf16> to vector<64x32xbf16>
    %cst_21 = arith.constant dense<0.000000e+00> : vector<256x32xf32>
    %18 = tpu.matmul %15, %17, %cst_21 {dimension_numbers = #tpu.dot_dimension_numbers<[1], [0], [0], [1], [0, 0, 1, 1], [], []>} : vector<256x64xbf16>, vector<64x32xbf16>, vector<256x32xf32> -> vector<256x32xf32>
    %19 = arith.addf %14, %18 : vector<256x32xf32>
    %c8 = arith.constant 8 : index
    %c0_22 = arith.constant 0 : index
    %20 = vector.load %arg7[%c8, %c0_22] : memref<512x64xbf16, #tpu.memory_space<vmem>>, vector<256x64xbf16>
    %c3 = arith.constant 3 : index
    %c0_23 = arith.constant 0 : index
    %c0_24 = arith.constant 0 : index
    %21 = vector.load %arg3[%c3, %c0_23, %c0_24] : memref<9x64x32xbf16, #tpu.memory_space<vmem>>, vector<1x64x32xbf16>
    %22 = vector.shape_cast %21 : vector<1x64x32xbf16> to vector<64x32xbf16>
    %cst_25 = arith.constant dense<0.000000e+00> : vector<256x32xf32>
    %23 = tpu.matmul %20, %22, %cst_25 {dimension_numbers = #tpu.dot_dimension_numbers<[1], [0], [0], [1], [0, 0, 1, 1], [], []>} : vector<256x64xbf16>, vector<64x32xbf16>, vector<256x32xf32> -> vector<256x32xf32>
    %24 = arith.addf %19, %23 : vector<256x32xf32>
    %c9 = arith.constant 9 : index
    %c0_26 = arith.constant 0 : index
    %25 = vector.load %arg7[%c9, %c0_26] : memref<512x64xbf16, #tpu.memory_space<vmem>>, vector<256x64xbf16>
    %c4 = arith.constant 4 : index
    %c0_27 = arith.constant 0 : index
    %c0_28 = arith.constant 0 : index
    %26 = vector.load %arg3[%c4, %c0_27, %c0_28] : memref<9x64x32xbf16, #tpu.memory_space<vmem>>, vector<1x64x32xbf16>
    %27 = vector.shape_cast %26 : vector<1x64x32xbf16> to vector<64x32xbf16>
    %cst_29 = arith.constant dense<0.000000e+00> : vector<256x32xf32>
    %28 = tpu.matmul %25, %27, %cst_29 {dimension_numbers = #tpu.dot_dimension_numbers<[1], [0], [0], [1], [0, 0, 1, 1], [], []>} : vector<256x64xbf16>, vector<64x32xbf16>, vector<256x32xf32> -> vector<256x32xf32>
    %29 = arith.addf %24, %28 : vector<256x32xf32>
    %c10 = arith.constant 10 : index
    %c0_30 = arith.constant 0 : index
    %30 = vector.load %arg7[%c10, %c0_30] : memref<512x64xbf16, #tpu.memory_space<vmem>>, vector<256x64xbf16>
    %c5 = arith.constant 5 : index
    %c0_31 = arith.constant 0 : index
    %c0_32 = arith.constant 0 : index
    %31 = vector.load %arg3[%c5, %c0_31, %c0_32] : memref<9x64x32xbf16, #tpu.memory_space<vmem>>, vector<1x64x32xbf16>
    %32 = vector.shape_cast %31 : vector<1x64x32xbf16> to vector<64x32xbf16>
    %cst_33 = arith.constant dense<0.000000e+00> : vector<256x32xf32>
    %33 = tpu.matmul %30, %32, %cst_33 {dimension_numbers = #tpu.dot_dimension_numbers<[1], [0], [0], [1], [0, 0, 1, 1], [], []>} : vector<256x64xbf16>, vector<64x32xbf16>, vector<256x32xf32> -> vector<256x32xf32>
    %34 = arith.addf %29, %33 : vector<256x32xf32>
    %c16 = arith.constant 16 : index
    %c0_34 = arith.constant 0 : index
    %35 = vector.load %arg7[%c16, %c0_34] : memref<512x64xbf16, #tpu.memory_space<vmem>>, vector<256x64xbf16>
    %c6 = arith.constant 6 : index
    %c0_35 = arith.constant 0 : index
    %c0_36 = arith.constant 0 : index
    %36 = vector.load %arg3[%c6, %c0_35, %c0_36] : memref<9x64x32xbf16, #tpu.memory_space<vmem>>, vector<1x64x32xbf16>
    %37 = vector.shape_cast %36 : vector<1x64x32xbf16> to vector<64x32xbf16>
    %cst_37 = arith.constant dense<0.000000e+00> : vector<256x32xf32>
    %38 = tpu.matmul %35, %37, %cst_37 {dimension_numbers = #tpu.dot_dimension_numbers<[1], [0], [0], [1], [0, 0, 1, 1], [], []>} : vector<256x64xbf16>, vector<64x32xbf16>, vector<256x32xf32> -> vector<256x32xf32>
    %39 = arith.addf %34, %38 : vector<256x32xf32>
    %c17 = arith.constant 17 : index
    %c0_38 = arith.constant 0 : index
    %40 = vector.load %arg7[%c17, %c0_38] : memref<512x64xbf16, #tpu.memory_space<vmem>>, vector<256x64xbf16>
    %c7 = arith.constant 7 : index
    %c0_39 = arith.constant 0 : index
    %c0_40 = arith.constant 0 : index
    %41 = vector.load %arg3[%c7, %c0_39, %c0_40] : memref<9x64x32xbf16, #tpu.memory_space<vmem>>, vector<1x64x32xbf16>
    %42 = vector.shape_cast %41 : vector<1x64x32xbf16> to vector<64x32xbf16>
    %cst_41 = arith.constant dense<0.000000e+00> : vector<256x32xf32>
    %43 = tpu.matmul %40, %42, %cst_41 {dimension_numbers = #tpu.dot_dimension_numbers<[1], [0], [0], [1], [0, 0, 1, 1], [], []>} : vector<256x64xbf16>, vector<64x32xbf16>, vector<256x32xf32> -> vector<256x32xf32>
    %44 = arith.addf %39, %43 : vector<256x32xf32>
    %c18 = arith.constant 18 : index
    %c0_42 = arith.constant 0 : index
    %45 = vector.load %arg7[%c18, %c0_42] : memref<512x64xbf16, #tpu.memory_space<vmem>>, vector<256x64xbf16>
    %c8_43 = arith.constant 8 : index
    %c0_44 = arith.constant 0 : index
    %c0_45 = arith.constant 0 : index
    %46 = vector.load %arg3[%c8_43, %c0_44, %c0_45] : memref<9x64x32xbf16, #tpu.memory_space<vmem>>, vector<1x64x32xbf16>
    %47 = vector.shape_cast %46 : vector<1x64x32xbf16> to vector<64x32xbf16>
    %cst_46 = arith.constant dense<0.000000e+00> : vector<256x32xf32>
    %48 = tpu.matmul %45, %47, %cst_46 {dimension_numbers = #tpu.dot_dimension_numbers<[1], [0], [0], [1], [0, 0, 1, 1], [], []>} : vector<256x64xbf16>, vector<64x32xbf16>, vector<256x32xf32> -> vector<256x32xf32>
    %49 = arith.addf %44, %48 : vector<256x32xf32>
    %c0_47 = arith.constant 0 : index
    %c0_48 = arith.constant 0 : index
    %50 = vector.load %arg4[%c0_47, %c0_48] : memref<256x1xf32, #tpu.memory_space<vmem>>, vector<256x1xf32>
    %cst_49 = arith.constant 5.000000e-01 : f32
    %51 = vector.broadcast %cst_49 : f32 to vector<256x1xf32>
    %52 = arith.cmpf ogt, %50, %51 : vector<256x1xf32>
    %cst_50 = arith.constant 0.000000e+00 : f32
    %53 = vector.shape_cast %52 : vector<256x1xi1> to vector<256x1xi1>
    %54 = vector.broadcast %53 : vector<256x1xi1> to vector<256x32xi1>
    %55 = vector.broadcast %cst_50 : f32 to vector<256x32xf32>
    %56 = arith.select %54, %49, %55 : vector<256x32xi1>, vector<256x32xf32>
    %c0_51 = arith.constant 0 : index
    %c0_52 = arith.constant 0 : index
    %57 = vector.load %arg5[%c0_51, %c0_52] : memref<256x32xf32, #tpu.memory_space<vmem>>, vector<256x32xf32>
    tpu.vector_store %arg5[%c0_51, %c0_52], %56 {strides = array<i32>} : memref<256x32xf32, #tpu.memory_space<vmem>>, vector<256x32xf32>,
    %cst_53 = arith.constant dense<0.000000e+00> : vector<32xf32>
    %58 = vector.multi_reduction <add>, %56, %cst_53 [0] : vector<256x32xf32> to vector<32xf32>
    %59 = vector.shape_cast %58 : vector<32xf32> to vector<1x32xf32>
    %60 = arith.mulf %56, %56 : vector<256x32xf32>
    %cst_54 = arith.constant dense<0.000000e+00> : vector<32xf32>
    %61 = vector.multi_reduction <add>, %60, %cst_54 [0] : vector<256x32xf32> to vector<32xf32>
    %62 = vector.shape_cast %61 : vector<32xf32> to vector<1x32xf32>
    %cst_55 = arith.constant 0.000000e+00 : f32
    %63 = vector.broadcast %cst_55 : f32 to vector<6x32xf32>
    %64 = tpu.concatenate %59, %62, %63 in 0 : vector<1x32xf32>, vector<1x32xf32>, vector<6x32xf32> -> vector<8x32xf32>
    %65 = vector.shape_cast %64 : vector<8x32xf32> to vector<1x8x32xf32>
    %c0_56 = arith.constant 0 : index
    %c0_57 = arith.constant 0 : index
    %c0_58 = arith.constant 0 : index
    %66 = vector.load %arg6[%c0_56, %c0_57, %c0_58] : memref<1x8x32xf32, #tpu.memory_space<vmem>>, vector<1x8x32xf32>
    tpu.vector_store %arg6[%c0_56, %c0_57, %c0_58], %65 {strides = array<i32>} : memref<1x8x32xf32, #tpu.memory_space<vmem>>, vector<1x8x32xf32>,
    return
  }
  func.func @transform_0(%arg0: i32) -> (i32, i32) {
    %c0_i32 = arith.constant 0 : i32
    %c0_i32_0 = arith.constant 0 : i32
    return %arg0, %c0_i32 : i32, i32
  }
  func.func @transform_1(%arg0: i32) -> (i32, i32) {
    %c1_i32 = arith.constant 1 : i32
    %0 = arith.addi %arg0, %c1_i32 : i32
    %c0_i32 = arith.constant 0 : i32
    %c0_i32_0 = arith.constant 0 : i32
    return %0, %c0_i32 : i32, i32
  }
  func.func @transform_2(%arg0: i32) -> (i32, i32, i32) {
    %c0_i32 = arith.constant 0 : i32
    %c0_i32_0 = arith.constant 0 : i32
    %c0_i32_1 = arith.constant 0 : i32
    %c0_i32_2 = arith.constant 0 : i32
    return %c0_i32, %c0_i32_0, %c0_i32_1 : i32, i32, i32
  }
  func.func @transform_3(%arg0: i32) -> (i32, i32) {
    %c0_i32 = arith.constant 0 : i32
    %c0_i32_0 = arith.constant 0 : i32
    return %arg0, %c0_i32 : i32, i32
  }
  func.func @transform_4(%arg0: i32) -> (i32, i32) {
    %c0_i32 = arith.constant 0 : i32
    %c0_i32_0 = arith.constant 0 : i32
    return %arg0, %c0_i32 : i32, i32
  }
  func.func @transform_5(%arg0: i32) -> (i32, i32, i32) {
    %c0_i32 = arith.constant 0 : i32
    %c0_i32_0 = arith.constant 0 : i32
    %c0_i32_1 = arith.constant 0 : i32
    return %arg0, %c0_i32, %c0_i32_0 : i32, i32, i32
  }
}

module attributes {stable_mosaic.version = 11 : i64} {
  func.func @bn_relu_kernel(%arg0: i32, %arg1: memref<64x128xf32, #tpu.memory_space<vmem>>, %arg2: memref<1x128xf32, #tpu.memory_space<vmem>>, %arg3: memref<1x128xf32, #tpu.memory_space<vmem>>, %arg4: memref<64x128xf32, #tpu.memory_space<vmem>>) attributes {dimension_semantics = [#tpu.dimension_semantics<parallel>], iteration_bounds = array<i64: 1>, scalar_prefetch = 0 : i64, scratch_operands = 0 : i64, tpu.core_type = #tpu.core_type<tc>, window_params = [{transform_indices = @transform_0, window_bounds = array<i64: 64, 128>}, {pipeline_mode = #tpu.pipeline_mode<synchronous>, transform_indices = @transform_1, window_bounds = array<i64: 1, 128>}, {pipeline_mode = #tpu.pipeline_mode<synchronous>, transform_indices = @transform_2, window_bounds = array<i64: 1, 128>}, {transform_indices = @transform_3, window_bounds = array<i64: 64, 128>}]} {
    %c0 = arith.constant 0 : index
    %c0_0 = arith.constant 0 : index
    %0 = vector.load %arg1[%c0, %c0_0] : memref<64x128xf32, #tpu.memory_space<vmem>>, vector<64x128xf32>
    %c0_1 = arith.constant 0 : index
    %c0_2 = arith.constant 0 : index
    %1 = vector.load %arg2[%c0_1, %c0_2] : memref<1x128xf32, #tpu.memory_space<vmem>>, vector<1x128xf32>
    %2 = vector.broadcast %1 : vector<1x128xf32> to vector<64x128xf32>
    %3 = arith.mulf %0, %2 : vector<64x128xf32>
    %c0_3 = arith.constant 0 : index
    %c0_4 = arith.constant 0 : index
    %4 = vector.load %arg3[%c0_3, %c0_4] : memref<1x128xf32, #tpu.memory_space<vmem>>, vector<1x128xf32>
    %5 = vector.broadcast %4 : vector<1x128xf32> to vector<64x128xf32>
    %6 = arith.addf %3, %5 : vector<64x128xf32>
    %cst = arith.constant 0.000000e+00 : f32
    %7 = vector.broadcast %cst : f32 to vector<64x128xf32>
    %8 = arith.maximumf %6, %7 : vector<64x128xf32>
    %c0_5 = arith.constant 0 : index
    %c0_6 = arith.constant 0 : index
    %9 = vector.load %arg4[%c0_5, %c0_6] : memref<64x128xf32, #tpu.memory_space<vmem>>, vector<64x128xf32>
    tpu.vector_store %arg4[%c0_5, %c0_6], %8 {strides = array<i32>} : memref<64x128xf32, #tpu.memory_space<vmem>>, vector<64x128xf32>,
    return
  }
  func.func @transform_0(%arg0: i32) -> (i32, i32) {
    %c0_i32 = arith.constant 0 : i32
    %c0_i32_0 = arith.constant 0 : i32
    return %arg0, %c0_i32 : i32, i32
  }
  func.func @transform_1(%arg0: i32) -> (i32, i32) {
    %c0_i32 = arith.constant 0 : i32
    %c0_i32_0 = arith.constant 0 : i32
    %c0_i32_1 = arith.constant 0 : i32
    return %c0_i32, %c0_i32_0 : i32, i32
  }
  func.func @transform_2(%arg0: i32) -> (i32, i32) {
    %c0_i32 = arith.constant 0 : i32
    %c0_i32_0 = arith.constant 0 : i32
    %c0_i32_1 = arith.constant 0 : i32
    return %c0_i32, %c0_i32_0 : i32, i32
  }
  func.func @transform_3(%arg0: i32) -> (i32, i32) {
    %c0_i32 = arith.constant 0 : i32
    %c0_i32_0 = arith.constant 0 : i32
    return %arg0, %c0_i32 : i32, i32
  }
}

</mosaic_0001>

<bundles_post_ra>
// kernel: intro_block_forward.5
= control target key start
LH: loop header
LB: loop body
LE: loop exit
PB: predicated region body
PF: predicated region fallthrough
CT: control target
= control target key end

     0   :  { %s522_s12 = smov 0   ;;  %s658_s0 = inlined_call_operand.vmem [shape: f32[32,2,8,64], index: 0, kind: input, shape index: {}]   ;;  %s659_s1 = inlined_call_operand.vmem [shape: f32[1,1,1,64], index: 1, kind: input, shape index: {}]   ;;  %s660_s2 = inlined_call_operand.vmem [shape: f32[1,1,1,64], index: 2, kind: input, shape index: {}]   ;;  %s661_s3 = inlined_call_operand.vmem [shape: bf16[12,8,64], index: 3, kind: output, shape index: {}]  }
   0x1 LB: > { %s473_s13 = sadd.s32 4294967295, %s500_s12   ;;  %p477_p0 = scmp.ge.s32.totalorder %s500_s12, 1  ;;  %s500_s12 = sphi %s522_s12, %s13_s12  }
   0x2   : > { %p149_p1 = scmp.lt.s32.totalorder %s500_s12, 3 }
   0x4   : > { %p150_p2 = pnand %p477_p0, %p149_p1 }
   0x5   : > { %s179_s14 = smul.u32 (!%p150_p2), 13, %s473_s13 }
   0x6   : > { %153 = sbr.rel (%p150_p2) target bundleno = 60 (0x3c), region = 32 }
   0x7   : > { %p185_p3 = scmp.lt.s32.totalorder (!%p150_p2), %s179_s14, 31  ;;  %s548_s23 = smul.u32 (!%p150_p2), 6, %s473_s13 }
   0x9   : > { %p197_p4 = scmp.lt.s32.totalorder (!%p150_p2), %s548_s23, 11 }
   0xb   : > { %s663_s14 = smov (!%p185_p3, %s179_s14), 31  ;;  %v533_v0 = vld [vmem:[%s659_s1] ss:$0 sm:$0xff]  ;;  %vm397_vm0 = vcmask 1045504   ;;  %vm410_vm1 = vcmask 519168   ;;  %s665_s23 = smov (!%p197_p4, %s548_s23), 11 }
   0xc   : > { %s485_s15 = sshll.u32 %s663_s14, 4  ;;  %v543_v1 = vld [vmem:[%s660_s2] ss:$0 sm:$0xff]  ;;  %s480_s24 = sshll.u32 %s665_s23, 2 }
   0xd   : > { %s538_s20 = scalar_lea.vmem %s658_s0, %s485_s15  ;;  %s603_s27 = scalar_lea.vmem %s661_s3, %s480_s24 }
   0xe   : > { %v202_v2 = vld [vmem:[%s538_s20] sm:$0xff]  ;;  %v203_v3 = vld [vmem:[%s538_s20 + $0x8] sm:$0xff]  ;;  %v204_v4 = vld [vmem:[%s538_s20 + $0x10] sm:$0xff] }
   0xf   : > { %v205_v5 = vld [vmem:[%s538_s20 + $0x18] sm:$0xff]  ;;  %v206_v6 = vld [vmem:[%s538_s20 + $0x20] sm:$0xff]  ;;  %v207_v7 = vld [vmem:[%s538_s20 + $0x28] sm:$0xff]  ;;  %v235_v8 = vmul.f32 %v533_v0, %v202_v2  ;;  %v236_v9 = vmul.f32 %v533_v0, %v203_v3  ;;  %v237_v10 = vmul.f32 %v533_v0, %v204_v4 }
  0x10   : > { %v238_v11 = vmul.f32 %v533_v0, %v205_v5  ;;  %v239_v12 = vmul.f32 %v533_v0, %v206_v6  ;;  %v240_v13 = vmul.f32 %v533_v0, %v207_v7  ;;  %v208_v14 = vld [vmem:[%s538_s20 + $0x30] sm:$0xff]  ;;  %v209_v15 = vld [vmem:[%s538_s20 + $0x38] sm:$0xff]  ;;  %v210_v16 = vld [vmem:[%s538_s20 + $0x40] sm:$0xff] }
  0x11   : > { %v268_v17 = vadd.f32 %v543_v1, %v235_v8  ;;  %v269_v18 = vadd.f32 %v543_v1, %v236_v9  ;;  %v270_v19 = vadd.f32 %v543_v1, %v237_v10  ;;  %v211_v20 = vld [vmem:[%s538_s20 + $0x48] sm:$0xff]  ;;  %v241_v21 = vmul.f32 %v533_v0, %v208_v14  ;;  %v212_v38 = vld [vmem:[%s538_s20 + $0x50] sm:$0xff]  ;;  %v213_v43 = vld [vmem:[%s538_s20 + $0x58] sm:$0xff] }
  0x12   : > { %v271_v22 = vadd.f32 %v543_v1, %v238_v11  ;;  %v272_v23 = vadd.f32 %v543_v1, %v239_v12  ;;  %v273_v24 = vadd.f32 %v543_v1, %v240_v13  ;;  %v242_v25 = vmul.f32 %v533_v0, %v209_v15  ;;  %v214_v48 = vld [vmem:[%s538_s20 + $0x60] sm:$0xff]  ;;  %v215_v49 = vld [vmem:[%s538_s20 + $0x68] sm:$0xff]  ;;  %v216_v62 = vld [vmem:[%s538_s20 + $0x70] sm:$0xff] }
  0x13   : > { %v294_v26 = vmax.f32 %v268_v17, 0.0  ;;  %v295_v27 = vmax.f32 %v269_v18, 0.0  ;;  %v296_v28 = vmax.f32 %v270_v19, 0.0  ;;  %v243_v29 = vmul.f32 %v533_v0, %v210_v16  ;;  %v217_v9 = vld [vmem:[%s538_s20 + $0x78] sm:$0xff]  ;;  %v218_v13 = vld [vmem:[%s538_s20 + $0x80] sm:$0xff]  ;;  %v219_v19 = vld [vmem:[%s538_s20 + $0x88] sm:$0xff] }
  0x14   : > { %v297_v30 = vmax.f32 %v271_v22, 0.0  ;;  %v298_v31 = vmax.f32 %v272_v23, 0.0  ;;  %v299_v32 = vmax.f32 %v273_v24, 0.0  ;;  %v244_v33 = vmul.f32 %v533_v0, %v211_v20  ;;  %v220_v24 = vld [vmem:[%s538_s20 + $0x90] sm:$0xff] }
  0x15   : > { %v320_v34 = vmax.f32 %v294_v26, %v295_v27  ;;  %v346_v35 = vrot.slane %v294_v26, 1  ;;  %v347_v36 = vrot.slane %v296_v28, 1  ;;  %v274_v37 = vadd.f32 %v543_v1, %v241_v21 }
  0x16   : > { %v321_v39 = vmax.f32 %v296_v28, %v297_v30  ;;  %v322_v40 = vmax.f32 %v298_v31, %v299_v32  ;;  %v348_v41 = vrot.slane %v298_v31, 1  ;;  %v275_v42 = vadd.f32 %v543_v1, %v242_v25 }
  0x17   : > { %v372_v44 = vmax.f32 %v320_v34, %v346_v35  ;;  %v276_v45 = vadd.f32 %v543_v1, %v243_v29  ;;  %v277_v46 = vadd.f32 %v543_v1, %v244_v33  ;;  %v300_v47 = vmax.f32 %v274_v37, 0.0  ;;  %v221_v33 = vld [vmem:[%s538_s20 + $0x98] sm:$0xff]  ;;  %v222_v34 = vld [vmem:[%s538_s20 + $0xa0] sm:$0xff] }
  0x18   : > { %v373_v50 = vmax.f32 %v321_v39, %v347_v36  ;;  %v374_v51 = vmax.f32 %v322_v40, %v348_v41  ;;  %v301_v52 = vmax.f32 %v275_v42, 0.0  ;;  %v245_v53 = vmul.f32 %v533_v0, %v212_v38  ;;  %v223_v38 = vld [vmem:[%s538_s20 + $0xa8] sm:$0xff] }
  0x19   : > { %v302_v54 = vmax.f32 %v276_v45, 0.0  ;;  %v303_v55 = vmax.f32 %v277_v46, 0.0  ;;  %v349_v56 = vrot.slane %v300_v47, 1  ;;  %v246_v57 = vmul.f32 %v533_v0, %v213_v43 }
  0x1a   : > { %v385_v58 = vmax.f32 %v372_v44, %v373_v50  ;;  %v323_v59 = vmax.f32 %v300_v47, %v301_v52  ;;  %v247_v60 = vmul.f32 %v533_v0, %v214_v48  ;;  %v248_v61 = vmul.f32 %v533_v0, %v215_v49 }
  0x1b   : > { %v324_v63 = vmax.f32 %v302_v54, %v303_v55  ;;  %v350_v2 = vrot.slane %v302_v54, 1  ;;  %v278_v3 = vadd.f32 %v543_v1, %v245_v53  ;;  %v279_v4 = vadd.f32 %v543_v1, %v246_v57 }
  0x1c   : > { %v391_v5 = vmax.f32 %v385_v58, %v374_v51  ;;  %v375_v6 = vmax.f32 %v323_v59, %v349_v56  ;;  %v280_v7 = vadd.f32 %v543_v1, %v247_v60  ;;  %v281_v8 = vadd.f32 %v543_v1, %v248_v61  ;;  %v224_v56 = vld [vmem:[%s538_s20 + $0xb0] sm:$0xff]  ;;  %v225_v61 = vld [vmem:[%s538_s20 + $0xb8] sm:$0xff] }
  0x1d   : > { %v376_v10 = vmax.f32 %v324_v63, %v350_v2  ;;  %v304_v11 = vmax.f32 %v278_v3, 0.0  ;;  %v305_v12 = vmax.f32 %v279_v4, 0.0  ;;  %v249_v14 = vmul.f32 %v533_v0, %v216_v62  ;;  %v226_v4 = vld [vmem:[%s538_s20 + $0xc0] sm:$0xff] }
  0x1e   : > { %v398_v15 = vsel %vm397_vm0, %v391_v5, 0.0  ;;  %v386_v16 = vmax.f32 %v374_v51, %v375_v6  ;;  %v306_v17 = vmax.f32 %v280_v7, 0.0  ;;  %v307_v18 = vmax.f32 %v281_v8, 0.0  ;;  %v227_v5 = vld [vmem:[%s538_s20 + $0xc8] sm:$0xff] }
  0x1f   : > { %v404_v20 = vpack.c.bf16 %v398_v15, %v398_v15  ;;  %v325_v21 = vmax.f32 %v304_v11, %v305_v12  ;;  %v351_v22 = vrot.slane %v304_v11, 1  ;;  %v250_v23 = vmul.f32 %v533_v0, %v217_v9 }
  0x20   : > { %v392_v25 = vmax.f32 %v386_v16, %v376_v10  ;;  %v326_v26 = vmax.f32 %v306_v17, %v307_v18  ;;  %v352_v27 = vrot.slane %v306_v17, 1  ;;  %v251_v28 = vmul.f32 %v533_v0, %v218_v13 }
  0x21   : > { %411 = vst.msk [vmem:[%s603_s27] sm:$0xf] %vm410_vm1, %v404_v20  ;;  %v377_v29 = vmax.f32 %v325_v21, %v351_v22  ;;  %v252_v30 = vmul.f32 %v533_v0, %v219_v19  ;;  %v282_v31 = vadd.f32 %v543_v1, %v249_v14  ;;  %v283_v32 = vadd.f32 %v543_v1, %v250_v23 }
  0x22   : > { %v399_v35 = vsel %vm397_vm0, %v392_v25, 0.0  ;;  %v378_v36 = vmax.f32 %v326_v26, %v352_v27  ;;  %v284_v37 = vadd.f32 %v543_v1, %v251_v28  ;;  %v253_v39 = vmul.f32 %v533_v0, %v220_v24 }
  0x23   : > { %v405_v40 = vpack.c.bf16 %v399_v35, %v399_v35  ;;  %v387_v41 = vmax.f32 %v376_v10, %v377_v29  ;;  %v285_v42 = vadd.f32 %v543_v1, %v252_v30  ;;  %v308_v43 = vmax.f32 %v282_v31, 0.0 }
  0x24   : > { %v309_v44 = vmax.f32 %v283_v32, 0.0  ;;  %v310_v45 = vmax.f32 %v284_v37, 0.0  ;;  %v254_v46 = vmul.f32 %v533_v0, %v221_v33  ;;  %v255_v47 = vmul.f32 %v533_v0, %v222_v34 }
  0x25   : > { %412 = vst.msk [vmem:[%s603_s27 + $0x4] sm:$0xf] %vm410_vm1, %v405_v40  ;;  %v393_v48 = vmax.f32 %v387_v41, %v378_v36  ;;  %v311_v49 = vmax.f32 %v285_v42, 0.0  ;;  %v353_v50 = vrot.slane %v308_v43, 1  ;;  %v256_v51 = vmul.f32 %v533_v0, %v223_v38 }
  0x26   : > { %v327_v52 = vmax.f32 %v308_v43, %v309_v44  ;;  %v354_v53 = vrot.slane %v310_v45, 1  ;;  %v286_v54 = vadd.f32 %v543_v1, %v253_v39  ;;  %v287_v55 = vadd.f32 %v543_v1, %v254_v46 }
  0x27   : > { %v400_v57 = vsel %vm397_vm0, %v393_v48, 0.0  ;;  %v328_v58 = vmax.f32 %v310_v45, %v311_v49  ;;  %v288_v59 = vadd.f32 %v543_v1, %v255_v47  ;;  %v289_v60 = vadd.f32 %v543_v1, %v256_v51 }
  0x28   : > { %v406_v62 = vpack.c.bf16 %v400_v57, %v400_v57  ;;  %v379_v63 = vmax.f32 %v327_v52, %v353_v50  ;;  %v312_v2 = vmax.f32 %v286_v54, 0.0  ;;  %v313_v3 = vmax.f32 %v287_v55, 0.0 }
  0x29   : > { %v380_v6 = vmax.f32 %v328_v58, %v354_v53  ;;  %v314_v7 = vmax.f32 %v288_v59, 0.0  ;;  %v315_v8 = vmax.f32 %v289_v60, 0.0  ;;  %v257_v9 = vmul.f32 %v533_v0, %v224_v56 }
  0x2a   : > { %413 = vst.msk [vmem:[%s603_s27 + $0x8] sm:$0xf] %vm410_vm1, %v406_v62  ;;  %v388_v10 = vmax.f32 %v378_v36, %v379_v63  ;;  %v329_v11 = vmax.f32 %v312_v2, %v313_v3  ;;  %v355_v12 = vrot.slane %v312_v2, 1  ;;  %v258_v13 = vmul.f32 %v533_v0, %v225_v61 }
  0x2b   : > { %v330_v14 = vmax.f32 %v314_v7, %v315_v8  ;;  %v356_v15 = vrot.slane %v314_v7, 1  ;;  %v259_v16 = vmul.f32 %v533_v0, %v226_v4  ;;  %v260_v17 = vmul.f32 %v533_v0, %v227_v5 }
  0x2c   : > { %v394_v18 = vmax.f32 %v388_v10, %v380_v6  ;;  %v381_v19 = vmax.f32 %v329_v11, %v355_v12  ;;  %v290_v20 = vadd.f32 %v543_v1, %v257_v9  ;;  %v291_v21 = vadd.f32 %v543_v1, %v258_v13 }
  0x2d   : > { %v382_v22 = vmax.f32 %v330_v14, %v356_v15  ;;  %v292_v23 = vadd.f32 %v543_v1, %v259_v16  ;;  %v293_v24 = vadd.f32 %v543_v1, %v260_v17 }
  0x2e   : > { %v401_v25 = vsel %vm397_vm0, %v394_v18, 0.0  ;;  %v389_v26 = vmax.f32 %v380_v6, %v381_v19  ;;  %v316_v27 = vmax.f32 %v290_v20, 0.0  ;;  %v317_v28 = vmax.f32 %v291_v21, 0.0 }
  0x2f   : > { %v407_v29 = vpack.c.bf16 %v401_v25, %v401_v25  ;;  %v318_v0 = vmax.f32 %v292_v23, 0.0  ;;  %v319_v30 = vmax.f32 %v293_v24, 0.0 }
  0x30   : > { %v395_v31 = vmax.f32 %v389_v26, %v382_v22  ;;  %v331_v32 = vmax.f32 %v316_v27, %v317_v28  ;;  %v357_v33 = vrot.slane %v316_v27, 1 }
  0x31   : > { %414 = vst.msk [vmem:[%s603_s27 + $0xc] sm:$0xf] %vm410_vm1, %v407_v29  ;;  %v332_v34 = vmax.f32 %v318_v0, %v319_v30  ;;  %v358_v35 = vrot.slane %v318_v0, 1 }
  0x32   : > { %v402_v36 = vsel %vm397_vm0, %v395_v31, 0.0  ;;  %v383_v1 = vmax.f32 %v331_v32, %v357_v33 }
  0x33   : > { %v408_v37 = vpack.c.bf16 %v402_v36, %v402_v36  ;;  %v384_v38 = vmax.f32 %v332_v34, %v358_v35 }
  0x34   : > { %v390_v39 = vmax.f32 %v382_v22, %v383_v1 }
  0x35   : > { %415 = vst.msk [vmem:[%s603_s27 + $0x10] sm:$0xf] %vm410_vm1, %v408_v37 }
  0x36   : > { %v396_v40 = vmax.f32 %v390_v39, %v384_v38 }
  0x38   : > { %v403_v41 = vsel %vm397_vm0, %v396_v40, 0.0 }
  0x39   : > { %v409_v42 = vpack.c.bf16 %v403_v41, %v403_v41 }
  0x3b   : > { %416 = vst.msk [vmem:[%s603_s27 + $0x14] sm:$0xf] %vm410_vm1, %v409_v42 }
  0x3c PF: > { %s13_s12 = sadd.s32 1, %s500_s12  }
  0x3d   : > { %p10_p5 = scmp.ge.s32.totalorder %s13_s12, 4  }
  0x3f   :  { %12 = sbr.rel (!%p10_p5) target bundleno = 1 (0x1), region = 62 }

// kernel: intro_block_forward.4
= control target key start
LH: loop header
LB: loop body
LE: loop exit
PB: predicated region body
PF: predicated region fallthrough
CT: control target
= control target key end

     0   :  { %s1255_s12 = smov 0   ;;  %s1608_s0 = inlined_call_operand.vmem [shape: bf16[512,256], index: 0, kind: input, shape index: {}]   ;;  %s1609_s1 = inlined_call_operand.vmem [shape: bf16[256,64], index: 1, kind: input, shape index: {}]   ;;  %s1610_s2 = inlined_call_operand.vmem [shape: f32[512,64], index: 2, kind: output, shape index: {0}]   ;;  %s1611_s3 = inlined_call_operand.vmem [shape: f32[2,8,64], index: 3, kind: output, shape index: {1}]  }
   0x1 LB: > { %s1261_s13 = sadd.s32 4294967295, %s1233_s12   ;;  %p969_p0 = scmp.ge.s32.totalorder %s1233_s12, 1  ;;  %s1233_s12 = sphi %s1255_s12, %s14_s12  }
   0x2   : > { %p142_p1 = scmp.lt.s32.totalorder %s1233_s12, 3 }
   0x4   : > { %p143_p2 = pnand %p969_p0, %p142_p1 }
   0x5   : > { %s970_s16 = sshll.u32 (!%p143_p2), %s1261_s13, 5  ;;  %p184_p4 = scmp.lt.s32.totalorder (!%p143_p2), %s1261_s13, 1 }
   0x6   : > { %146 = sbr.rel (%p143_p2) target bundleno = 353 (0x161), region = 28  ;;  %p172_p3 = scmp.lt.s32.totalorder (!%p143_p2), %s970_s16, 63 }
   0xb   : > { %v1163_v0 = vld [vmem:[%s1609_s1 + $0x78] sm:$0xff]   ;;  %v1165_v2 = vld [vmem:[%s1609_s1 + $0x70] sm:$0xff]   ;;  %v1167_v4 = vld [vmem:[%s1609_s1 + $0x68] sm:$0xff]   ;;  %s1613_s16 = smov (!%p172_p3, %s970_s16), 63  ;;  %vm670_vm0 = vcmask 523264   ;;  %s1615_s13 = smov (!%p184_p4, %s1261_s13), 1 }
   0xc   : > { %v1164_v1 = vld [vmem:[%s1609_s1 + $0x38] sm:$0xff]   ;;  %1027 = vmatprep.subr.bf16.mxu0 %v1163_v0  ;;  %1139 = vmatprep.subr.bf16.mxu1 %v1163_v0  ;;  %v1166_v3 = vld [vmem:[%s1609_s1 + $0x30] sm:$0xff]   ;;  %v1168_v5 = vld [vmem:[%s1609_s1 + $0x28] sm:$0xff]   ;;  %s1026_s4 = sshll.u32 %s1613_s16, 3  ;;  %s975_s16 = sshll.u32 %s1615_s13, 3  ;;  %vm873_vm1 = vcmask 1040384  }
   0xd   : > { %1028 = vmatpush3.bf16.msra.mxu0 %v1164_v1  ;;  %1147 = vmatpush3.bf16.msra.mxu1 %v1164_v1  ;;  %v1169_v6 = vld [vmem:[%s1609_s1 + $0x60] sm:$0xff]   ;;  %v1171_v8 = vld [vmem:[%s1609_s1 + $0x58] sm:$0xff]   ;;  %s1301_s9 = scalar_lea.vmem %s1608_s0, %s1026_s4  ;;  %v1173_v10 = vld [vmem:[%s1609_s1 + $0x50] sm:$0xff]   ;;  %s1361_s29 = scalar_lea.vmem %s1610_s2, %s1026_s4  ;;  %vm875_vm2 = vcmask 1041408  }
   0xe   : > { %1029 = vmatprep.subr.bf16.mxu0 %v1165_v2  ;;  %1140 = vmatprep.subr.bf16.mxu1 %v1165_v2  ;;  %v1170_v7 = vld [vmem:[%s1609_s1 + $0x20] sm:$0xff]   ;;  %v1172_v9 = vld [vmem:[%s1609_s1 + $0x18] sm:$0xff]   ;;  %v1174_v12 = vld [vmem:[%s1609_s1 + $0x10] sm:$0xff]   ;;  %s187_s5 = scalar_lea.vmem %s1611_s3, %s975_s16 }
   0xf   : > { %v1181_v11 = vld [vmem:[%s1301_s9 + $0x4] ss:$8 sps:$4 sm:$0xff]   ;;  %v1179_v18 = vld [vmem:[%s1301_s9] ss:$8 sps:$4 sm:$0xff]   ;;  %v1182_v19 = vld [vmem:[%s1301_s9 + $0x14] ss:$8 sps:$4 sm:$0xff]  }
  0x10   : > { %541 = vmatprep.mubr.bf16.mxu0 %v1181_v11  ;;  %v1175_v13 = vld [vmem:[%s1609_s1 + $0x48] sm:$0xff]   ;;  %v1177_v16 = vld [vmem:[%s1609_s1 + $0x40] sm:$0xff]   ;;  %v1197_v21 = vld [vmem:[%s1301_s9 + $0x94] ss:$8 sps:$4 sm:$0xff]  }
  0x11   : > { %1030 = vmatpush3.bf16.msra.mxu0 %v1166_v3  ;;  %1148 = vmatpush3.bf16.msra.mxu1 %v1166_v3  ;;  %v1193_v14 = vld [vmem:[%s1301_s9 + $0x84] ss:$8 sps:$4 sm:$0xff]   ;;  %v1191_v20 = vld [vmem:[%s1301_s9 + $0x80] ss:$8 sps:$4 sm:$0xff]   ;;  %v1184_v22 = vld [vmem:[%s1301_s9 + $0x10] ss:$8 sps:$4 sm:$0xff]  }
  0x12   : > { %1031 = vmatprep.subr.bf16.mxu0 %v1167_v4  ;;  %1141 = vmatprep.subr.bf16.mxu1 %v1167_v4  ;;  %v1176_v15 = vld [vmem:[%s1609_s1 + $0x8] sm:$0xff]   ;;  %v1178_v17 = vld [vmem:[%s1609_s1] sm:$0xff]   ;;  %v1199_v24 = vld [vmem:[%s1301_s9 + $0x90] ss:$8 sps:$4 sm:$0xff]  }
  0x13   : > { %605 = vmatprep.mubr.bf16.mxu1 %v1193_v14  ;;  %v1185_v23 = vld [vmem:[%s1301_s9 + $0x24] ss:$8 sps:$4 sm:$0xff]   ;;  %v1187_v26 = vld [vmem:[%s1301_s9 + $0x20] ss:$8 sps:$4 sm:$0xff]   ;;  %v1188_v27 = vld [vmem:[%s1301_s9 + $0x34] ss:$8 sps:$4 sm:$0xff]  }
  0x14   : > { %v1203_v25 = vld [vmem:[%s1301_s9 + $0xa4] ss:$8 sps:$4 sm:$0xff]   ;;  %v1205_v28 = vld [vmem:[%s1301_s9 + $0xa0] ss:$8 sps:$4 sm:$0xff]   ;;  %v1209_v29 = vld [vmem:[%s1301_s9 + $0xb4] ss:$8 sps:$4 sm:$0xff]  }
  0x15   : > { %1032 = vmatpush3.bf16.msra.mxu0 %v1168_v5  ;;  %1149 = vmatpush3.bf16.msra.mxu1 %v1168_v5  ;;  %v1190_v30 = vld [vmem:[%s1301_s9 + $0x30] ss:$8 sps:$4 sm:$0xff]   ;;  %v1194_v31 = vld [vmem:[%s1301_s9 + $0x44] ss:$8 sps:$4 sm:$0xff]   ;;  %v1196_v34 = vld [vmem:[%s1301_s9 + $0x40] ss:$8 sps:$4 sm:$0xff]  }
  0x16   : > { %1033 = vmatprep.subr.bf16.mxu0 %v1169_v6  ;;  %1142 = vmatprep.subr.bf16.mxu1 %v1169_v6  ;;  %v1211_v32 = vld [vmem:[%s1301_s9 + $0xb0] ss:$8 sps:$4 sm:$0xff]   ;;  %v1215_v33 = vld [vmem:[%s1301_s9 + $0xc4] ss:$8 sps:$4 sm:$0xff]   ;;  %v1200_v35 = vld [vmem:[%s1301_s9 + $0x54] ss:$8 sps:$4 sm:$0xff]  }
  0x17   : > { %v1217_v36 = vld [vmem:[%s1301_s9 + $0xc0] ss:$8 sps:$4 sm:$0xff]   ;;  %v1218_v37 = vld [vmem:[%s1301_s9 + $0xd4] ss:$8 sps:$4 sm:$0xff]   ;;  %v1202_v38 = vld [vmem:[%s1301_s9 + $0x50] ss:$8 sps:$4 sm:$0xff]  }
  0x18   : > { %v1206_v39 = vld [vmem:[%s1301_s9 + $0x64] ss:$8 sps:$4 sm:$0xff]   ;;  %v1220_v40 = vld [vmem:[%s1301_s9 + $0xd0] ss:$8 sps:$4 sm:$0xff]   ;;  %v1208_v42 = vld [vmem:[%s1301_s9 + $0x60] ss:$8 sps:$4 sm:$0xff]  }
  0x19   : > { %1034 = vmatpush3.bf16.msra.mxu0 %v1170_v7  ;;  %1150 = vmatpush3.bf16.msra.mxu1 %v1170_v7  ;;  %v1221_v41 = vld [vmem:[%s1301_s9 + $0xe4] ss:$8 sps:$4 sm:$0xff]   ;;  %v1212_v43 = vld [vmem:[%s1301_s9 + $0x74] ss:$8 sps:$4 sm:$0xff]   ;;  %v1223_v44 = vld [vmem:[%s1301_s9 + $0xe0] ss:$8 sps:$4 sm:$0xff]  }
  0x1a   : > { %1035 = vmatprep.subr.bf16.mxu0 %v1171_v8  ;;  %1143 = vmatprep.subr.bf16.mxu1 %v1171_v8  ;;  %v1224_v45 = vld [vmem:[%s1301_s9 + $0xf4] ss:$8 sps:$4 sm:$0xff]   ;;  %v1214_v46 = vld [vmem:[%s1301_s9 + $0x70] ss:$8 sps:$4 sm:$0xff]  }
  0x1b   : > { %v1226_v47 = vld [vmem:[%s1301_s9 + $0xf0] ss:$8 sps:$4 sm:$0xff]  }
  0x1d   : > { %1036 = vmatpush3.bf16.msra.mxu0 %v1172_v9  ;;  %1151 = vmatpush3.bf16.msra.mxu1 %v1172_v9 }
  0x1e   : > { %1037 = vmatprep.subr.bf16.mxu0 %v1173_v10  ;;  %1144 = vmatprep.subr.bf16.mxu1 %v1173_v10 }
  0x21   : > { %1038 = vmatpush3.bf16.msra.mxu0 %v1174_v12  ;;  %1152 = vmatpush3.bf16.msra.mxu1 %v1174_v12 }
  0x22   : > { %1039 = vmatprep.subr.bf16.mxu0 %v1175_v13  ;;  %1145 = vmatprep.subr.bf16.mxu1 %v1175_v13 }
  0x25   : > { %1040 = vmatpush3.bf16.msra.mxu0 %v1176_v15  ;;  %1153 = vmatpush3.bf16.msra.mxu1 %v1176_v15 }
  0x26   : > { %1041 = vmatprep.subr.bf16.mxu0 %v1177_v16  ;;  %1146 = vmatprep.subr.bf16.mxu1 %v1177_v16 }
  0x29   : > { %1042 = vmatpush3.bf16.msra.mxu0 %v1178_v17  ;;  %1154 = vmatpush3.bf16.msra.mxu1 %v1178_v17 }
  0x2c   : > { %542 = vmatmul.mubr.bf16.vlgmr.msra.gmra.mxu0 %v1179_v18  ;;  %606 = vmatmul.mubr.bf16.vlgmr.msra.gmra.mxu1 %v1191_v20 }
  0x2d   : > { %549 = vmatprep.mubr.bf16.mxu0 %v1182_v19  ;;  %613 = vmatprep.mubr.bf16.mxu1 %v1197_v21 }
  0x34   : > { %550 = vmatmul.mubr.bf16.gmra.mxu0 %v1184_v22  ;;  %614 = vmatmul.mubr.bf16.gmra.mxu1 %v1199_v24 }
  0x35   : > { %557 = vmatprep.mubr.bf16.mxu0 %v1185_v23  ;;  %621 = vmatprep.mubr.bf16.mxu1 %v1203_v25 }
  0x3c   : > { %558 = vmatmul.mubr.bf16.gmra.mxu0 %v1187_v26  ;;  %622 = vmatmul.mubr.bf16.gmra.mxu1 %v1205_v28 }
  0x3d   : > { %565 = vmatprep.mubr.bf16.mxu0 %v1188_v27  ;;  %629 = vmatprep.mubr.bf16.mxu1 %v1209_v29 }
  0x44   : > { %566 = vmatmul.mubr.bf16.gmra.mxu0 %v1190_v30  ;;  %630 = vmatmul.mubr.bf16.gmra.mxu1 %v1211_v32 }
  0x45   : > { %573 = vmatprep.mubr.bf16.mxu0 %v1194_v31  ;;  %637 = vmatprep.mubr.bf16.mxu1 %v1215_v33 }
  0x4c   : > { %574 = vmatmul.mubr.bf16.gmra.mxu0 %v1196_v34  ;;  %638 = vmatmul.mubr.bf16.gmra.mxu1 %v1217_v36 }
  0x4d   : > { %581 = vmatprep.mubr.bf16.mxu0 %v1200_v35  ;;  %645 = vmatprep.mubr.bf16.mxu1 %v1218_v37 }
  0x54   : > { %582 = vmatmul.mubr.bf16.gmra.mxu0 %v1202_v38  ;;  %646 = vmatmul.mubr.bf16.gmra.mxu1 %v1220_v40 }
  0x55   : > { %589 = vmatprep.mubr.bf16.mxu0 %v1206_v39  ;;  %653 = vmatprep.mubr.bf16.mxu1 %v1221_v41 }
  0x5c   : > { %590 = vmatmul.mubr.bf16.gmra.mxu0 %v1208_v42  ;;  %654 = vmatmul.mubr.bf16.gmra.mxu1 %v1223_v44 }
  0x5d   : > { %597 = vmatprep.mubr.bf16.mxu0 %v1212_v43  ;;  %661 = vmatprep.mubr.bf16.mxu1 %v1224_v45 }
  0x64   : > { %598 = vmatmul.mubr.bf16.gmra.mxu0 %v1214_v46  ;;  %662 = vmatmul.mubr.bf16.gmra.mxu1 %v1226_v47 }
  0xec   : > { %v1043_v48 = vpop.f32.mrf.mxu0  ;;  %v1091_v49 = vpop.f32.mrf.mxu1 }
  0xee   : > { %v1044_v50 = vpop.f32.mrf.mxu0  ;;  %v1092_v52 = vpop.f32.mrf.mxu1 }
  0xef   : > { %v1363_v51 = vadd.f32 %v1044_v50, %v1043_v48  ;;  %v1365_v54 = vadd.f32 %v1092_v52, %v1091_v49 }
  0xf0   : > { %v1046_v53 = vpop.f32.mrf.mxu0  ;;  %v1094_v55 = vpop.f32.mrf.mxu1 }
  0xf1   : > { %671 = vst.msk [vmem:[%s1361_s29] sm:$0xff] %vm670_vm0, %v1363_v51  ;;  %687 = vst.msk [vmem:[%s1361_s29 + $0x80] sm:$0xff] %vm670_vm0, %v1365_v54  ;;  %v772_v35 = vmul.f32 %v1363_v51, %v1363_v51  ;;  %v703_v43 = vsel %vm670_vm0, %v1363_v51, 0.0 }
  0xf2   : > { %v1047_v56 = vpop.f32.mrf.mxu0  ;;  %v1095_v58 = vpop.f32.mrf.mxu1 }
  0xf3   : > { %v1048_v57 = vadd.f32 %v1047_v56, %v1046_v53  ;;  %v1373_v60 = vadd.f32 %v1095_v58, %v1094_v55  ;;  %v804_v48 = vsel %vm670_vm0, %v772_v35, 0.0 }
  0xf4   : > { %v1049_v59 = vpop.f32.mrf.mxu0  ;;  %v1097_v61 = vpop.f32.mrf.mxu1 }
  0xf5   : > { %672 = vst.msk [vmem:[%s1361_s29 + $0x8] sm:$0xff] %vm670_vm0, %v1048_v57  ;;  %688 = vst.msk [vmem:[%s1361_s29 + $0x88] sm:$0xff] %vm670_vm0, %v1373_v60  ;;  %v773_v33 = vmul.f32 %v1048_v57, %v1048_v57  ;;  %v704_v37 = vsel %vm670_vm0, %v1048_v57, 0.0 }
  0xf6   : > { %v1050_v62 = vpop.f32.mrf.mxu0  ;;  %v1098_v0 = vpop.f32.mrf.mxu1  ;;  %v705_v49 = vadd.f32 %v704_v37, %v703_v43 }
  0xf7   : > { %v1051_v63 = vadd.f32 %v1050_v62, %v1049_v59  ;;  %v1380_v2 = vadd.f32 %v1098_v0, %v1097_v61  ;;  %v805_v44 = vsel %vm670_vm0, %v773_v33, 0.0 }
  0xf8   : > { %v1052_v1 = vpop.f32.mrf.mxu0  ;;  %v1100_v3 = vpop.f32.mrf.mxu1  ;;  %v806_v57 = vadd.f32 %v805_v44, %v804_v48 }
  0xf9   : > { %673 = vst.msk [vmem:[%s1361_s29 + $0x10] sm:$0xff] %vm670_vm0, %v1051_v63  ;;  %689 = vst.msk [vmem:[%s1361_s29 + $0x90] sm:$0xff] %vm670_vm0, %v1380_v2  ;;  %v774_v38 = vmul.f32 %v1051_v63, %v1051_v63  ;;  %v706_v45 = vsel %vm670_vm0, %v1051_v63, 0.0 }
  0xfa   : > { %v1053_v4 = vpop.f32.mrf.mxu0  ;;  %v1101_v6 = vpop.f32.mrf.mxu1  ;;  %v707_v58 = vadd.f32 %v706_v45, %v705_v49 }
  0xfb   : > { %v1054_v5 = vadd.f32 %v1053_v4, %v1052_v1  ;;  %v1387_v8 = vadd.f32 %v1101_v6, %v1100_v3  ;;  %v807_v52 = vsel %vm670_vm0, %v774_v38, 0.0 }
  0xfc   : > { %v1055_v7 = vpop.f32.mrf.mxu0  ;;  %v1103_v9 = vpop.f32.mrf.mxu1  ;;  %v808_v3 = vadd.f32 %v807_v52, %v806_v57 }
  0xfd   : > { %674 = vst.msk [vmem:[%s1361_s29 + $0x18] sm:$0xff] %vm670_vm0, %v1054_v5  ;;  %690 = vst.msk [vmem:[%s1361_s29 + $0x98] sm:$0xff] %vm670_vm0, %v1387_v8  ;;  %v775_v46 = vmul.f32 %v1054_v5, %v1054_v5  ;;  %v708_v51 = vsel %vm670_vm0, %v1054_v5, 0.0 }
  0xfe   : > { %v1056_v10 = vpop.f32.mrf.mxu0  ;;  %v1104_v12 = vpop.f32.mrf.mxu1  ;;  %v709_v4 = vadd.f32 %v708_v51, %v707_v58 }
  0xff   : > { %v1057_v11 = vadd.f32 %v1056_v10, %v1055_v7  ;;  %v1394_v14 = vadd.f32 %v1104_v12, %v1103_v9  ;;  %v809_v62 = vsel %vm670_vm0, %v775_v46, 0.0 }
 0x100   : > { %v1058_v13 = vpop.f32.mrf.mxu0  ;;  %v1106_v15 = vpop.f32.mrf.mxu1 }
 0x101   : > { %675 = vst.msk [vmem:[%s1361_s29 + $0x20] sm:$0xff] %vm670_vm0, %v1057_v11  ;;  %691 = vst.msk [vmem:[%s1361_s29 + $0xa0] sm:$0xff] %vm670_vm0, %v1394_v14  ;;  %v776_v53 = vmul.f32 %v1057_v11, %v1057_v11  ;;  %v710_v63 = vsel %vm670_vm0, %v1057_v11, 0.0  ;;  %v810_v11 = vadd.f32 %v809_v62, %v808_v3 }
 0x102   : > { %v1059_v16 = vpop.f32.mrf.mxu0  ;;  %v1107_v18 = vpop.f32.mrf.mxu1 }
 0x103   : > { %v1060_v17 = vadd.f32 %v1059_v16, %v1058_v13  ;;  %v1401_v20 = vadd.f32 %v1107_v18, %v1106_v15  ;;  %v811_v6 = vsel %vm670_vm0, %v776_v53, 0.0  ;;  %v711_v13 = vadd.f32 %v710_v63, %v709_v4 }
 0x104   : > { %v1061_v19 = vpop.f32.mrf.mxu0  ;;  %v1109_v21 = vpop.f32.mrf.mxu1 }
 0x105   : > { %676 = vst.msk [vmem:[%s1361_s29 + $0x28] sm:$0xff] %vm670_vm0, %v1060_v17  ;;  %692 = vst.msk [vmem:[%s1361_s29 + $0xa8] sm:$0xff] %vm670_vm0, %v1401_v20  ;;  %v777_v0 = vmul.f32 %v1060_v17, %v1060_v17  ;;  %v712_v7 = vsel %vm670_vm0, %v1060_v17, 0.0  ;;  %v812_v17 = vadd.f32 %v811_v6, %v810_v11 }
 0x106   : > { %v1062_v22 = vpop.f32.mrf.mxu0  ;;  %v1110_v24 = vpop.f32.mrf.mxu1 }
 0x107   : > { %v1063_v23 = vadd.f32 %v1062_v22, %v1061_v19  ;;  %v1408_v26 = vadd.f32 %v1110_v24, %v1109_v21  ;;  %v813_v18 = vsel %vm670_vm0, %v777_v0, 0.0  ;;  %v713_v24 = vadd.f32 %v712_v7, %v711_v13 }
 0x108   : > { %v1064_v25 = vpop.f32.mrf.mxu0  ;;  %v1112_v27 = vpop.f32.mrf.mxu1  ;;  %v814_v33 = vadd.f32 %v813_v18, %v812_v17 }
 0x109   : > { %677 = vst.msk [vmem:[%s1361_s29 + $0x30] sm:$0xff] %vm670_vm0, %v1063_v23  ;;  %693 = vst.msk [vmem:[%s1361_s29 + $0xb0] sm:$0xff] %vm670_vm0, %v1408_v26  ;;  %v778_v9 = vmul.f32 %v1063_v23, %v1063_v23  ;;  %v714_v19 = vsel %vm670_vm0, %v1063_v23, 0.0 }
 0x10a   : > { %v1065_v28 = vpop.f32.mrf.mxu0  ;;  %v1113_v30 = vpop.f32.mrf.mxu1 }
 0x10b   : > { %v1415_v29 = vadd.f32 %v1065_v28, %v1064_v25  ;;  %v1417_v32 = vadd.f32 %v1113_v30, %v1112_v27  ;;  %v815_v27 = vsel %vm670_vm0, %v778_v9, 0.0 }
 0x10c   : > { %v1067_v31 = vpop.f32.mrf.mxu0  ;;  %v1115_v34 = vpop.f32.mrf.mxu1  ;;  %v816_v43 = vadd.f32 %v815_v27, %v814_v33 }
 0x10d   : > { %678 = vst.msk [vmem:[%s1361_s29 + $0x38] sm:$0xff] %vm670_vm0, %v1415_v29  ;;  %694 = vst.msk [vmem:[%s1361_s29 + $0xb8] sm:$0xff] %vm670_vm0, %v1417_v32  ;;  %v779_v21 = vmul.f32 %v1415_v29, %v1415_v29  ;;  %v716_v28 = vsel %vm670_vm0, %v1415_v29, 0.0 }
 0x10e   : > { %v1068_v36 = vpop.f32.mrf.mxu0  ;;  %v1116_v40 = vpop.f32.mrf.mxu1 }
 0x10f   : > { %v1069_v39 = vadd.f32 %v1068_v36, %v1067_v31  ;;  %v1428_v42 = vadd.f32 %v1116_v40, %v1115_v34  ;;  %v715_v34 = vadd.f32 %v714_v19, %v713_v24  ;;  %v817_v37 = vsel %vm670_vm0, %v779_v21, 0.0 }
 0x110   : > { %v1070_v41 = vpop.f32.mrf.mxu0  ;;  %v1118_v47 = vpop.f32.mrf.mxu1 }
 0x111   : > { %679 = vst.msk [vmem:[%s1361_s29 + $0x40] sm:$0xff] %vm670_vm0, %v1069_v39  ;;  %695 = vst.msk [vmem:[%s1361_s29 + $0xc0] sm:$0xff] %vm670_vm0, %v1428_v42  ;;  %v780_v23 = vmul.f32 %v1069_v39, %v1069_v39  ;;  %v718_v38 = vsel %vm670_vm0, %v1069_v39, 0.0  ;;  %v717_v29 = vadd.f32 %v716_v28, %v715_v34  ;;  %v818_v39 = vadd.f32 %v817_v37, %v816_v43 }
 0x112   : > { %v1071_v50 = vpop.f32.mrf.mxu0  ;;  %v1119_v56 = vpop.f32.mrf.mxu1 }
 0x113   : > { %v1072_v55 = vadd.f32 %v1071_v50, %v1070_v41  ;;  %v1442_v61 = vadd.f32 %v1119_v56, %v1118_v47  ;;  %v819_v45 = vsel %vm670_vm0, %v780_v23, 0.0  ;;  %v719_v50 = vadd.f32 %v718_v38, %v717_v29 }
 0x114   : > { %v1073_v59 = vpop.f32.mrf.mxu0  ;;  %v1121_v1 = vpop.f32.mrf.mxu1 }
 0x115   : > { %680 = vst.msk [vmem:[%s1361_s29 + $0x48] sm:$0xff] %vm670_vm0, %v1072_v55  ;;  %696 = vst.msk [vmem:[%s1361_s29 + $0xc8] sm:$0xff] %vm670_vm0, %v1442_v61  ;;  %v781_v40 = vmul.f32 %v1072_v55, %v1072_v55  ;;  %v720_v46 = vsel %vm670_vm0, %v1072_v55, 0.0 }
 0x116   : > { %v1074_v5 = vpop.f32.mrf.mxu0  ;;  %v1122_v12 = vpop.f32.mrf.mxu1  ;;  %v721_v55 = vadd.f32 %v720_v46, %v719_v50  ;;  %v788_v46 = vmul.f32 %v1365_v54, %v1365_v54  ;;  %v734_v50 = vsel %vm670_vm0, %v1365_v54, 0.0  ;;  %v738_v54 = vsel %vm670_vm0, %v1380_v2, 0.0 }
 0x117   : > { %v1075_v10 = vadd.f32 %v1074_v5, %v1073_v59  ;;  %v1453_v16 = vadd.f32 %v1122_v12, %v1121_v1  ;;  %v821_v53 = vsel %vm670_vm0, %v781_v40, 0.0  ;;  %v820_v59 = vadd.f32 %v819_v45, %v818_v39 }
 0x118   : > { %v1076_v15 = vpop.f32.mrf.mxu0  ;;  %v1124_v22 = vpop.f32.mrf.mxu1 }
 0x119   : > { %681 = vst.msk [vmem:[%s1361_s29 + $0x50] sm:$0xff] %vm670_vm0, %v1075_v10  ;;  %697 = vst.msk [vmem:[%s1361_s29 + $0xd0] sm:$0xff] %vm670_vm0, %v1453_v16  ;;  %v782_v47 = vmul.f32 %v1075_v10, %v1075_v10  ;;  %v722_v56 = vsel %vm670_vm0, %v1075_v10, 0.0  ;;  %v822_v5 = vadd.f32 %v821_v53, %v820_v59  ;;  %v736_v59 = vsel %vm670_vm0, %v1373_v60, 0.0 }
 0x11a   : > { %v1077_v25 = vpop.f32.mrf.mxu0  ;;  %v1125_v31 = vpop.f32.mrf.mxu1  ;;  %v723_v6 = vadd.f32 %v722_v56, %v721_v55  ;;  %v790_v55 = vmul.f32 %v1380_v2, %v1380_v2  ;;  %v742_v2 = vsel %vm670_vm0, %v1394_v14, 0.0 }
 0x11b   : > { %v1078_v30 = vadd.f32 %v1077_v25, %v1076_v15  ;;  %v1467_v36 = vadd.f32 %v1125_v31, %v1124_v22  ;;  %v823_v63 = vsel %vm670_vm0, %v782_v47, 0.0 }
 0x11c   : > { %v1079_v35 = vpop.f32.mrf.mxu0  ;;  %v1127_v41 = vpop.f32.mrf.mxu1  ;;  %v824_v15 = vadd.f32 %v823_v63, %v822_v5  ;;  %v839_v5 = vsel %vm670_vm0, %v790_v55, 0.0 }
 0x11d   : > { %682 = vst.msk [vmem:[%s1361_s29 + $0x58] sm:$0xff] %vm670_vm0, %v1078_v30  ;;  %698 = vst.msk [vmem:[%s1361_s29 + $0xd8] sm:$0xff] %vm670_vm0, %v1467_v36  ;;  %v783_v57 = vmul.f32 %v1078_v30, %v1078_v30  ;;  %v724_v0 = vsel %vm670_vm0, %v1078_v30, 0.0 }
 0x11e   : > { %v1080_v44 = vpop.f32.mrf.mxu0  ;;  %v1128_v49 = vpop.f32.mrf.mxu1  ;;  %v725_v18 = vadd.f32 %v724_v0, %v723_v6  ;;  %v792_v6 = vmul.f32 %v1394_v14, %v1394_v14  ;;  %v746_v14 = vsel %vm670_vm0, %v1408_v26, 0.0 }
 0x11f   : > { %v1081_v48 = vadd.f32 %v1080_v44, %v1079_v35  ;;  %v1478_v51 = vadd.f32 %v1128_v49, %v1127_v41  ;;  %v825_v10 = vsel %vm670_vm0, %v783_v57, 0.0 }
 0x120   : > { %v1082_v52 = vpop.f32.mrf.mxu0  ;;  %v1130_v58 = vpop.f32.mrf.mxu1  ;;  %v826_v25 = vadd.f32 %v825_v10, %v824_v15 }
 0x121   : > { %683 = vst.msk [vmem:[%s1361_s29 + $0x60] sm:$0xff] %vm670_vm0, %v1081_v48  ;;  %699 = vst.msk [vmem:[%s1361_s29 + $0xe0] sm:$0xff] %vm670_vm0, %v1478_v51  ;;  %v784_v1 = vmul.f32 %v1081_v48, %v1081_v48  ;;  %v726_v12 = vsel %vm670_vm0, %v1081_v48, 0.0 }
 0x122   : > { %v1083_v62 = vpop.f32.mrf.mxu0  ;;  %v1131_v4 = vpop.f32.mrf.mxu1  ;;  %v727_v27 = vadd.f32 %v726_v12, %v725_v18  ;;  %v843_v18 = vsel %vm670_vm0, %v792_v6, 0.0 }
 0x123   : > { %v1084_v3 = vadd.f32 %v1083_v62, %v1082_v52  ;;  %v1489_v9 = vadd.f32 %v1131_v4, %v1130_v58  ;;  %v827_v21 = vsel %vm670_vm0, %v784_v1, 0.0  ;;  %v789_v52 = vmul.f32 %v1373_v60, %v1373_v60 }
 0x124   : > { %v1085_v7 = vpop.f32.mrf.mxu0  ;;  %v1133_v13 = vpop.f32.mrf.mxu1  ;;  %v828_v35 = vadd.f32 %v827_v21, %v826_v25  ;;  %v835_v58 = vsel %vm670_vm0, %v788_v46, 0.0  ;;  %v791_v1 = vmul.f32 %v1387_v8, %v1387_v8  ;;  %v740_v60 = vsel %vm670_vm0, %v1387_v8, 0.0 }
 0x125   : > { %684 = vst.msk [vmem:[%s1361_s29 + $0x68] sm:$0xff] %vm670_vm0, %v1084_v3  ;;  %v785_v11 = vmul.f32 %v1084_v3, %v1084_v3  ;;  %700 = vst.msk [vmem:[%s1361_s29 + $0xe8] sm:$0xff] %vm670_vm0, %v1489_v9  ;;  %v728_v22 = vsel %vm670_vm0, %v1084_v3, 0.0  ;;  %v837_v0 = vsel %vm670_vm0, %v789_v52, 0.0  ;;  %v744_v8 = vsel %vm670_vm0, %v1401_v20, 0.0 }
 0x126   : > { %v1086_v19 = vpop.f32.mrf.mxu0  ;;  %v1134_v24 = vpop.f32.mrf.mxu1  ;;  %v729_v37 = vadd.f32 %v728_v22, %v727_v27  ;;  %v841_v12 = vsel %vm670_vm0, %v791_v1, 0.0  ;;  %v799_v46 = vmul.f32 %v1467_v36, %v1467_v36 }
 0x127   : > { %v1087_v17 = vadd.f32 %v1086_v19, %v1085_v7  ;;  %v1500_v23 = vadd.f32 %v1134_v24, %v1133_v13  ;;  %v829_v30 = vsel %vm670_vm0, %v785_v11, 0.0  ;;  %v793_v11 = vmul.f32 %v1401_v20, %v1401_v20 }
 0x128   : > { %v1088_v28 = vpop.f32.mrf.mxu0  ;;  %v1136_v34 = vpop.f32.mrf.mxu1  ;;  %v830_v29 = vadd.f32 %v829_v30, %v828_v35  ;;  %v794_v19 = vmul.f32 %v1408_v26, %v1408_v26  ;;  %v795_v24 = vmul.f32 %v1417_v32, %v1417_v32  ;;  %v748_v20 = vsel %vm670_vm0, %v1417_v32, 0.0 }
 0x129   : > { %685 = vst.msk [vmem:[%s1361_s29 + $0x70] sm:$0xff] %vm670_vm0, %v1087_v17  ;;  %v730_v31 = vsel %vm670_vm0, %v1087_v17, 0.0  ;;  %v786_v33 = vmul.f32 %v1087_v17, %v1087_v17  ;;  %701 = vst.msk [vmem:[%s1361_s29 + $0xf0] sm:$0xff] %vm670_vm0, %v1500_v23  ;;  %v845_v17 = vsel %vm670_vm0, %v793_v11, 0.0  ;;  %v796_v30 = vmul.f32 %v1428_v42, %v1428_v42 }
 0x12a   : > { %v1089_v38 = vpop.f32.mrf.mxu0  ;;  %v1137_v43 = vpop.f32.mrf.mxu1  ;;  %v731_v44 = vadd.f32 %v730_v31, %v729_v37  ;;  %v750_v26 = vsel %vm670_vm0, %v1428_v42, 0.0  ;;  %v797_v35 = vmul.f32 %v1442_v61, %v1442_v61  ;;  %v752_v32 = vsel %vm670_vm0, %v1442_v61, 0.0 }
 0x12b   : > { %v831_v40 = vsel %vm670_vm0, %v786_v33, 0.0  ;;  %v1090_v41 = vadd.f32 %v1089_v38, %v1088_v28  ;;  %v1510_v45 = vadd.f32 %v1137_v43, %v1136_v34  ;;  %v847_v28 = vsel %vm670_vm0, %v794_v19, 0.0 }
 0x12c   : > { %v832_v49 = vadd.f32 %v831_v40, %v830_v29  ;;  %v849_v34 = vsel %vm670_vm0, %v795_v24, 0.0  ;;  %v851_v40 = vsel %vm670_vm0, %v796_v30, 0.0  ;;  %v754_v42 = vsel %vm670_vm0, %v1453_v16, 0.0 }
 0x12d   : > { %686 = vst.msk [vmem:[%s1361_s29 + $0x78] sm:$0xff] %vm670_vm0, %v1090_v41  ;;  %v732_v47 = vsel %vm670_vm0, %v1090_v41, 0.0  ;;  %v787_v48 = vmul.f32 %v1090_v41, %v1090_v41  ;;  %702 = vst.msk [vmem:[%s1361_s29 + $0xf8] sm:$0xff] %vm670_vm0, %v1510_v45  ;;  %v798_v41 = vmul.f32 %v1453_v16, %v1453_v16  ;;  %v756_v61 = vsel %vm670_vm0, %v1467_v36, 0.0 }
 0x12e   : > { %v733_v39 = vadd.f32 %v732_v47, %v731_v44  ;;  %v853_v44 = vsel %vm670_vm0, %v797_v35, 0.0  ;;  %v758_v16 = vsel %vm670_vm0, %v1478_v51, 0.0  ;;  %v760_v36 = vsel %vm670_vm0, %v1489_v9, 0.0 }
 0x12f   : > { %v833_v53 = vsel %vm670_vm0, %v787_v48, 0.0  ;;  %v802_v55 = vmul.f32 %v1500_v23, %v1500_v23 }
 0x130   : > { %v735_v56 = vadd.f32 %v734_v50, %v733_v39  ;;  %v834_v57 = vadd.f32 %v833_v53, %v832_v49  ;;  %v855_v49 = vsel %vm670_vm0, %v798_v41, 0.0  ;;  %v800_v39 = vmul.f32 %v1478_v51, %v1478_v51 }
 0x131   : > { %v857_v53 = vsel %vm670_vm0, %v799_v46, 0.0  ;;  %v762_v51 = vsel %vm670_vm0, %v1500_v23, 0.0 }
 0x132   : > { %v737_v62 = vadd.f32 %v736_v59, %v735_v56  ;;  %v836_v63 = vadd.f32 %v835_v58, %v834_v57  ;;  %v801_v56 = vmul.f32 %v1489_v9, %v1489_v9  ;;  %v859_v59 = vsel %vm670_vm0, %v800_v39, 0.0 }
 0x133   : > { %v764_v9 = vsel %vm670_vm0, %v1510_v45, 0.0 }
 0x134   : > { %v739_v3 = vadd.f32 %v738_v54, %v737_v62  ;;  %v838_v4 = vadd.f32 %v837_v0, %v836_v63  ;;  %v861_v0 = vsel %vm670_vm0, %v801_v56, 0.0  ;;  %v803_v54 = vmul.f32 %v1510_v45, %v1510_v45 }
 0x136   : > { %v741_v7 = vadd.f32 %v740_v60, %v739_v3  ;;  %v840_v10 = vadd.f32 %v839_v5, %v838_v4  ;;  %v863_v4 = vsel %vm670_vm0, %v802_v55, 0.0  ;;  %v865_v6 = vsel %vm670_vm0, %v803_v54, 0.0 }
 0x138   : > { %v842_v13 = vadd.f32 %v841_v12, %v840_v10  ;;  %v743_v15 = vadd.f32 %v742_v2, %v741_v7 }
 0x13a   : > { %v745_v21 = vadd.f32 %v744_v8, %v743_v15  ;;  %v844_v22 = vadd.f32 %v843_v18, %v842_v13 }
 0x13c   : > { %v747_v25 = vadd.f32 %v746_v14, %v745_v21  ;;  %v846_v27 = vadd.f32 %v845_v17, %v844_v22 }
 0x13e   : > { %v749_v31 = vadd.f32 %v748_v20, %v747_v25  ;;  %v848_v33 = vadd.f32 %v847_v28, %v846_v27 }
 0x140   : > { %v751_v37 = vadd.f32 %v750_v26, %v749_v31  ;;  %v850_v38 = vadd.f32 %v849_v34, %v848_v33 }
 0x142   : > { %v753_v43 = vadd.f32 %v752_v32, %v751_v37  ;;  %v852_v29 = vadd.f32 %v851_v40, %v850_v38 }
 0x144   : > { %v854_v47 = vadd.f32 %v853_v44, %v852_v29  ;;  %v755_v48 = vadd.f32 %v754_v42, %v753_v43 }
 0x146   : > { %v856_v50 = vadd.f32 %v855_v49, %v854_v47  ;;  %v757_v52 = vadd.f32 %v756_v61, %v755_v48 }
 0x148   : > { %v858_v57 = vadd.f32 %v857_v53, %v856_v50  ;;  %v759_v58 = vadd.f32 %v758_v16, %v757_v52 }
 0x14a   : > { %v860_v62 = vadd.f32 %v859_v59, %v858_v57  ;;  %v761_v63 = vadd.f32 %v760_v36, %v759_v58 }
 0x14c   : > { %v862_v1 = vadd.f32 %v861_v0, %v860_v62  ;;  %v763_v3 = vadd.f32 %v762_v51, %v761_v63 }
 0x14e   : > { %v864_v5 = vadd.f32 %v863_v4, %v862_v1  ;;  %v765_v60 = vadd.f32 %v764_v9, %v763_v3 }
 0x150   : > { %v766_v7 = vrot.slane %v765_v60, 4  ;;  %v866_v10 = vadd.f32 %v865_v6, %v864_v5 }
 0x152   : > { %v767_v12 = vadd.f32 %v766_v7, %v765_v60  ;;  %v867_v23 = vrot.slane %v866_v10, 4 }
 0x154   : > { %v768_v2 = vrot.slane %v767_v12, 2  ;;  %v868_v11 = vadd.f32 %v867_v23, %v866_v10 }
 0x156   : > { %v769_v13 = vadd.f32 %v768_v2, %v767_v12  ;;  %v869_v15 = vrot.slane %v868_v11, 2 }
 0x158   : > { %v770_v18 = vrot.slane %v769_v13, 1  ;;  %v870_v8 = vadd.f32 %v869_v15, %v868_v11 }
 0x15a   : > { %v871_v19 = vrot.slane %v870_v8, 1  ;;  %v771_v45 = vadd.f32 %v770_v18, %v769_v13 }
 0x15c   : > { %v872_v21 = vadd.f32 %v871_v19, %v870_v8 }
 0x15e   : > { %v874_v22 = vsel %vm873_vm1, %v771_v45, %v872_v21 }
 0x15f   : > { %v876_v17 = vsel %vm875_vm2, %v874_v22, 0.0 }
 0x160   : > { %877 = vst.msk [vmem:[%s187_s5] sm:$0xff] %vm670_vm0, %v876_v17 }
 0x161 PF: > { %s14_s12 = sadd.s32 1, %s1233_s12  }
 0x162   : > { %p11_p5 = scmp.ge.s32.totalorder %s14_s12, 4  }
 0x164   :  { %13 = sbr.rel (!%p11_p5) target bundleno = 1 (0x1), region = 70 }

// kernel: tile.13
= control target key start
LH: loop header
LB: loop body
LE: loop exit
PB: predicated region body
PF: predicated region fallthrough
CT: control target
= control target key end

     0   :  { %s22_s0 = inlined_call_operand.vmem [shape: f32[32], index: 0, kind: input, shape index: {}]   ;;  %s23_s1 = inlined_call_operand.vmem [shape: f32[4,32], index: 1, kind: output, shape index: {}]  }
   0x1   :  { %v4_v0 = vld [vmem:[%s22_s0] ss:$0 sm:$0xff] }
   0x2   :  { %5 = vst [vmem:[%s23_s1] sm:$0xf] %v4_v0 }

// kernel: tile.18
= control target key start
LH: loop header
LB: loop body
LE: loop exit
PB: predicated region body
PF: predicated region fallthrough
CT: control target
= control target key end

     0   :  { %vm8_vm0 = vcmask 261120   ;;  %s40_s8 = smov 32   ;;  %s41_s9 = smov 64   ;;  %vm14_vm1 = vcmask 1048320   ;;  %vm20_vm2 = vcmask 785920   ;;  %vm26_vm3 = vcmask 523520   ;;  %s58_s0 = inlined_call_operand.vmem [shape: f32[4,32], index: 0, kind: input, shape index: {}]   ;;  %s59_s1 = inlined_call_operand.vmem [shape: f32[1,128], index: 1, kind: output, shape index: {}]  }
   0x1   :  { %v5_v0 = vld [vmem:[%s58_s0] sm:$0xf]  ;;  %s39_s0 = smov 96  }
   0x2   :  { %6 = vst [vmem:[#allocation1] sm:$0xf] %v5_v0 }
   0x9   :  { %v11_v1 = vld [vmem:[#allocation1 + $0x3] sm:$0x1]   ;;  %v23_v2 = vld [vmem:[#allocation1 + $0x1] sm:$0x1]   ;;  %v7_v3 = vld [vmem:[#allocation1] sm:$0x1]  }
   0xa   :  { %12 = vrot.lane.b32.xlu0 %v11_v1, %s39_s0  ;;  %24 = vrot.lane.b32.xlu1 %v23_v2, %s40_s8  ;;  %v17_v4 = vld [vmem:[#allocation1 + $0x2] sm:$0x1]   ;;  %9 = vst.msk [vmem:[#allocation0] sm:$0x1] %vm8_vm0, %v7_v3  }
   0xe   :  { %18 = vrot.lane.b32.xlu0 %v17_v4, %s41_s9 }
  0x7c   :  { %v13_v5 = vpop.permute.xlu0 %12   ;;  %v25_v6 = vpop.permute.xlu1 %24  }
  0x7d   :  { %15 = vst.msk [vmem:[#allocation0] sm:$0x1] %vm14_vm1, %v13_v5  }
  0x80   :  { %v19_v7 = vpop.permute.xlu0 %18  }
  0x81   :  { %21 = vst.msk [vmem:[#allocation0] sm:$0x1] %vm20_vm2, %v19_v7  }
  0x82   :  { %27 = vst.msk [vmem:[#allocation0] sm:$0x1] %vm26_vm3, %v25_v6  }
  0x89   :  { %v32_v8 = vld [vmem:[#allocation0] sm:$0x1] }
  0x8a   :  { %35 = vst [vmem:[%s59_s1] sm:$0x1] %v32_v8 }

// kernel: intro_block_forward.7
= control target key start
LH: loop header
LB: loop body
LE: loop exit
PB: predicated region body
PF: predicated region fallthrough
CT: control target
= control target key end

     0   :  { %s148_s0 = inlined_call_operand.vmem [shape: f32[64,128], index: 0, kind: input, shape index: {}]   ;;  %s149_s1 = inlined_call_operand.vmem [shape: f32[1,128], index: 1, kind: input, shape index: {}]   ;;  %s150_s2 = inlined_call_operand.vmem [shape: f32[1,128], index: 2, kind: input, shape index: {}]   ;;  %s151_s3 = inlined_call_operand.vmem [shape: f32[64,128], index: 3, kind: output, shape index: {}]  }
   0x1   :  { %v14_v0 = vld [vmem:[%s148_s0] sm:$0xff]  ;;  %v15_v4 = vld [vmem:[%s148_s0 + $0x8] sm:$0xff]  ;;  %v16_v5 = vld [vmem:[%s148_s0 + $0x10] sm:$0xff] }
   0x2   :  { %v72_v1 = vld [vmem:[%s149_s1] ss:$0 sm:$0xff]  ;;  %v17_v6 = vld [vmem:[%s148_s0 + $0x18] sm:$0xff]  ;;  %v19_v11 = vld [vmem:[%s148_s0 + $0x28] sm:$0xff] }
   0x3   :  { %v73_v2 = vld [vmem:[%s150_s2] ss:$0 sm:$0xff]  ;;  %v29_v3 = vmul.f32 %v72_v1, %v14_v0  ;;  %v30_v7 = vmul.f32 %v72_v1, %v15_v4  ;;  %v31_v8 = vmul.f32 %v72_v1, %v16_v5  ;;  %v32_v9 = vmul.f32 %v72_v1, %v17_v6  ;;  %v20_v12 = vld [vmem:[%s148_s0 + $0x30] sm:$0xff]  ;;  %v21_v17 = vld [vmem:[%s148_s0 + $0x38] sm:$0xff] }
   0x4   :  { %v18_v10 = vld [vmem:[%s148_s0 + $0x20] sm:$0xff]  ;;  %v34_v15 = vmul.f32 %v72_v1, %v19_v11  ;;  %v35_v16 = vmul.f32 %v72_v1, %v20_v12  ;;  %v36_v21 = vmul.f32 %v72_v1, %v21_v17 }
   0x5   :  { %v44_v13 = vadd.f32 %v73_v2, %v29_v3  ;;  %v33_v14 = vmul.f32 %v72_v1, %v18_v10  ;;  %v45_v18 = vadd.f32 %v73_v2, %v30_v7  ;;  %v46_v19 = vadd.f32 %v73_v2, %v31_v8 }
   0x6   :  { %v47_v20 = vadd.f32 %v73_v2, %v32_v9  ;;  %v49_v24 = vadd.f32 %v73_v2, %v34_v15  ;;  %v50_v25 = vadd.f32 %v73_v2, %v35_v16  ;;  %v51_v29 = vadd.f32 %v73_v2, %v36_v21 }
   0x7   :  { %v52_v22 = vmax.f32 %v44_v13, 0.0  ;;  %v48_v23 = vadd.f32 %v73_v2, %v33_v14  ;;  %v53_v26 = vmax.f32 %v45_v18, 0.0  ;;  %v54_v27 = vmax.f32 %v46_v19, 0.0 }
   0x8   :  { %v55_v28 = vmax.f32 %v47_v20, 0.0  ;;  %v57_v31 = vmax.f32 %v49_v24, 0.0  ;;  %v58_v32 = vmax.f32 %v50_v25, 0.0  ;;  %v59_v33 = vmax.f32 %v51_v29, 0.0 }
   0x9   :  { %60 = vst [vmem:[%s151_s3] sm:$0xff] %v52_v22  ;;  %v56_v30 = vmax.f32 %v48_v23, 0.0  ;;  %61 = vst [vmem:[%s151_s3 + $0x8] sm:$0xff] %v53_v26 }
   0xa   :  { %62 = vst [vmem:[%s151_s3 + $0x10] sm:$0xff] %v54_v27  ;;  %63 = vst [vmem:[%s151_s3 + $0x18] sm:$0xff] %v55_v28 }
   0xb   :  { %64 = vst [vmem:[%s151_s3 + $0x20] sm:$0xff] %v56_v30  ;;  %65 = vst [vmem:[%s151_s3 + $0x28] sm:$0xff] %v57_v31 }
   0xc   :  { %66 = vst [vmem:[%s151_s3 + $0x30] sm:$0xff] %v58_v32  ;;  %67 = vst [vmem:[%s151_s3 + $0x38] sm:$0xff] %v59_v33 }

// kernel: intro_block_forward.6
= control target key start
LH: loop header
LB: loop body
LE: loop exit
PB: predicated region body
PF: predicated region fallthrough
CT: control target
= control target key end

     0   :  { %vm74_vm0 = vcmask 519168   ;;  %vm304_vm1 = vsmask.f32 7424  ;;  %vm461_vm2 = vcmask 523264   ;;  %vm901_vm3 = vcmask 1046528   ;;  %s7140_s2 = inlined_call_operand.vmem [shape: bf16[9,64,32], index: 2, kind: input, shape index: {}]   ;;  %s7141_s0 = inlined_call_operand.vmem [shape: bf16[512,64], index: 0, kind: input, shape index: {}, may-alias: {0,1}]   ;;  %s7142_s1 = inlined_call_operand.vmem [shape: bf16[512,64], index: 1, kind: input, shape index: {}, may-alias: {0,1}]   ;;  %s7143_s3 = inlined_call_operand.vmem [shape: f32[256,1], index: 3, kind: input, shape index: {}]   ;;  %s7144_s4 = inlined_call_operand.vmem [shape: f32[256,32], index: 4, kind: output, shape index: {0}]   ;;  %s7145_s5 = inlined_call_operand.vmem [shape: f32[1,8,32], index: 5, kind: output, shape index: {1}]  }
   0x1   :  { %v4843_v0 = vld [vmem:[%s7140_s2 + $0x38] sm:$0xff]   ;;  %v4844_v1 = vld [vmem:[%s7140_s2 + $0x30] sm:$0xff]   ;;  %v4845_v2 = vld [vmem:[%s7140_s2 + $0x28] sm:$0xff]  }
   0x2   :  { %4472 = vmatprep.subr.bf16.mxu0 %v4843_v0  ;;  %4832 = vmatprep.subr.bf16.mxu1 %v4843_v0  ;;  %v42_v3 = vld [vmem:[%s7141_s0] sm:$0xf]  ;;  %v43_v4 = vld [vmem:[%s7141_s0 + $0x4] sm:$0xf]  ;;  %v44_v5 = vld [vmem:[%s7141_s0 + $0x8] sm:$0xf] }
   0x3   :  { %4473 = vmatpush3.bf16.msra.mxu0 %v4843_v0  ;;  %4836 = vmatpush3.bf16.msra.mxu1 %v4843_v0  ;;  %v45_v6 = vld [vmem:[%s7141_s0 + $0xc] sm:$0xf]  ;;  %v46_v7 = vld [vmem:[%s7141_s0 + $0x10] sm:$0xf]  ;;  %75 = vst.msk [vmem:[#allocation2] sm:$0xf] %vm74_vm0, %v42_v3 }
   0x4   :  { %4474 = vmatprep.subr.bf16.mxu0 %v4844_v1  ;;  %4833 = vmatprep.subr.bf16.mxu1 %v4844_v1  ;;  %76 = vst.msk [vmem:[#allocation2 + $0x4] sm:$0xf] %vm74_vm0, %v43_v4  ;;  %77 = vst.msk [vmem:[#allocation2 + $0x8] sm:$0xf] %vm74_vm0, %v44_v5  ;;  %v58_v8 = vld [vmem:[%s7141_s0 + $0x40] sm:$0xf] }
   0x5   :  { %78 = vst.msk [vmem:[#allocation2 + $0xc] sm:$0xf] %vm74_vm0, %v45_v6  ;;  %79 = vst.msk [vmem:[#allocation2 + $0x10] sm:$0xf] %vm74_vm0, %v46_v7  ;;  %v59_v9 = vld [vmem:[%s7141_s0 + $0x44] sm:$0xf] }
   0x6   :  { %v60_v10 = vld [vmem:[%s7141_s0 + $0x48] sm:$0xf]  ;;  %v61_v11 = vld [vmem:[%s7141_s0 + $0x4c] sm:$0xf]  ;;  %91 = vst.msk [vmem:[#allocation2 + $0x40] sm:$0xf] %vm74_vm0, %v58_v8 }
   0x7   :  { %4475 = vmatpush3.bf16.msra.mxu0 %v4844_v1  ;;  %4837 = vmatpush3.bf16.msra.mxu1 %v4844_v1  ;;  %92 = vst.msk [vmem:[#allocation2 + $0x44] sm:$0xf] %vm74_vm0, %v59_v9  ;;  %93 = vst.msk [vmem:[#allocation2 + $0x48] sm:$0xf] %vm74_vm0, %v60_v10  ;;  %v47_v12 = vld [vmem:[%s7141_s0 + $0x14] sm:$0xf] }
   0x8   :  { %94 = vst.msk [vmem:[#allocation2 + $0x4c] sm:$0xf] %vm74_vm0, %v61_v11  ;;  %v62_v13 = vld [vmem:[%s7141_s0 + $0x50] sm:$0xf]  ;;  %v63_v14 = vld [vmem:[%s7141_s0 + $0x54] sm:$0xf]  ;;  %4476 = vmatprep.subr.bf16.mxu0 %v4845_v2  ;;  %4834 = vmatprep.subr.bf16.mxu1 %v4845_v2 }
   0x9   :  { %v4846_v15 = vld [vmem:[%s7140_s2 + $0x20] sm:$0xff]   ;;  %80 = vst.msk [vmem:[#allocation2 + $0x14] sm:$0xf] %vm74_vm0, %v47_v12  ;;  %95 = vst.msk [vmem:[#allocation2 + $0x50] sm:$0xf] %vm74_vm0, %v62_v13  ;;  %v5027_v16 = vld [vmem:[%s7140_s2 + $0x18] sm:$0xff]  }
   0xa   :  { %96 = vst.msk [vmem:[#allocation2 + $0x54] sm:$0xf] %vm74_vm0, %v63_v14  ;;  %v5032_v17 = vld [vmem:[%s7140_s2 + $0x58] sm:$0xff]   ;;  %v50_v22 = vld [vmem:[%s7141_s0 + $0x20] sm:$0xf]  ;;  %v4860_v63 = vld [vmem:[%s7140_s2 + $0x50] sm:$0xff]  }
   0xb   :  { %v48_v18 = vld [vmem:[%s7141_s0 + $0x18] sm:$0xf]  ;;  %v49_v19 = vld [vmem:[%s7141_s0 + $0x1c] sm:$0xf]  ;;  %4477 = vmatpush3.bf16.msra.mxu0 %v4845_v2  ;;  %4838 = vmatpush3.bf16.msra.mxu1 %v4845_v2  ;;  %v51_v23 = vld [vmem:[%s7141_s0 + $0x24] sm:$0xf] }
   0xc   :  { %v64_v20 = vld [vmem:[%s7141_s0 + $0x58] sm:$0xf]  ;;  %81 = vst.msk [vmem:[#allocation2 + $0x18] sm:$0xf] %vm74_vm0, %v48_v18  ;;  %82 = vst.msk [vmem:[#allocation2 + $0x1c] sm:$0xf] %vm74_vm0, %v49_v19  ;;  %4478 = vmatprep.subr.bf16.mxu0 %v4846_v15  ;;  %4835 = vmatprep.subr.bf16.mxu1 %v4846_v15 }
   0xd   :  { %v65_v21 = vld [vmem:[%s7141_s0 + $0x5c] sm:$0xf]  ;;  %97 = vst.msk [vmem:[#allocation2 + $0x58] sm:$0xf] %vm74_vm0, %v64_v20  ;;  %v171_v24 = vld [vmem:[#allocation2] sm:$0xf] }
   0xe   :  { %v5055_v25 = vld [vmem:[#allocation2 + $0x4] sm:$0xf]  ;;  %v5057_v26 = vld [vmem:[#allocation2 + $0x8] sm:$0xf]  ;;  %98 = vst.msk [vmem:[#allocation2 + $0x5c] sm:$0xf] %vm74_vm0, %v65_v21 }
   0xf   :  { %83 = vst.msk [vmem:[#allocation2 + $0x20] sm:$0xf] %vm74_vm0, %v50_v22  ;;  %84 = vst.msk [vmem:[#allocation2 + $0x24] sm:$0xf] %vm74_vm0, %v51_v23  ;;  %v5062_v27 = vld [vmem:[#allocation2 + $0xc] sm:$0xf]  ;;  %v5067_v29 = vcombine.low %v171_v24, %v5055_v25  ;;  %4479 = vmatpush3.bf16.msra.mxu0 %v4846_v15  ;;  %4839 = vmatpush3.bf16.msra.mxu1 %v4846_v15 }
  0x10   :  { %v5064_v28 = vld [vmem:[#allocation2 + $0x10] sm:$0xf]  ;;  %v5069_v30 = vld [vmem:[#allocation2 + $0x40] sm:$0xf]  ;;  %v5075_v32 = vcombine.low %v5057_v26, %v5062_v27  ;;  %v5079_v34 = vld [vmem:[#allocation2 + $0x44] sm:$0xf]  ;;  %4512 = vmatprep.subr.bf16.mxu1 %v5027_v16  ;;  %4552 = vmatprep.subr.bf16.mxu0 %v5032_v17 }
  0x11   :  { %7191 = vst [vmem:[#allocation3_spill] sm:$0xff] %v5069_v30  ;;  %7192 = vst [vmem:[#allocation4_spill] sm:$0xff] %v5079_v34  ;;  %v5081_v35 = vld [vmem:[#allocation2 + $0x48] sm:$0xf]  ;;  %v5083_v36 = vld [vmem:[#allocation2 + $0x4c] sm:$0xf]  ;;  %v5089_v39 = vcombine.low %v5069_v30, %v5079_v34 }
  0x12   :  { %7193 = vst [vmem:[#allocation5_spill] sm:$0xff] %v5081_v35  ;;  %7194 = vst [vmem:[#allocation6_spill] sm:$0xff] %v5083_v36  ;;  %v306_v37 = vshrl.u32 %v5067_v29, 16  ;;  %v308_v38 = vshll.u32 %v5067_v29, 16  ;;  %v5093_v40 = vcombine.low %v5081_v35, %v5083_v36  ;;  %v5095_v41 = vld [vmem:[#allocation2 + $0x14] sm:$0xf] }
  0x13   :  { %v5097_v42 = vld [vmem:[#allocation2 + $0x50] sm:$0xf]  ;;  %v313_v43 = vshll.u32 %v5075_v32, 16  ;;  %v317_v44 = vshrl.u32 %v5075_v32, 16  ;;  %v5103_v45 = vcombine.low %v5064_v28, %v5095_v41  ;;  %v5105_v46 = vld [vmem:[#allocation2 + $0x54] sm:$0xf] }
  0x14   :  { %7195 = vst [vmem:[#allocation7_spill] sm:$0xff] %v5097_v42  ;;  %7196 = vst [vmem:[#allocation8_spill] sm:$0xff] %v5105_v46  ;;  %v66_v47 = vld [vmem:[%s7141_s0 + $0x60] sm:$0xf]  ;;  %v310_v48 = vrot.slane %v308_v38, 1  ;;  %v369_v49 = vshll.u32 %v5089_v39, 16  ;;  %v5123_v56 = vcombine.low %v5097_v42, %v5105_v46 }
  0x15   :  { %v373_v50 = vshrl.u32 %v5089_v39, 16  ;;  %v377_v51 = vshll.u32 %v5093_v40, 16  ;;  %v67_v52 = vld [vmem:[%s7141_s0 + $0x64] sm:$0xf]  ;;  %99 = vst.msk [vmem:[#allocation2 + $0x60] sm:$0xf] %vm74_vm0, %v66_v47 }
  0x16   :  { %v315_v53 = vrot.slane %v313_v43, 1  ;;  %v381_v54 = vshrl.u32 %v5093_v40, 16  ;;  %v321_v55 = vshll.u32 %v5103_v45, 16  ;;  %v5125_v57 = vld [vmem:[#allocation2 + $0x18] sm:$0xf]  ;;  %v311_v58 = vor.u32 %v310_v48, %v306_v37  ;;  %v5158_v12 = vld [vmem:[%s7140_s2 + $0x10] sm:$0xff]  }
  0x17   :  { %100 = vst.msk [vmem:[#allocation2 + $0x64] sm:$0xf] %vm74_vm0, %v67_v52  ;;  %v5128_v59 = vrot.slane %v369_v49, 1  ;;  %v379_v60 = vrot.slane %v377_v51, 1  ;;  %v5130_v61 = vld [vmem:[#allocation2 + $0x1c] sm:$0xf] }
  0x18   :  { %v325_v62 = vshrl.u32 %v5103_v45, 16  ;;  %v319_v0 = vor.u32 %v317_v44, %v315_v53  ;;  %v323_v1 = vrot.slane %v321_v55, 1  ;;  %v385_v2 = vshll.u32 %v5123_v56, 16  ;;  %v5141_v4 = vld [vmem:[#allocation2 + $0x58] sm:$0xf] }
  0x19   :  { %v5139_v3 = vcombine.low %v5125_v57, %v5130_v61  ;;  %7197 = vst [vmem:[#allocation9_spill] sm:$0xff] %v5141_v4  ;;  %v5143_v5 = vld [vmem:[#allocation2 + $0x5c] sm:$0xf]  ;;  %v316_v6 = vsel %vm304_vm1, %v311_v58, %v315_v53  ;;  %v375_v7 = vor.u32 %v373_v50, %v5128_v59  ;;  %v383_v8 = vor.u32 %v381_v54, %v379_v60  ;;  %v5151_v10 = vld [vmem:[#allocation2 + $0x20] sm:$0xf] }
  0x1a   :  { %7198 = vst [vmem:[#allocation10_spill] sm:$0xff] %v5143_v5  ;;  %v5149_v9 = vcombine.low %v5141_v4, %v5143_v5  ;;  %v5153_v11 = vld [vmem:[#allocation2 + $0x24] sm:$0xf]  ;;  %4480 = vmatprep.mubr.msk.bf16.mxu0 %vm461_vm2, %v316_v6  ;;  %v324_v13 = vsel %vm304_vm1, %v319_v0, %v323_v1  ;;  %v387_v14 = vrot.slane %v385_v2, 1  ;;  %v327_v15 = vor.u32 %v325_v62, %v323_v1  ;;  %v52_v23 = vld [vmem:[%s7141_s0 + $0x28] sm:$0xf] }
  0x1b   :  { %v329_v18 = vshll.u32 %v5139_v3, 16  ;;  %v380_v19 = vsel %vm304_vm1, %v375_v7, %v379_v60  ;;  %4481 = vmatmul.mubr.msk.bf16.vlgmr.msra.gmra.mxu0 %vm461_vm2, %v324_v13  ;;  %v389_v20 = vshrl.u32 %v5123_v56, 16  ;;  %v5169_v22 = vcombine.low %v5151_v10, %v5153_v11  ;;  %85 = vst.msk [vmem:[#allocation2 + $0x28] sm:$0xf] %vm74_vm0, %v52_v23  ;;  %v68_v58 = vld [vmem:[%s7141_s0 + $0x68] sm:$0xf] }
  0x1c   :  { %v393_v21 = vshll.u32 %v5149_v9, 16  ;;  %4496 = vmatprep.mubr.msk.bf16.mxu1 %vm461_vm2, %v380_v19  ;;  %v388_v24 = vsel %vm304_vm1, %v383_v8, %v387_v14  ;;  %4553 = vmatpush3.bf16.msra.mxu0 %v5032_v17  ;;  %v333_v38 = vshrl.u32 %v5139_v3, 16  ;;  %v5178_v43 = vld [vmem:[#allocation2 + $0x60] sm:$0xf]  ;;  %v397_v44 = vshrl.u32 %v5149_v9, 16  ;;  %v4865_v7 = vld [vmem:[%s7140_s2 + $0x8] sm:$0xff]  }
  0x1d   :  { %v331_v37 = vrot.slane %v329_v18, 1  ;;  %7199 = vst [vmem:[#allocation11_spill] sm:$0xff] %v5178_v43  ;;  %4497 = vmatmul.mubr.msk.bf16.vlgmr.msra.gmra.mxu1 %vm461_vm2, %v388_v24  ;;  %v391_v47 = vor.u32 %v389_v20, %v387_v14  ;;  %v337_v49 = vshll.u32 %v5169_v22, 16  ;;  %4554 = vmatprep.subr.bf16.mxu0 %v4860_v63  ;;  %v53_v17 = vld [vmem:[%s7141_s0 + $0x2c] sm:$0xf]  ;;  %v341_v55 = vshrl.u32 %v5169_v22, 16 }
  0x1e   :  { %v395_v48 = vrot.slane %v393_v21, 1  ;;  %v5184_v50 = vld [vmem:[#allocation2 + $0x64] sm:$0xf]  ;;  %4513 = vmatpush3.bf16.msra.mxu1 %v5027_v16  ;;  %86 = vst.msk [vmem:[#allocation2 + $0x2c] sm:$0xf] %vm74_vm0, %v53_v17  ;;  %v4866_v16 = vld [vmem:[%s7140_s2 + $0x48] sm:$0xff]  }
  0x1f   :  { %7200 = vst [vmem:[#allocation12_spill] sm:$0xff] %v5184_v50  ;;  %v332_v52 = vsel %vm304_vm1, %v327_v15, %v331_v37  ;;  %v335_v53 = vor.u32 %v333_v38, %v331_v37  ;;  %v5195_v54 = vcombine.low %v5178_v43, %v5184_v50  ;;  %v69_v60 = vld [vmem:[%s7141_s0 + $0x6c] sm:$0xf]  ;;  %v339_v0 = vrot.slane %v337_v49, 1  ;;  %4514 = vmatprep.subr.bf16.mxu1 %v5158_v12  ;;  %v54_v2 = vld [vmem:[%s7141_s0 + $0x30] sm:$0xf] }
  0x20   :  { %4484 = vmatprep.mubr.msk.bf16.mxu0 %vm461_vm2, %v332_v52  ;;  %v396_v62 = vsel %vm304_vm1, %v391_v47, %v395_v48  ;;  %v399_v1 = vor.u32 %v397_v44, %v395_v48  ;;  %101 = vst.msk [vmem:[#allocation2 + $0x68] sm:$0xf] %vm74_vm0, %v68_v58  ;;  %102 = vst.msk [vmem:[#allocation2 + $0x6c] sm:$0xf] %vm74_vm0, %v69_v60  ;;  %v55_v6 = vld [vmem:[%s7141_s0 + $0x34] sm:$0xf]  ;;  %4555 = vmatpush3.bf16.msra.mxu0 %v4860_v63 }
  0x21   :  { %4500 = vmatprep.mubr.msk.bf16.mxu1 %vm461_vm2, %v396_v62  ;;  %v401_v13 = vshll.u32 %v5195_v54, 16  ;;  %v405_v14 = vshrl.u32 %v5195_v54, 16  ;;  %87 = vst.msk [vmem:[#allocation2 + $0x30] sm:$0xf] %vm74_vm0, %v54_v2  ;;  %88 = vst.msk [vmem:[#allocation2 + $0x34] sm:$0xf] %vm74_vm0, %v55_v6  ;;  %v340_v20 = vsel %vm304_vm1, %v335_v53, %v339_v0  ;;  %4556 = vmatprep.subr.bf16.mxu0 %v4866_v16 }
  0x22   :  { %v70_v15 = vld [vmem:[%s7141_s0 + $0x70] sm:$0xf]  ;;  %v71_v18 = vld [vmem:[%s7141_s0 + $0x74] sm:$0xf]  ;;  %v4870_v21 = vld [vmem:[%s7140_s2] sm:$0xff]   ;;  %4515 = vmatpush3.bf16.msra.mxu1 %v5158_v12 }
  0x23   :  { %103 = vst.msk [vmem:[#allocation2 + $0x70] sm:$0xf] %vm74_vm0, %v70_v15  ;;  %104 = vst.msk [vmem:[#allocation2 + $0x74] sm:$0xf] %vm74_vm0, %v71_v18  ;;  %v403_v23 = vrot.slane %v401_v13, 1  ;;  %v4871_v37 = vld [vmem:[%s7140_s2 + $0x40] sm:$0xff]   ;;  %4485 = vmatmul.mubr.msk.bf16.gmra.mxu0 %vm461_vm2, %v340_v20  ;;  %4516 = vmatprep.subr.bf16.mxu1 %v4865_v7 }
  0x24   :  { %v56_v24 = vld [vmem:[%s7141_s0 + $0x38] sm:$0xf]  ;;  %v5253_v38 = vld [vmem:[#allocation2 + $0x28] sm:$0xf]  ;;  %v57_v44 = vld [vmem:[%s7141_s0 + $0x3c] sm:$0xf]  ;;  %4557 = vmatpush3.bf16.msra.mxu0 %v4866_v16 }
  0x25   :  { %89 = vst.msk [vmem:[#allocation2 + $0x38] sm:$0xf] %vm74_vm0, %v56_v24  ;;  %v72_v12 = vld [vmem:[%s7141_s0 + $0x78] sm:$0xf]  ;;  %v404_v47 = vsel %vm304_vm1, %v399_v1, %v403_v23  ;;  %90 = vst.msk [vmem:[#allocation2 + $0x3c] sm:$0xf] %vm74_vm0, %v57_v44  ;;  %4558 = vmatprep.subr.bf16.mxu0 %v4871_v37  ;;  %v343_v1 = vor.u32 %v341_v55, %v339_v0  ;;  %v407_v24 = vor.u32 %v405_v14, %v403_v23 }
  0x26   :  { %v73_v48 = vld [vmem:[%s7141_s0 + $0x7c] sm:$0xf]  ;;  %105 = vst.msk [vmem:[#allocation2 + $0x78] sm:$0xf] %vm74_vm0, %v72_v12  ;;  %v3930_v49 = vld [vmem:[%s7142_s1 + $0x80] sm:$0xf]  ;;  %4501 = vmatmul.mubr.msk.bf16.gmra.mxu1 %vm461_vm2, %v404_v47 }
  0x27   :  { %v5274_v52 = vld [vmem:[#allocation2 + $0x2c] sm:$0xf]  ;;  %106 = vst.msk [vmem:[#allocation2 + $0x7c] sm:$0xf] %vm74_vm0, %v73_v48  ;;  %139 = vst.msk [vmem:[#allocation2 + $0x80] sm:$0xf] %vm74_vm0, %v3930_v49  ;;  %4517 = vmatpush3.bf16.msra.mxu1 %v4865_v7 }
  0x28   :  { %v5282_v58 = vcombine.low %v5253_v38, %v5274_v52  ;;  %v5284_v60 = vld [vmem:[#allocation2 + $0x68] sm:$0xf]  ;;  %v5286_v16 = vld [vmem:[#allocation2 + $0x6c] sm:$0xf]  ;;  %v5294_v6 = vld [vmem:[#allocation2 + $0x30] sm:$0xf]  ;;  %4518 = vmatprep.subr.bf16.mxu1 %v4870_v21  ;;  %4559 = vmatpush3.bf16.msra.mxu0 %v4871_v37 }
  0x29   :  { %7201 = vst [vmem:[#allocation13_spill] sm:$0xff] %v5284_v60  ;;  %7202 = vst [vmem:[#allocation14_spill] sm:$0xff] %v5286_v16  ;;  %v5292_v2 = vcombine.low %v5284_v60, %v5286_v16  ;;  %v5296_v13 = vld [vmem:[#allocation2 + $0x34] sm:$0xf]  ;;  %v2015_v16 = vld [vmem:[#allocation2 + $0x4] sm:$0xe] }
  0x2a   :  { %v345_v15 = vshll.u32 %v5282_v58, 16  ;;  %v5301_v18 = vcombine.low %v5294_v6, %v5296_v13  ;;  %v349_v7 = vshrl.u32 %v5282_v58, 16  ;;  %v5304_v20 = vld [vmem:[#allocation2 + $0x70] sm:$0xf]  ;;  %v5306_v55 = vld [vmem:[#allocation2 + $0x74] sm:$0xf] }
  0x2b   :  { %7203 = vst [vmem:[#allocation15_spill] sm:$0xff] %v5304_v20  ;;  %7204 = vst [vmem:[#allocation16_spill] sm:$0xff] %v5306_v55  ;;  %v409_v44 = vshll.u32 %v5292_v2, 16  ;;  %v5313_v12 = vcombine.low %v5304_v20, %v5306_v55  ;;  %v413_v47 = vshrl.u32 %v5292_v2, 16  ;;  %4519 = vmatpush3.bf16.msra.mxu1 %v4870_v21  ;;  %v5335_v21 = vld [vmem:[%s7140_s2 + $0x78] sm:$0xff]   ;;  %v7225_v4 = vrot.slane %v5292_v2, 1 }
  0x2c   :  { %v347_v48 = vrot.slane %v345_v15, 1  ;;  %v353_v49 = vshll.u32 %v5301_v18, 16  ;;  %v5317_v62 = vld [vmem:[#allocation2 + $0x38] sm:$0xf]  ;;  %v357_v53 = vshrl.u32 %v5301_v18, 16  ;;  %4592 = vmatprep.subr.bf16.mxu1 %v5335_v21 }
  0x2d   :  { %7205 = vst [vmem:[#allocation17_spill] sm:$0xff] %v5317_v62  ;;  %v411_v37 = vrot.slane %v409_v44, 1  ;;  %v417_v63 = vshll.u32 %v5313_v12, 16  ;;  %v5321_v14 = vld [vmem:[#allocation2 + $0x3c] sm:$0xf] }
  0x2e   :  { %7206 = vst [vmem:[#allocation18_spill] sm:$0xff] %v5321_v14  ;;  %v5323_v23 = vld [vmem:[#allocation2 + $0x78] sm:$0xf]  ;;  %v348_v0 = vsel %vm304_vm1, %v343_v1, %v347_v48  ;;  %v351_v15 = vor.u32 %v349_v7, %v347_v48  ;;  %v355_v17 = vrot.slane %v353_v49, 1  ;;  %v5330_v8 = vcombine.low %v5317_v62, %v5321_v14  ;;  %v202_v51 = vld [vmem:[#allocation2 + $0x7c] sm:$0xf] }
  0x2f   :  { %7207 = vst [vmem:[#allocation19_spill] sm:$0xff] %v5323_v23  ;;  %4488 = vmatprep.mubr.msk.bf16.mxu0 %vm461_vm2, %v348_v0  ;;  %v412_v44 = vsel %vm304_vm1, %v407_v24, %v411_v37  ;;  %v415_v33 = vor.u32 %v413_v47, %v411_v37  ;;  %v419_v19 = vrot.slane %v417_v63, 1  ;;  %v5340_v1 = vcombine.low %v5323_v23, %v202_v51  ;;  %v4873_v7 = vld [vmem:[%s7140_s2 + $0x98] sm:$0xff]   ;;  %v5508_v55 = vld [vmem:[#allocation2 + $0x4c] sm:$0xf] }
  0x30   :  { %4504 = vmatprep.mubr.msk.bf16.mxu1 %vm461_vm2, %v412_v44  ;;  %v356_v48 = vsel %vm304_vm1, %v351_v15, %v355_v17  ;;  %v359_v49 = vor.u32 %v357_v53, %v355_v17  ;;  %v361_v31 = vshll.u32 %v5330_v8, 16  ;;  %v421_v0 = vshrl.u32 %v5313_v12, 16  ;;  %4632 = vmatprep.subr.bf16.mxu0 %v4873_v7  ;;  %v5489_v23 = vld [vmem:[#allocation2 + $0x38] sm:$0xf]  ;;  %7223 = vst [vmem:[#allocation35_spill] sm:$0xff] %v5508_v55 }
  0x31   :  { %4489 = vmatmul.mubr.msk.bf16.gmra.mxu0 %vm461_vm2, %v356_v48  ;;  %v420_v51 = vsel %vm304_vm1, %v415_v33, %v419_v19  ;;  %v425_v63 = vshll.u32 %v5340_v1, 16  ;;  %v365_v24 = vshrl.u32 %v5330_v8, 16  ;;  %v903_v37 = vrot.slane %v5075_v32, 1  ;;  %7220 = vst [vmem:[#allocation32_spill] sm:$0xff] %v5489_v23  ;;  %v5532_v36 = vld [vmem:[#allocation2 + $0x5c] sm:$0xf] }
  0x32   :  { %4505 = vmatmul.mubr.msk.bf16.gmra.mxu1 %vm461_vm2, %v420_v51  ;;  %v363_v17 = vrot.slane %v361_v31, 1  ;;  %v423_v53 = vor.u32 %v421_v0, %v419_v19  ;;  %v429_v33 = vshrl.u32 %v5340_v1, 16  ;;  %v5371_v51 = vld [vmem:[#allocation2 + $0x80] ss:$0 sps:$4 sm:$0x11]   ;;  %v923_v15 = vrot.slane %v5149_v9, 1 }
  0x33   :  { %v427_v44 = vrot.slane %v425_v63, 1  ;;  %v905_v63 = vrot.slane %v5103_v45, 1  ;;  %v925_v47 = vrot.slane %v5195_v54, 1  ;;  %7228 = vst [vmem:[#allocation39_spill] sm:$0xff] %v5532_v36 }
  0x34   :  { %v364_v43 = vsel %vm304_vm1, %v359_v49, %v363_v17  ;;  %v367_v5 = vor.u32 %v365_v24, %v363_v17  ;;  %v433_v24 = vshll.u32 %v5371_v51, 16  ;;  %v907_v17 = vrot.slane %v5139_v3, 1 }
  0x35   :  { %4492 = vmatprep.mubr.msk.bf16.mxu0 %vm461_vm2, %v364_v43  ;;  %v428_v31 = vsel %vm304_vm1, %v423_v53, %v427_v44  ;;  %v431_v49 = vor.u32 %v429_v33, %v427_v44  ;;  %v888_v43 = vld [vmem:[#allocation2] sm:$0xe]  ;;  %v4875_v44 = vld [vmem:[%s7140_s2 + $0x90] sm:$0xff]   ;;  %v909_v33 = vrot.slane %v5169_v22, 1  ;;  %v926_v50 = vsel %vm901_vm3, %v923_v15, %v925_v47 }
  0x36   :  { %4508 = vmatprep.mubr.msk.bf16.mxu1 %vm461_vm2, %v428_v31  ;;  %v372_v19 = vsel %vm304_vm1, %v367_v5, %v5128_v59  ;;  %v4035_v53 = vcombine.low %v888_v43, %v5055_v25  ;;  %v435_v31 = vrot.slane %v433_v24, 1  ;;  %v906_v5 = vsel %vm901_vm3, %v903_v37, %v905_v63 }
  0x37   :  { %v910_v43 = vsel %vm901_vm3, %v907_v17, %v909_v33  ;;  %v928_v46 = vsel %vm901_vm3, %v925_v47, %v7225_v4 }
  0x38   :  { %v902_v48 = vrot.slane %v4035_v53, 1  ;;  %v436_v59 = vsel %vm304_vm1, %v431_v49, %v435_v31  ;;  %v5405_v49 = vld [vmem:[#allocation2 + $0xc] sm:$0xf]  ;;  %v4879_v53 = vld [vmem:[%s7140_s2 + $0x80] sm:$0xff]  }
  0x39   :  { %4493 = vmatmul.mubr.msk.bf16.gmra.mxu0 %vm461_vm2, %v372_v19  ;;  %v908_v19 = vsel %vm901_vm3, %v905_v63, %v907_v17  ;;  %v5399_v63 = vld [vmem:[#allocation2 + $0x8] sm:$0xf]  ;;  %7211 = vst [vmem:[#allocation23_spill] sm:$0xff] %v5405_v49 }
  0x3a   :  { %4509 = vmatmul.mubr.msk.bf16.gmra.mxu1 %vm461_vm2, %v436_v59  ;;  %v904_v0 = vsel %vm901_vm3, %v902_v48, %v903_v37  ;;  %v911_v37 = vrot.slane %v5282_v58, 1  ;;  %v4874_v48 = vld [vmem:[%s7140_s2 + $0x70] sm:$0xff]   ;;  %7208 = vst [vmem:[#allocation20_spill] sm:$0xff] %v5399_v63 }
  0x3b   :  { %4520 = vmatprep.mubr.msk.bf16.mxu1 %vm461_vm2, %v5067_v29  ;;  %4560 = vmatprep.mubr.msk.bf16.mxu0 %vm461_vm2, %v904_v0  ;;  %v4877_v29 = vld [vmem:[%s7140_s2 + $0x88] sm:$0xff]   ;;  %v5401_v0 = vld [vmem:[#allocation2 + $0x10] sm:$0xf] }
  0x3c   :  { %7209 = vst [vmem:[#allocation21_spill] sm:$0xff] %v5401_v0  ;;  %v912_v59 = vsel %vm901_vm3, %v909_v33, %v911_v37  ;;  %v5440_v33 = vld [vmem:[%s7140_s2 + $0xd8] sm:$0xff]  }
  0x41   :  { %4561 = vmatmul.mubr.msk.bf16.vlgmr.msra.gmra.mxu0 %vm461_vm2, %v906_v5  ;;  %v5418_v5 = vld [vmem:[#allocation2 + $0x18] sm:$0xf] }
  0x42   :  { %4633 = vmatpush3.bf16.msra.mxu0 %v4873_v7  ;;  %4564 = vmatprep.mubr.msk.bf16.mxu0 %vm461_vm2, %v908_v19  ;;  %v5403_v7 = vld [vmem:[#allocation2 + $0x14] sm:$0xf]  ;;  %7212 = vst [vmem:[#allocation24_spill] sm:$0xff] %v5418_v5  ;;  %v5420_v19 = vld [vmem:[#allocation2 + $0x1c] sm:$0xf] }
  0x43   :  { %4634 = vmatprep.subr.bf16.mxu0 %v4875_v44  ;;  %7210 = vst [vmem:[#allocation22_spill] sm:$0xff] %v5403_v7  ;;  %4521 = vmatmul.mubr.msk.bf16.vlgmr.msra.gmra.mxu1 %vm461_vm2, %v5075_v32  ;;  %7213 = vst [vmem:[#allocation25_spill] sm:$0xff] %v5420_v19  ;;  %v4876_v32 = vld [vmem:[%s7140_s2 + $0x68] sm:$0xff]  }
  0x44   :  { %4593 = vmatpush3.bf16.msra.mxu1 %v5335_v21  ;;  %4524 = vmatprep.mubr.msk.bf16.mxu1 %vm461_vm2, %v5103_v45  ;;  %v915_v21 = vrot.slane %v5330_v8, 1  ;;  %v4878_v45 = vld [vmem:[%s7140_s2 + $0x60] sm:$0xff]  }
  0x45   :  { %4594 = vmatprep.subr.bf16.mxu1 %v4874_v48 }
  0x46   :  { %4635 = vmatpush3.bf16.msra.mxu0 %v4875_v44  ;;  %v913_v44 = vrot.slane %v5301_v18, 1 }
  0x47   :  { %4636 = vmatprep.subr.bf16.mxu0 %v4877_v29 }
  0x48   :  { %4595 = vmatpush3.bf16.msra.mxu1 %v4874_v48  ;;  %v916_v24 = vsel %vm901_vm3, %v913_v44, %v915_v21  ;;  %v919_v48 = vrot.slane %v5093_v40, 1 }
  0x49   :  { %4565 = vmatmul.mubr.msk.bf16.gmra.mxu0 %vm461_vm2, %v910_v43  ;;  %v5442_v43 = vld [vmem:[#allocation2 + $0x20] sm:$0xf]  ;;  %4596 = vmatprep.subr.bf16.mxu1 %v4876_v32 }
  0x4a   :  { %4568 = vmatprep.mubr.msk.bf16.mxu0 %vm461_vm2, %v912_v59  ;;  %4637 = vmatpush3.bf16.msra.mxu0 %v4877_v29  ;;  %7214 = vst [vmem:[#allocation26_spill] sm:$0xff] %v5442_v43  ;;  %v5444_v59 = vld [vmem:[#allocation2 + $0x24] sm:$0xf]  ;;  %v914_v29 = vsel %vm901_vm3, %v911_v37, %v913_v44  ;;  %v5459_v37 = vld [vmem:[%s7140_s2 + $0xb8] sm:$0xff]   ;;  %v5466_v44 = vld [vmem:[#allocation2 + $0x2c] sm:$0xf] }
  0x4b   :  { %4638 = vmatprep.subr.bf16.mxu0 %v4879_v53  ;;  %7215 = vst [vmem:[#allocation27_spill] sm:$0xff] %v5444_v59  ;;  %4525 = vmatmul.mubr.msk.bf16.gmra.mxu1 %vm461_vm2, %v5139_v3  ;;  %v917_v3 = vrot.slane %v5089_v39, 1  ;;  %7217 = vst [vmem:[#allocation29_spill] sm:$0xff] %v5466_v44 }
  0x4c   :  { %4528 = vmatprep.mubr.msk.bf16.mxu1 %vm461_vm2, %v5169_v22  ;;  %4597 = vmatpush3.bf16.msra.mxu1 %v4876_v32  ;;  %v5468_v22 = vld [vmem:[#allocation2 + $0x30] sm:$0xf]  ;;  %v5470_v32 = vld [vmem:[#allocation2 + $0x34] sm:$0xf] }
  0x4d   :  { %4598 = vmatprep.subr.bf16.mxu1 %v4878_v45  ;;  %7218 = vst [vmem:[#allocation30_spill] sm:$0xff] %v5468_v22  ;;  %7219 = vst [vmem:[#allocation31_spill] sm:$0xff] %v5470_v32  ;;  %v918_v17 = vsel %vm901_vm3, %v915_v21, %v917_v3  ;;  %v920_v31 = vsel %vm901_vm3, %v917_v3, %v919_v48  ;;  %v1493_v21 = vld [vmem:[#allocation2 + $0x4] sm:$0xf]  ;;  %v5500_v3 = vld [vmem:[#allocation2 + $0x3c] sm:$0xf]  ;;  %v5547_v47 = vcombine.low %v5466_v44, %v5468_v22 }
  0x4e   :  { %4639 = vmatpush3.bf16.msra.mxu0 %v4879_v53  ;;  %v5464_v53 = vld [vmem:[#allocation2 + $0x28] sm:$0xf]  ;;  %7221 = vst [vmem:[#allocation33_spill] sm:$0xff] %v5500_v3  ;;  %v5526_v42 = vcombine.low %v1493_v21, %v5399_v63  ;;  %v4153_v22 = vcombine.low %v2015_v16, %v5399_v63 }
  0x4f   :  { %4712 = vmatprep.subr.bf16.mxu0 %v5440_v33  ;;  %7216 = vst [vmem:[#allocation28_spill] sm:$0xff] %v5464_v53  ;;  %v5543_v4 = vcombine.low %v5444_v59, %v5464_v53  ;;  %v2037_v59 = vrot.slane %v5547_v47, 1 }
  0x50   :  { %4599 = vmatpush3.bf16.msra.mxu1 %v4878_v45  ;;  %v921_v45 = vrot.slane %v5123_v56, 1  ;;  %v2028_v16 = vrot.slane %v4153_v22, 1 }
  0x51   :  { %4569 = vmatmul.mubr.msk.bf16.gmra.mxu0 %vm461_vm2, %v914_v29  ;;  %4672 = vmatprep.subr.bf16.mxu1 %v5459_v37  ;;  %v5502_v29 = vld [vmem:[#allocation2 + $0x40] sm:$0xf]  ;;  %v2035_v53 = vrot.slane %v5543_v4, 1 }
  0x52   :  { %4572 = vmatprep.mubr.msk.bf16.mxu0 %vm461_vm2, %v916_v24  ;;  %v5504_v24 = vld [vmem:[#allocation2 + $0x44] sm:$0xf]  ;;  %v924_v60 = vsel %vm901_vm3, %v921_v45, %v923_v15  ;;  %v5539_v15 = vcombine.low %v5420_v19, %v5442_v43 }
  0x53   :  { %4529 = vmatmul.mubr.msk.bf16.gmra.mxu1 %vm461_vm2, %v5282_v58  ;;  %v5494_v58 = vcombine.low %v5405_v49, %v5401_v0  ;;  %v3931_v49 = vld [vmem:[%s7142_s1 + $0x84] sm:$0xf]  ;;  %v5528_v0 = vld [vmem:[#allocation2 + $0x54] sm:$0xf]  ;;  %v5603_v34 = vsel %vm901_vm3, %v2035_v53, %v2037_v59 }
  0x54   :  { %4532 = vmatprep.mubr.msk.bf16.mxu1 %vm461_vm2, %v5301_v18  ;;  %v5498_v18 = vcombine.low %v5403_v7, %v5418_v5  ;;  %v922_v5 = vsel %vm901_vm3, %v919_v48, %v921_v45  ;;  %v5515_v7 = vld [vmem:[#allocation2 + $0x50] sm:$0xf]  ;;  %7226 = vst [vmem:[#allocation37_spill] sm:$0xff] %v5528_v0  ;;  %v5530_v48 = vld [vmem:[#allocation2 + $0x58] sm:$0xf]  ;;  %v5551_v45 = vcombine.low %v5470_v32, %v5489_v23 }
  0x55   :  { %7224 = vst [vmem:[#allocation36_spill] sm:$0xff] %v5515_v7  ;;  %7227 = vst [vmem:[#allocation38_spill] sm:$0xff] %v5530_v48  ;;  %v5572_v23 = vcombine.low %v5508_v55, %v5515_v7  ;;  %v5576_v32 = vld [vmem:[#allocation2 + $0x68] sm:$0xf]  ;;  %v5587_v19 = vcombine.low %v5528_v0, %v5530_v48  ;;  %v1626_v55 = vshll.u32 %v5494_v58, 16 }
  0x56   :  { %v2031_v20 = vrot.slane %v5498_v18, 1  ;;  %140 = vst.msk [vmem:[#allocation2 + $0x84] sm:$0xf] %vm74_vm0, %v3931_v49  ;;  %v5553_v49 = vld [vmem:[#allocation2 + $0x60] sm:$0xf]  ;;  %v2039_v43 = vrot.slane %v5551_v45, 1 }
  0x57   :  { %7229 = vst [vmem:[#allocation40_spill] sm:$0xff] %v5553_v49  ;;  %v5591_v63 = vcombine.low %v5532_v36, %v5553_v49  ;;  %v5656_v7 = vld [vmem:[#allocation2 + $0x74] sm:$0xf]  ;;  %v5694_v49 = vld [vmem:[#allocation2 + $0x80] sm:$0xf] }
  0x58   :  { %v5606_v30 = vsel %vm901_vm3, %v2037_v59, %v2039_v43  ;;  %7239 = vst [vmem:[#allocation47_spill] sm:$0xff] %v5694_v49 }
  0x59   :  { %4573 = vmatmul.mubr.msk.bf16.gmra.mxu0 %vm461_vm2, %v918_v17  ;;  %v5506_v17 = vld [vmem:[#allocation2 + $0x48] sm:$0xf] }
  0x5a   :  { %4576 = vmatprep.mubr.msk.bf16.mxu0 %vm461_vm2, %v920_v31  ;;  %7222 = vst [vmem:[#allocation34_spill] sm:$0xff] %v5506_v17  ;;  %v2029_v31 = vrot.slane %v5494_v58, 1  ;;  %v5563_v21 = vcombine.low %v5504_v24, %v5506_v17  ;;  %v5638_v17 = vld [vmem:[#allocation2 + $0x6c] sm:$0xf] }
  0x5b   :  { %4533 = vmatmul.mubr.msk.bf16.gmra.mxu1 %vm461_vm2, %v5330_v8  ;;  %v5559_v8 = vcombine.low %v5500_v3, %v5502_v29  ;;  %v2033_v3 = vrot.slane %v5539_v15, 1 }
  0x5c   :  { %4536 = vmatprep.mubr.msk.bf16.mxu1 %vm461_vm2, %v5089_v39  ;;  %v5567_v44 = vsel %vm901_vm3, %v2029_v31, %v2031_v20  ;;  %v5574_v39 = vld [vmem:[#allocation2 + $0x64] sm:$0xf]  ;;  %v5600_v22 = vsel %vm901_vm3, %v2028_v16, %v2029_v31 }
  0x5d   :  { %7230 = vst [vmem:[#allocation41_spill] sm:$0xff] %v5567_v44  ;;  %7231 = vst [vmem:[#allocation42_spill] sm:$0xff] %v5574_v39  ;;  %v2043_v44 = vrot.slane %v5563_v21, 1  ;;  %v5594_v35 = vsel %vm901_vm3, %v2031_v20, %v2033_v3  ;;  %v5622_v59 = vcombine.low %v5574_v39, %v5576_v32  ;;  %v1621_v20 = vshll.u32 %v5526_v42, 16  ;;  %v5692_v39 = vld [vmem:[#allocation2 + $0x7c] sm:$0xf] }
  0x61   :  { %4577 = vmatmul.mubr.msk.bf16.gmra.mxu0 %vm461_vm2, %v922_v5  ;;  %v2041_v5 = vrot.slane %v5559_v8, 1 }
  0x62   :  { %4580 = vmatprep.mubr.msk.bf16.mxu0 %vm461_vm2, %v924_v60  ;;  %v5597_v60 = vsel %vm901_vm3, %v2033_v3, %v2035_v53  ;;  %v2045_v3 = vrot.slane %v5572_v23, 1  ;;  %v931_v53 = vrot.slane %v5340_v1, 1 }
  0x63   :  { %v5609_v14 = vsel %vm901_vm3, %v2039_v43, %v2041_v5  ;;  %v5612_v62 = vsel %vm901_vm3, %v2041_v5, %v2043_v44  ;;  %v2047_v43 = vrot.slane %v5587_v19, 1  ;;  %4537 = vmatmul.mubr.msk.bf16.gmra.mxu1 %vm461_vm2, %v5093_v40  ;;  %v1619_v5 = vshrl.u32 %v5526_v42, 16 }
  0x64   :  { %7232 = vst [vmem:[#allocation43_spill] sm:$0xff] %v5612_v62  ;;  %v5632_v31 = vsel %vm901_vm3, %v2043_v44, %v2045_v3  ;;  %v2049_v62 = vrot.slane %v5591_v63, 1  ;;  %4540 = vmatprep.mubr.msk.bf16.mxu1 %vm461_vm2, %v5123_v56  ;;  %v2051_v42 = vrot.slane %v5622_v59, 1  ;;  %v5647_v44 = vld [vmem:[#allocation2 + $0x70] sm:$0xf] }
  0x65   :  { %v5641_v16 = vsel %vm901_vm3, %v2045_v3, %v2047_v43  ;;  %v5658_v3 = vld [vmem:[#allocation2 + $0x78] sm:$0xf]  ;;  %v5662_v40 = vcombine.low %v5638_v17, %v5647_v44 }
  0x66   :  { %7233 = vst [vmem:[#allocation44_spill] sm:$0xff] %v5641_v16  ;;  %v5650_v0 = vsel %vm901_vm3, %v2047_v43, %v2049_v62  ;;  %v5654_v56 = vsel %vm901_vm3, %v2049_v62, %v2051_v42  ;;  %v7236_v16 = vrot.slane %v5313_v12, 1  ;;  %v7237_v43 = vrot.slane %v5292_v2, 1 }
  0x67   :  { %7234 = vst [vmem:[#allocation45_spill] sm:$0xff] %v5650_v0  ;;  %7235 = vst [vmem:[#allocation46_spill] sm:$0xff] %v5654_v56  ;;  %v1623_v0 = vrot.slane %v1621_v20, 1  ;;  %v2053_v36 = vrot.slane %v5662_v40, 1  ;;  %v933_v20 = vrot.slane %v5371_v51, 1  ;;  %v1630_v51 = vshrl.u32 %v5494_v58, 16 }
  0x68   :  { %v7238_v62 = vmov %v7236_v16  ;;  %v1646_v58 = vshrl.u32 %v5539_v15, 16 }
  0x69   :  { %4581 = vmatmul.mubr.msk.bf16.gmra.mxu0 %vm461_vm2, %v926_v50  ;;  %v932_v56 = vsel %vm901_vm3, %v7238_v62, %v931_v53  ;;  %v5681_v50 = vcombine.low %v5656_v7, %v5658_v3  ;;  %v1624_v62 = vor.u32 %v1623_v0, %v1619_v5  ;;  %v5706_v0 = vcombine.low %v5692_v39, %v5694_v49 }
  0x6a   :  { %4584 = vmatprep.mubr.msk.bf16.mxu0 %vm461_vm2, %v928_v46  ;;  %v930_v46 = vsel %vm901_vm3, %v7237_v43, %v7236_v16  ;;  %v1642_v5 = vshll.u32 %v5539_v15, 16 }
  0x6b   :  { %4541 = vmatmul.mubr.msk.bf16.gmra.mxu1 %vm461_vm2, %v5149_v9  ;;  %v5687_v9 = vsel %vm901_vm3, %v2051_v42, %v2053_v36  ;;  %v2055_v43 = vrot.slane %v5681_v50, 1 }
  0x6c   :  { %4544 = vmatprep.mubr.msk.bf16.mxu1 %vm461_vm2, %v5195_v54  ;;  %v1628_v54 = vrot.slane %v1626_v55, 1  ;;  %v1644_v16 = vrot.slane %v1642_v5, 1  ;;  %v1666_v5 = vshll.u32 %v5551_v45, 16 }
  0x6d   :  { %v5697_v48 = vsel %vm901_vm3, %v2053_v36, %v2055_v43  ;;  %v1638_v36 = vshrl.u32 %v5498_v18, 16 }
  0x6e   :  { %7240 = vst [vmem:[#allocation48_spill] sm:$0xff] %v5697_v48  ;;  %v1629_v55 = vsel %vm304_vm1, %v1624_v62, %v1628_v54  ;;  %v1632_v42 = vor.u32 %v1630_v51, %v1628_v54  ;;  %v1650_v48 = vshll.u32 %v5543_v4, 16  ;;  %v4891_v51 = vld [vmem:[%s7140_s2 + $0xd0] sm:$0xff]  }
  0x70   :  { %v1652_v15 = vrot.slane %v1650_v48, 1  ;;  %v7242_v48 = vcombine.low %v5062_v27, %v5064_v28  ;;  %v1668_v27 = vrot.slane %v1666_v5, 1  ;;  %v4896_v28 = vld [vmem:[%s7140_s2 + $0xa8] sm:$0xff]   ;;  %v1694_v5 = vshrl.u32 %v5572_v23, 16 }
  0x71   :  { %4585 = vmatmul.mubr.msk.bf16.gmra.mxu0 %vm461_vm2, %v930_v46  ;;  %v1634_v46 = vshll.u32 %v5498_v18, 16 }
  0x72   :  { %4588 = vmatprep.mubr.msk.bf16.mxu0 %vm461_vm2, %v932_v56  ;;  %v934_v56 = vsel %vm901_vm3, %v931_v53, %v933_v20  ;;  %v2057_v53 = vrot.slane %v5706_v0, 1 }
  0x73   :  { %4545 = vmatmul.mubr.msk.bf16.gmra.mxu1 %vm461_vm2, %v5292_v2  ;;  %v1636_v20 = vrot.slane %v1634_v46, 1  ;;  %v5720_v2 = vld [vmem:[#allocation2 + $0x84] ss:$0 sps:$4 sm:$0x11]  }
  0x74   :  { %4548 = vmatprep.mubr.msk.bf16.mxu1 %vm461_vm2, %v5313_v12  ;;  %v5723_v18 = vsel %vm901_vm3, %v2055_v43, %v2057_v53  ;;  %v2059_v12 = vrot.slane %v5720_v2, 1  ;;  %v1654_v43 = vshrl.u32 %v5543_v4, 16 }
  0x75   :  { %v1640_v62 = vor.u32 %v1638_v36, %v1636_v20  ;;  %v1637_v49 = vsel %vm304_vm1, %v1632_v42, %v1636_v20  ;;  %v7241_v42 = vcombine.low %v5055_v25, %v5057_v26  ;;  %v4897_v36 = vld [vmem:[%s7140_s2 + $0xc8] sm:$0xff]   ;;  %v4890_v25 = vld [vmem:[%s7140_s2 + $0xb0] sm:$0xff]  }
  0x76   :  { %v5730_v46 = vsel %vm901_vm3, %v2057_v53, %v2059_v12  ;;  %v1656_v4 = vor.u32 %v1654_v43, %v1652_v15  ;;  %v1674_v53 = vshll.u32 %v5559_v8, 16  ;;  %v7244_v43 = vcombine.low %v5130_v61, %v5151_v10  ;;  %v5803_v61 = vld [vmem:[%s7140_s2 + $0xf8] sm:$0xff]  }
  0x77   :  { %v1645_v54 = vsel %vm304_vm1, %v1640_v62, %v1644_v16 }
  0x78   :  { %v1676_v62 = vrot.slane %v1674_v53, 1 }
  0x79   :  { %4589 = vmatmul.mubr.msk.bf16.gmra.mxu0 %vm461_vm2, %v934_v56  ;;  %v1658_v56 = vshll.u32 %v5547_v47, 16 }
  0x7a   :  { %4640 = vmatprep.mubr.msk.bf16.mxu0 %vm461_vm2, %v1629_v55 }
  0x7b   :  { %4549 = vmatmul.mubr.msk.bf16.gmra.mxu1 %vm461_vm2, %v5340_v1  ;;  %v1648_v1 = vor.u32 %v1646_v58, %v1644_v16  ;;  %v1660_v55 = vrot.slane %v1658_v56, 1  ;;  %v1670_v16 = vshrl.u32 %v5551_v45, 16  ;;  %v4903_v58 = vld [vmem:[%s7140_s2 + $0xc0] sm:$0xff]  }
  0x7c   :  { %4600 = vmatprep.mubr.msk.bf16.mxu1 %vm461_vm2, %v7241_v42  ;;  %v1690_v42 = vshll.u32 %v5572_v23, 16  ;;  %v1706_v23 = vshll.u32 %v5591_v63, 16 }
  0x7d   :  { %v1653_v26 = vsel %vm304_vm1, %v1648_v1, %v1652_v15  ;;  %v1672_v20 = vor.u32 %v1670_v16, %v1668_v27  ;;  %v7245_v15 = vcombine.low %v5153_v11, %v5253_v38  ;;  %v4933_v1 = vmov 0  }
  0x7e   :  { %v1692_v38 = vrot.slane %v1690_v42, 1  ;;  %4841 = vset.pattern.permute.xlu0 %v4933_v1  ;;  %4842 = vset.pattern.permute.xlu1 %v4933_v1 }
  0x7f   :  { %v1677_v56 = vsel %vm304_vm1, %v1672_v20, %v1676_v62 }
  0x81   :  { %4641 = vmatmul.mubr.msk.bf16.vlgmr.msra.gmra.mxu0 %vm461_vm2, %v1637_v49  ;;  %v1661_v49 = vsel %vm304_vm1, %v1656_v4, %v1660_v55 }
  0x82   :  { %4713 = vmatpush3.bf16.msra.mxu0 %v5440_v33  ;;  %4644 = vmatprep.mubr.msk.bf16.mxu0 %vm461_vm2, %v1645_v54  ;;  %v1662_v33 = vshrl.u32 %v5547_v47, 16  ;;  %v7243_v47 = vcombine.low %v5095_v41, %v5125_v57  ;;  %v5779_v41 = vld [vmem:[%s7140_s2 + $0x118] sm:$0xff]   ;;  %v1682_v57 = vshll.u32 %v5563_v21, 16  ;;  %v1678_v54 = vshrl.u32 %v5559_v8, 16 }
  0x83   :  { %4714 = vmatprep.subr.bf16.mxu0 %v4891_v51  ;;  %4601 = vmatmul.mubr.msk.bf16.vlgmr.msra.gmra.mxu1 %vm461_vm2, %v7242_v48  ;;  %v7246_v48 = vcombine.low %v5274_v52, %v5294_v6  ;;  %v1696_v6 = vor.u32 %v1694_v5, %v1692_v38 }
  0x84   :  { %4673 = vmatpush3.bf16.msra.mxu1 %v5459_v37  ;;  %4604 = vmatprep.mubr.msk.bf16.mxu1 %vm461_vm2, %v7243_v47  ;;  %v1664_v45 = vor.u32 %v1662_v33, %v1660_v55  ;;  %v4902_v37 = vld [vmem:[%s7140_s2 + $0xa0] sm:$0xff]   ;;  %v1684_v8 = vrot.slane %v1682_v57, 1  ;;  %v1680_v10 = vor.u32 %v1678_v54, %v1676_v62  ;;  %v1698_v55 = vshll.u32 %v5587_v19, 16  ;;  %v3453_v33 = vld [vmem:[%s7143_s3 + $0x8] sm:$0xff]  ;;  %v3455_v47 = vld [vmem:[%s7143_s3 + $0x18] sm:$0xff] }
  0x85   :  { %4674 = vmatprep.subr.bf16.mxu1 %v4890_v25  ;;  %vm3485_vm6 = vcmp.gt.f32.partialorder %v3453_v33, 0.5  ;;  %vm3487_vm7 = vcmp.gt.f32.partialorder %v3455_v47, 0.5  ;;  %v1714_v62 = vshll.u32 %v5622_v59, 16  ;;  %v3457_v54 = vld [vmem:[%s7143_s3 + $0x28] sm:$0xff] }
  0x86   :  { %4715 = vmatpush3.bf16.msra.mxu0 %v4891_v51  ;;  %v1669_v12 = vsel %vm304_vm1, %v1664_v45, %v1668_v27  ;;  %v1686_v51 = vshrl.u32 %v5563_v21, 16  ;;  %v3452_v21 = vld [vmem:[%s7143_s3] sm:$0xff]  ;;  %v1700_v52 = vrot.slane %v1698_v55, 1  ;;  %v3519_v45 = vsel %vm3487_vm7, 1, %v4933_v1  ;;  %v3459_v55 = vld [vmem:[%s7143_s3 + $0x38] sm:$0xff] }
  0x87   :  { %4716 = vmatprep.subr.bf16.mxu0 %v4897_v36  ;;  %vm3484_vm4 = vcmp.gt.f32.partialorder %v3452_v21, 0.5  ;;  %vm3489_vm9 = vcmp.gt.f32.partialorder %v3457_v54, 0.5  ;;  %vm3491_vm11 = vcmp.gt.f32.partialorder %v3459_v55, 0.5 }
  0x88   :  { %4675 = vmatpush3.bf16.msra.mxu1 %v4890_v25  ;;  %v1688_v11 = vor.u32 %v1686_v51, %v1684_v8  ;;  %v3516_v4 = vsel %vm3484_vm4, 1, %v4933_v1  ;;  %v1702_v25 = vshrl.u32 %v5587_v19, 16  ;;  %v7247_v19 = vld [vmem:[#allocation17_spill] sm:$0xff]  ;;  %v1701_v57 = vsel %vm304_vm1, %v1696_v6, %v1700_v52  ;;  %v7250_v51 = vld [vmem:[#allocation3_spill] sm:$0xff] }
  0x89   :  { %4645 = vmatmul.mubr.msk.bf16.gmra.mxu0 %vm461_vm2, %v1653_v26  ;;  %4676 = vmatprep.subr.bf16.mxu1 %v4896_v28  ;;  %v3454_v26 = vld [vmem:[%s7143_s3 + $0x10] sm:$0xff]  ;;  %v7248_v16 = vcombine.low %v5296_v13, %v7247_v19  ;;  %v3456_v13 = vld [vmem:[%s7143_s3 + $0x20] sm:$0xff]  ;;  %v3521_v21 = vsel %vm3489_vm9, 1, %v4933_v1  ;;  %v1734_v19 = vshrl.u32 %v5681_v50, 16 }
  0x8a   :  { %4648 = vmatprep.mubr.msk.bf16.mxu0 %vm461_vm2, %v1661_v49  ;;  %4717 = vmatpush3.bf16.msra.mxu0 %v4897_v36  ;;  %v1685_v36 = vsel %vm304_vm1, %v1680_v10, %v1684_v8  ;;  %v1693_v49 = vsel %vm304_vm1, %v1688_v11, %v1692_v38  ;;  %vm3486_vm5 = vcmp.gt.f32.partialorder %v3454_v26, 0.5  ;;  %v1704_v27 = vor.u32 %v1702_v25, %v1700_v52  ;;  %v7253_v8 = vld [vmem:[#allocation5_spill] sm:$0xff]  ;;  %v7256_v52 = vld [vmem:[#allocation7_spill] sm:$0xff] }
  0x8b   :  { %4718 = vmatprep.subr.bf16.mxu0 %v4903_v58  ;;  %4605 = vmatmul.mubr.msk.bf16.gmra.mxu1 %vm461_vm2, %v7244_v43  ;;  %v3518_v53 = vsel %vm3486_vm5, 1, %v4933_v1  ;;  %vm3488_vm8 = vcmp.gt.f32.partialorder %v3456_v13, 0.5  ;;  %v3458_v43 = vld [vmem:[%s7143_s3 + $0x30] sm:$0xff]  ;;  %v1716_v38 = vrot.slane %v1714_v62, 1  ;;  %v3523_v26 = vsel %vm3491_vm11, 1, %v4933_v1 }
  0x8c   :  { %4608 = vmatprep.mubr.msk.bf16.mxu1 %vm461_vm2, %v7245_v15  ;;  %4677 = vmatpush3.bf16.msra.mxu1 %v4896_v28  ;;  %v1708_v28 = vrot.slane %v1706_v23, 1  ;;  %v3520_v20 = vsel %vm3488_vm8, 1, %v4933_v1  ;;  %vm3490_vm10 = vcmp.gt.f32.partialorder %v3458_v43, 0.5  ;;  %v1726_v23 = vshrl.u32 %v5662_v40, 16  ;;  %v7259_v13 = vld [vmem:[#allocation9_spill] sm:$0xff] }
  0x8d   :  { %4678 = vmatprep.subr.bf16.mxu1 %v4902_v37  ;;  %3549 = vperm.xlu0 %4841, %v3516_v4   ;;  %v3522_v11 = vsel %vm3490_vm10, 1, %v4933_v1 }
  0x8e   :  { %4719 = vmatpush3.bf16.msra.mxu0 %v4903_v58  ;;  %v3517_v58 = vsel %vm3485_vm6, 1, %v4933_v1  ;;  %3555 = vperm.xlu1 %4842, %v3518_v53   ;;  %v1709_v15 = vsel %vm304_vm1, %v1704_v27, %v1708_v28  ;;  %v3462_v53 = vld [vmem:[%s7143_s3 + $0x50] sm:$0xff] }
  0x8f   :  { %4792 = vmatprep.subr.bf16.mxu0 %v5779_v41  ;;  %vm3494_vm14 = vcmp.gt.f32.partialorder %v3462_v53, 0.5  ;;  %v7267_v53 = vld [vmem:[#allocation14_spill] sm:$0xff] }
  0x90   :  { %4679 = vmatpush3.bf16.msra.mxu1 %v4902_v37  ;;  %v1710_v37 = vshrl.u32 %v5591_v63, 16  ;;  %v1722_v63 = vshll.u32 %v5662_v40, 16  ;;  %v1738_v40 = vshll.u32 %v5706_v0, 16 }
  0x91   :  { %4649 = vmatmul.mubr.msk.bf16.gmra.mxu0 %vm461_vm2, %v1669_v12  ;;  %4752 = vmatprep.subr.bf16.mxu1 %v5803_v61  ;;  %v1718_v12 = vshrl.u32 %v5622_v59, 16  ;;  %v7252_v59 = vld [vmem:[#allocation4_spill] sm:$0xff] }
  0x92   :  { %4652 = vmatprep.mubr.msk.bf16.mxu0 %vm461_vm2, %v1677_v56  ;;  %3552 = vperm.xlu0 %4841, %v3517_v58   ;;  %v7249_v56 = vld [vmem:[#allocation18_spill] sm:$0xff]  ;;  %v7254_v10 = vcombine.low %v7252_v59, %v7253_v8  ;;  %v1712_v4 = vor.u32 %v1710_v37, %v1708_v28  ;;  %v1724_v25 = vrot.slane %v1722_v63, 1  ;;  %v3464_v37 = vld [vmem:[%s7143_s3 + $0x60] sm:$0xff]  ;;  %v1740_v54 = vrot.slane %v1738_v40, 1  ;;  %v3465_v63 = vld [vmem:[%s7143_s3 + $0x68] sm:$0xff] }
  0x93   :  { %4609 = vmatmul.mubr.msk.bf16.gmra.mxu1 %vm461_vm2, %v7246_v48  ;;  %3558 = vperm.xlu1 %4842, %v3519_v45   ;;  %v7251_v42 = vcombine.low %v7249_v56, %v7250_v51  ;;  %v1720_v5 = vor.u32 %v1718_v12, %v1716_v38  ;;  %v1730_v48 = vshll.u32 %v5681_v50, 16  ;;  %v7255_v58 = vld [vmem:[#allocation6_spill] sm:$0xff]  ;;  %v7258_v50 = vld [vmem:[#allocation8_spill] sm:$0xff]  ;;  %v3526_v45 = vsel %vm3494_vm14, 1, %v4933_v1  ;;  %v3466_v59 = vld [vmem:[%s7143_s3 + $0x70] sm:$0xff] }
  0x94   :  { %4612 = vmatprep.mubr.msk.bf16.mxu1 %vm461_vm2, %v7248_v16  ;;  %v3461_v16 = vld [vmem:[%s7143_s3 + $0x48] sm:$0xff]  ;;  %v7257_v6 = vcombine.low %v7255_v58, %v7256_v52  ;;  %v7260_v27 = vcombine.low %v7258_v50, %v7259_v13  ;;  %v1728_v62 = vor.u32 %v1726_v23, %v1724_v25  ;;  %vm3496_vm4 = vcmp.gt.f32.partialorder %v3464_v37, 0.5  ;;  %v7261_v8 = vld [vmem:[#allocation10_spill] sm:$0xff]  ;;  %v7268_v58 = vld [vmem:[#allocation15_spill] sm:$0xff] }
  0x95   :  { %v1725_v47 = vsel %vm304_vm1, %v1720_v5, %v1724_v25  ;;  %vm3493_vm13 = vcmp.gt.f32.partialorder %v3461_v16, 0.5  ;;  %v3528_v56 = vsel %vm3496_vm4, 1, %v4933_v1  ;;  %vm3497_vm5 = vcmp.gt.f32.partialorder %v3465_v63, 0.5  ;;  %v3470_v16 = vld [vmem:[%s7143_s3 + $0x90] sm:$0xff]  ;;  %v1200_v50 = vld [vmem:[#allocation2 + $0x80] sm:$0xf] }
  0x96   :  { %3561 = vperm.xlu0 %4841, %v3520_v20   ;;  %v3525_v28 = vsel %vm3493_vm13, 1, %v4933_v1  ;;  %v1732_v20 = vrot.slane %v1730_v48, 1  ;;  %vm3498_vm6 = vcmp.gt.f32.partialorder %v3466_v59, 0.5  ;;  %v7269_v52 = vcombine.low %v7267_v53, %v7268_v58  ;;  %v4932_v37 = vld [vmem:[#allocation2 + $0x7c] sm:$0xf]  ;;  %v7276_v59 = vld [vmem:[#allocation21_spill] sm:$0xff] }
  0x97   :  { %3564 = vperm.xlu1 %4842, %v3521_v21   ;;  %v3530_v55 = vsel %vm3498_vm6, 1, %v4933_v1  ;;  %vm3502_vm9 = vcmp.gt.f32.partialorder %v3470_v16, 0.5  ;;  %v7286_v16 = vld [vmem:[#allocation28_spill] sm:$0xff]  ;;  %v3480_v58 = vld [vmem:[%s7143_s3 + $0xe0] sm:$0xff] }
  0x98   :  { %v1736_v12 = vor.u32 %v1734_v19, %v1732_v20  ;;  %v1733_v51 = vsel %vm304_vm1, %v1728_v62, %v1732_v20  ;;  %v3469_v19 = vld [vmem:[%s7143_s3 + $0x88] sm:$0xff]  ;;  %v3471_v62 = vld [vmem:[%s7143_s3 + $0x98] sm:$0xff] }
  0x99   :  { %4653 = vmatmul.mubr.msk.bf16.gmra.mxu0 %vm461_vm2, %v1685_v36  ;;  %v3460_v36 = vld [vmem:[%s7143_s3 + $0x40] sm:$0xff]  ;;  %vm3503_vm10 = vcmp.gt.f32.partialorder %v3471_v62, 0.5 }
  0x9a   :  { %4656 = vmatprep.mubr.msk.bf16.mxu0 %vm461_vm2, %v1693_v49  ;;  %3567 = vperm.xlu0 %4841, %v3522_v11   ;;  %vm3492_vm12 = vcmp.gt.f32.partialorder %v3460_v36, 0.5  ;;  %v1717_v49 = vsel %vm304_vm1, %v1712_v4, %v1716_v38  ;;  %v1741_v11 = vsel %vm304_vm1, %v1736_v12, %v1740_v54  ;;  %v3529_v4 = vsel %vm3497_vm5, 1, %v4933_v1  ;;  %v3932_v36 = vld [vmem:[%s7142_s1 + $0x88] sm:$0xf] }
  0x9b   :  { %4613 = vmatmul.mubr.msk.bf16.gmra.mxu1 %vm461_vm2, %v7251_v42  ;;  %v3524_v33 = vsel %vm3492_vm12, 1, %v4933_v1  ;;  %3570 = vperm.xlu1 %4842, %v3523_v26   ;;  %v1742_v42 = vshrl.u32 %v5706_v0, 16  ;;  %v7264_v0 = vld [vmem:[#allocation12_spill] sm:$0xff]  ;;  %141 = vst.msk [vmem:[#allocation2 + $0x88] sm:$0xf] %vm74_vm0, %v3932_v36  ;;  %v3467_v26 = vld [vmem:[%s7143_s3 + $0x78] sm:$0xff]  ;;  %v4079_v12 = vcombine.low %v4932_v37, %v1200_v50 }
  0x9c   :  { %4616 = vmatprep.mubr.msk.bf16.mxu1 %vm461_vm2, %v7254_v10  ;;  %v7262_v10 = vld [vmem:[#allocation11_spill] sm:$0xff]  ;;  %vm3499_vm7 = vcmp.gt.f32.partialorder %v3467_v26, 0.5  ;;  %vm3501_vm0 = vcmp.gt.f32.partialorder %v3469_v19, 0.5  ;;  %v3478_v36 = vld [vmem:[%s7143_s3 + $0xd0] sm:$0xff] }
  0x9d   :  { %v7263_v21 = vcombine.low %v7261_v8, %v7262_v10  ;;  %v1744_v5 = vor.u32 %v1742_v42, %v1740_v54  ;;  %v3531_v48 = vsel %vm3499_vm7, 1, %v4933_v1  ;;  %v3533_v13 = vsel %vm3501_vm0, 1, %v4933_v1  ;;  %v4909_v42 = vld [vmem:[%s7140_s2 + $0x110] sm:$0xff]   ;;  %v7277_v8 = vld [vmem:[#allocation22_spill] sm:$0xff] }
  0x9e   :  { %3573 = vperm.xlu0 %4841, %v3524_v33   ;;  %v3468_v33 = vld [vmem:[%s7143_s3 + $0x80] sm:$0xff]  ;;  %v3535_v54 = vsel %vm3503_vm10, 1, %v4933_v1  ;;  %v7278_v10 = vcombine.low %v7276_v59, %v7277_v8  ;;  %vm3510_vm5 = vcmp.gt.f32.partialorder %v3478_v36, 0.5  ;;  %vm3512_vm7 = vcmp.gt.f32.partialorder %v3480_v58, 0.5  ;;  %v7303_v8 = vld [vmem:[#allocation38_spill] sm:$0xff] }
  0x9f   :  { %3576 = vperm.xlu1 %4842, %v3525_v28   ;;  %vm3500_vm8 = vcmp.gt.f32.partialorder %v3468_v33, 0.5  ;;  %v7273_v28 = vld [vmem:[#allocation20_spill] sm:$0xff]  ;;  %v7283_v33 = vld [vmem:[#allocation26_spill] sm:$0xff] }
  0xa0   :  { %v7309_v36 = vld [vmem:[#allocation42_spill] sm:$0xff] }
  0xa1   :  { %4657 = vmatmul.mubr.msk.bf16.gmra.mxu0 %vm461_vm2, %v1701_v57  ;;  %v3463_v57 = vld [vmem:[%s7143_s3 + $0x58] sm:$0xff] }
  0xa2   :  { %4660 = vmatprep.mubr.msk.bf16.mxu0 %vm461_vm2, %v1709_v15  ;;  %3579 = vperm.xlu0 %4841, %v3526_v45   ;;  %vm3495_vm15 = vcmp.gt.f32.partialorder %v3463_v57, 0.5  ;;  %v1746_v15 = vshll.u32 %v5720_v2, 16  ;;  %v7265_v2 = vld [vmem:[#allocation13_spill] sm:$0xff]  ;;  %v7274_v45 = vld [vmem:[#allocation23_spill] sm:$0xff] }
  0xa3   :  { %4617 = vmatmul.mubr.msk.bf16.gmra.mxu1 %vm461_vm2, %v7257_v6  ;;  %v3527_v43 = vsel %vm3495_vm15, 1, %v4933_v1  ;;  %v7266_v38 = vcombine.low %v7264_v0, %v7265_v2  ;;  %v7270_v6 = vld [vmem:[#allocation16_spill] sm:$0xff]  ;;  %v7275_v20 = vcombine.low %v7273_v28, %v7274_v45  ;;  %v3472_v57 = vld [vmem:[%s7143_s3 + $0xa0] sm:$0xff]  ;;  %v7289_v45 = vld [vmem:[#allocation30_spill] sm:$0xff] }
  0xa4   :  { %4620 = vmatprep.mubr.msk.bf16.mxu1 %vm461_vm2, %v7260_v27  ;;  %3582 = vperm.xlu1 %4842, %v3527_v43   ;;  %v1748_v25 = vrot.slane %v1746_v15, 1  ;;  %v3534_v27 = vsel %vm3502_vm9, 1, %v4933_v1  ;;  %vm3504_vm11 = vcmp.gt.f32.partialorder %v3472_v57, 0.5  ;;  %v3476_v2 = vld [vmem:[%s7143_s3 + $0xc0] sm:$0xff]  ;;  %v7293_v57 = vld [vmem:[#allocation33_spill] sm:$0xff] }
  0xa5   :  { %v3536_v43 = vsel %vm3504_vm11, 1, %v4933_v1  ;;  %vm3508_vm15 = vcmp.gt.f32.partialorder %v3476_v2, 0.5  ;;  %v7306_v2 = vld [vmem:[#allocation44_spill] sm:$0xff] }
  0xa6   :  { %3585 = vperm.xlu0 %4841, %v3528_v56   ;;  %v1749_v23 = vsel %vm304_vm1, %v1744_v5, %v1748_v25  ;;  %v3473_v56 = vld [vmem:[%s7143_s3 + $0xa8] sm:$0xff]  ;;  %v7282_v5 = vld [vmem:[#allocation41_spill] sm:$0xff]  ;;  %v4913_v25 = vld [vmem:[%s7140_s2 + $0x100] sm:$0xff]   ;;  %v3540_v26 = vsel %vm3508_vm15, 1, %v4933_v1 }
  0xa7   :  { %vm3505_vm12 = vcmp.gt.f32.partialorder %v3473_v56, 0.5  ;;  %v7297_v56 = vld [vmem:[#allocation35_spill] sm:$0xff] }
  0xa8   :  { %3588 = vperm.xlu1 %4842, %v3529_v4   ;;  %v3537_v15 = vsel %vm3505_vm12, 1, %v4933_v1  ;;  %v4908_v4 = vld [vmem:[%s7140_s2 + $0xf0] sm:$0xff]  }
  0xa9   :  { %4661 = vmatmul.mubr.msk.bf16.gmra.mxu0 %vm461_vm2, %v1717_v49  ;;  %v3532_v49 = vsel %vm3500_vm8, 1, %v4933_v1 }
  0xaa   :  { %4664 = vmatprep.mubr.msk.bf16.mxu0 %vm461_vm2, %v1725_v47  ;;  %3591 = vperm.xlu0 %4841, %v3530_v55   ;;  %v7271_v47 = vld [vmem:[#allocation19_spill] sm:$0xff]  ;;  %v3477_v55 = vld [vmem:[%s7143_s3 + $0xc8] sm:$0xff] }
  0xab   :  { %4621 = vmatmul.mubr.msk.bf16.gmra.mxu1 %vm461_vm2, %v7263_v21  ;;  %v7272_v40 = vcombine.low %v7270_v6, %v7271_v47  ;;  %v7279_v21 = vld [vmem:[#allocation24_spill] sm:$0xff]  ;;  %vm3509_vm4 = vcmp.gt.f32.partialorder %v3477_v55, 0.5  ;;  %v4912_v6 = vld [vmem:[%s7140_s2 + $0xe0] sm:$0xff]  }
  0xac   :  { %4624 = vmatprep.mubr.msk.bf16.mxu1 %vm461_vm2, %v7266_v38  ;;  %3594 = vperm.xlu1 %4842, %v3531_v48   ;;  %v4911_v38 = vld [vmem:[%s7140_s2 + $0x108] sm:$0xff]   ;;  %v7284_v48 = vld [vmem:[#allocation27_spill] sm:$0xff]  ;;  %v3541_v19 = vsel %vm3509_vm4, 1, %v4933_v1 }
  0xad   :  { %v3481_v47 = vld [vmem:[%s7143_s3 + $0xe8] sm:$0xff] }
  0xae   :  { %3597 = vperm.xlu0 %4841, %v3532_v49   ;;  %v7285_v49 = vcombine.low %v7283_v33, %v7284_v48  ;;  %vm3513_vm8 = vcmp.gt.f32.partialorder %v3481_v47, 0.5  ;;  %v7308_v55 = vld [vmem:[#allocation40_spill] sm:$0xff]  ;;  %v7311_v33 = vcombine.low %v5576_v32, %v5638_v17  ;;  %v7313_v17 = vcombine.low %v5647_v44, %v5656_v7  ;;  %v7315_v7 = vld [vmem:[#allocation47_spill] sm:$0xff] }
  0xaf   :  { %v2619_v48 = vld [vmem:[#allocation2 + $0x8] sm:$0xf] }
  0xb0   :  { %3600 = vperm.xlu1 %4842, %v3533_v13   ;;  %v3544_v13 = vsel %vm3512_vm7, 1, %v4933_v1 }
  0xb1   :  { %4665 = vmatmul.mubr.msk.bf16.gmra.mxu0 %vm461_vm2, %v1733_v51  ;;  %v3474_v51 = vld [vmem:[%s7143_s3 + $0xb0] sm:$0xff] }
  0xb2   :  { %4668 = vmatprep.mubr.msk.bf16.mxu0 %vm461_vm2, %v1741_v11  ;;  %3603 = vperm.xlu0 %4841, %v3534_v27   ;;  %vm3506_vm13 = vcmp.gt.f32.partialorder %v3474_v51, 0.5  ;;  %v7280_v11 = vld [vmem:[#allocation25_spill] sm:$0xff]  ;;  %v3545_v27 = vsel %vm3513_vm8, 1, %v4933_v1 }
  0xb3   :  { %4625 = vmatmul.mubr.msk.bf16.gmra.mxu1 %vm461_vm2, %v7269_v52  ;;  %v3538_v63 = vsel %vm3506_vm13, 1, %v4933_v1  ;;  %v7281_v0 = vcombine.low %v7279_v21, %v7280_v11  ;;  %v3542_v52 = vsel %vm3510_vm5, 1, %v4933_v1 }
  0xb4   :  { %4628 = vmatprep.mubr.msk.bf16.mxu1 %vm461_vm2, %v7272_v40  ;;  %3606 = vperm.xlu1 %4842, %v3535_v54   ;;  %v3482_v40 = vld [vmem:[%s7143_s3 + $0xf0] sm:$0xff]  ;;  %v7295_v54 = vcombine.low %v5502_v29, %v5504_v24 }
  0xb5   :  { %vm3514_vm0 = vcmp.gt.f32.partialorder %v3482_v40, 0.5  ;;  %v7301_v29 = vld [vmem:[#allocation37_spill] sm:$0xff]  ;;  %v7314_v40 = vcombine.low %v5658_v3, %v5692_v39 }
  0xb6   :  { %3609 = vperm.xlu0 %4841, %v3536_v43   ;;  %v3546_v28 = vsel %vm3514_vm0, 1, %v4933_v1  ;;  %v7296_v43 = vld [vmem:[#allocation34_spill] sm:$0xff] }
  0xb7   :  { %v7298_v51 = vcombine.low %v7296_v43, %v7297_v56  ;;  %v4918_v56 = vld [vmem:[#allocation2 + $0x20] sm:$0xff]  }
  0xb8   :  { %3612 = vperm.xlu1 %4842, %v3537_v15  }
  0xb9   :  { %4669 = vmatmul.mubr.msk.bf16.gmra.mxu0 %vm461_vm2, %v1749_v23  ;;  %v4910_v23 = vld [vmem:[%s7140_s2 + $0xe8] sm:$0xff]  }
  0xba   :  { %4720 = vmatprep.mubr.msk.bf16.mxu0 %vm461_vm2, %v7275_v20  ;;  %3615 = vperm.xlu0 %4841, %v3538_v63   ;;  %v7290_v20 = vld [vmem:[#allocation31_spill] sm:$0xff] }
  0xbb   :  { %4629 = vmatmul.mubr.msk.bf16.gmra.mxu1 %vm461_vm2, %v4079_v12  ;;  %v7291_v62 = vcombine.low %v7289_v45, %v7290_v20 }
  0xbc   :  { %4680 = vmatprep.mubr.msk.bf16.mxu1 %vm461_vm2, %v5600_v22  ;;  %v3475_v22 = vld [vmem:[%s7143_s3 + $0xb8] sm:$0xff] }
  0xbd   :  { %vm3507_vm14 = vcmp.gt.f32.partialorder %v3475_v22, 0.5 }
  0xbe   :  { %3621 = vperm.xlu0 %4841, %v3540_v26  }
  0xc1   :  { %4721 = vmatmul.mubr.msk.bf16.vlgmr.msra.gmra.mxu0 %vm461_vm2, %v7278_v10  ;;  %v7304_v10 = vld [vmem:[#allocation39_spill] sm:$0xff] }
  0xc2   :  { %4793 = vmatpush3.bf16.msra.mxu0 %v5779_v41  ;;  %4724 = vmatprep.mubr.msk.bf16.mxu0 %vm461_vm2, %v7281_v0  ;;  %v3539_v41 = vsel %vm3507_vm14, 1, %v4933_v1  ;;  %v7305_v21 = vcombine.low %v7303_v8, %v7304_v10 }
  0xc3   :  { %4794 = vmatprep.subr.bf16.mxu0 %v4909_v42  ;;  %3618 = vperm.xlu1 %4842, %v3539_v41  }
  0xc4   :  { %4681 = vmatmul.mubr.msk.bf16.vlgmr.msra.gmra.mxu1 %vm461_vm2, %v7282_v5  ;;  %3627 = vperm.xlu0 %4841, %v3542_v52   ;;  %v7310_v5 = vcombine.low %v7308_v55, %v7309_v36  ;;  %v4915_v52 = vld [vmem:[#allocation2 + $0x10] sm:$0xff]  }
  0xc5   :  { %4753 = vmatpush3.bf16.msra.mxu1 %v5803_v61  ;;  %4684 = vmatprep.mubr.msk.bf16.mxu1 %vm461_vm2, %v5594_v35  ;;  %v7287_v61 = vld [vmem:[#allocation29_spill] sm:$0xff]  ;;  %v3479_v35 = vld [vmem:[%s7143_s3 + $0xd8] sm:$0xff]  ;;  %v2756_v8 = vshrl.u32 %v4915_v52, 16 }
  0xc6   :  { %4795 = vmatpush3.bf16.msra.mxu0 %v4909_v42  ;;  %4754 = vmatprep.subr.bf16.mxu1 %v4908_v4  ;;  %v7288_v53 = vcombine.low %v7286_v16, %v7287_v61  ;;  %vm3511_vm6 = vcmp.gt.f32.partialorder %v3479_v35, 0.5  ;;  %v7299_v42 = vld [vmem:[#allocation43_spill] sm:$0xff]  ;;  %v7312_v35 = vld [vmem:[#allocation46_spill] sm:$0xff] }
  0xc7   :  { %4796 = vmatprep.subr.bf16.mxu0 %v4911_v38  ;;  %3624 = vperm.xlu1 %4842, %v3541_v19   ;;  %v3543_v50 = vsel %vm3511_vm6, 1, %v4933_v1  ;;  %v3141_v19 = vld [vmem:[#allocation2 + $0x8] sm:$0xe] }
  0xc8   :  { %3633 = vperm.xlu0 %4841, %v3544_v13  }
  0xc9   :  { %4725 = vmatmul.mubr.msk.bf16.gmra.mxu0 %vm461_vm2, %v7285_v49  ;;  %4755 = vmatpush3.bf16.msra.mxu1 %v4908_v4  ;;  %v7307_v4 = vld [vmem:[#allocation45_spill] sm:$0xff]  ;;  %v2620_v49 = vld [vmem:[#allocation2 + $0xc] sm:$0xf] }
  0xca   :  { %4728 = vmatprep.mubr.msk.bf16.mxu0 %vm461_vm2, %v7288_v53  ;;  %4797 = vmatpush3.bf16.msra.mxu0 %v4911_v38  ;;  %v4226_v61 = vcombine.low %v2619_v48, %v2620_v49  ;;  %v4271_v58 = vcombine.low %v3141_v19, %v2620_v49  ;;  %v4919_v48 = vld [vmem:[#allocation2 + $0x28] sm:$0xff]  }
  0xcb   :  { %4798 = vmatprep.subr.bf16.mxu0 %v4913_v25  ;;  %4756 = vmatprep.subr.bf16.mxu1 %v4910_v23 }
  0xcc   :  { %4685 = vmatmul.mubr.msk.bf16.gmra.mxu1 %vm461_vm2, %v5597_v60  ;;  %v7292_v60 = vld [vmem:[#allocation32_spill] sm:$0xff]  ;;  %3630 = vperm.xlu1 %4842, %v3543_v50   ;;  %v2326_v50 = vld [vmem:[#allocation2 + $0x84] sm:$0xf]  ;;  %v2745_v20 = vshrl.u32 %v4226_v61, 16 }
  0xcd   :  { %4688 = vmatprep.mubr.msk.bf16.mxu1 %vm461_vm2, %v5603_v34  ;;  %4757 = vmatpush3.bf16.msra.mxu1 %v4910_v23  ;;  %v7294_v37 = vcombine.low %v7292_v60, %v7293_v57  ;;  %v3483_v34 = vld [vmem:[%s7143_s3 + $0xf8] sm:$0xff]  ;;  %v4197_v44 = vcombine.low %v7315_v7, %v2326_v50  ;;  %v2752_v60 = vshll.u32 %v4915_v52, 16  ;;  %v7316_v57 = vld [vmem:[#allocation48_spill] sm:$0xff] }
  0xce   :  { %4799 = vmatpush3.bf16.msra.mxu0 %v4913_v25  ;;  %4758 = vmatprep.subr.bf16.mxu1 %v4912_v6  ;;  %vm3515_vm9 = vcmp.gt.f32.partialorder %v3483_v34, 0.5  ;;  %v4917_v34 = vld [vmem:[#allocation2 + $0x18] sm:$0xff]  }
  0xcf   :  { %v3547_v12 = vsel %vm3515_vm9, 1, %v4933_v1  ;;  %3639 = vperm.xlu0 %4841, %v3546_v28   ;;  %v2754_v43 = vrot.slane %v2752_v60, 1 }
  0xd0   :  { %3636 = vperm.xlu1 %4842, %v3545_v27   ;;  %v3155_v27 = vrot.slane %v4915_v52, 1 }
  0xd1   :  { %4729 = vmatmul.mubr.msk.bf16.gmra.mxu0 %vm461_vm2, %v7291_v62  ;;  %4759 = vmatpush3.bf16.msra.mxu1 %v4912_v6  ;;  %v2747_v6 = vshll.u32 %v4226_v61, 16  ;;  %v2758_v49 = vor.u32 %v2756_v8, %v2754_v43 }
  0xd2   :  { %4732 = vmatprep.mubr.msk.bf16.mxu0 %vm461_vm2, %v7294_v37 }
  0xd3   :  { %v2749_v62 = vrot.slane %v2747_v6, 1 }
  0xd4   :  { %4689 = vmatmul.mubr.msk.bf16.gmra.mxu1 %vm461_vm2, %v5606_v30  ;;  %3642 = vperm.xlu1 %4842, %v3547_v12  }
  0xd5   :  { %4692 = vmatprep.mubr.msk.bf16.mxu1 %vm461_vm2, %v5609_v14  ;;  %v7300_v14 = vld [vmem:[#allocation36_spill] sm:$0xff] }
  0xd6   :  { %v7302_v24 = vcombine.low %v7300_v14, %v7301_v29  ;;  %v2760_v29 = vshll.u32 %v4917_v34, 16 }
  0xd9   :  { %4733 = vmatmul.mubr.msk.bf16.gmra.mxu0 %vm461_vm2, %v7295_v54  ;;  %v2750_v54 = vor.u32 %v2749_v62, %v2745_v20  ;;  %v2780_v62 = vshrl.u32 %v4919_v48, 16 }
  0xda   :  { %4736 = vmatprep.mubr.msk.bf16.mxu0 %vm461_vm2, %v7298_v51  ;;  %v3157_v51 = vrot.slane %v4917_v34, 1 }
  0xdb   :  { %v6084_v1 = vpop.f32.mrf.mxu0 }
  0xdc   :  { %4693 = vmatmul.mubr.msk.bf16.gmra.mxu1 %vm461_vm2, %v7299_v42 }
  0xdd   :  { %v6088_v30 = vpop.f32.mrf.mxu1  ;;  %v6090_v15 = vpop.f32.mrf.mxu0  ;;  %4696 = vmatprep.mubr.msk.bf16.mxu1 %vm461_vm2, %v5632_v31 }
  0xdf   :  { %v6098_v63 = vpop.f32.mrf.mxu1  ;;  %v6100_v59 = vpop.f32.mrf.mxu0 }
  0xe1   :  { %4737 = vmatmul.mubr.msk.bf16.gmra.mxu0 %vm461_vm2, %v7302_v24  ;;  %v6106_v11 = vpop.f32.mrf.mxu1  ;;  %v6108_v0 = vpop.f32.mrf.mxu0  ;;  %v3159_v24 = vrot.slane %v4918_v56, 1 }
  0xe2   :  { %4740 = vmatprep.mubr.msk.bf16.mxu0 %vm461_vm2, %v7305_v21  ;;  %v2764_v21 = vshrl.u32 %v4917_v34, 16 }
  0xe3   :  { %v6110_v22 = vpop.f32.mrf.mxu1  ;;  %v6112_v31 = vpop.f32.mrf.mxu0 }
  0xe4   :  { %4697 = vmatmul.mubr.msk.bf16.gmra.mxu1 %vm461_vm2, %v7306_v2  ;;  %v2768_v2 = vshll.u32 %v4918_v56, 16 }
  0xe5   :  { %v6118_v41 = vpop.f32.mrf.mxu0  ;;  %4700 = vmatprep.mubr.msk.bf16.mxu1 %vm461_vm2, %v7307_v4  ;;  %v3158_v4 = vsel %vm901_vm3, %v3155_v27, %v3157_v51 }
  0xe6   :  { %v6116_v38 = vpop.f32.mrf.mxu1 }
  0xe7   :  { %v6128_v26 = vpop.f32.mrf.mxu0 }
  0xe8   :  { %v6126_v25 = vpop.f32.mrf.mxu1 }
  0xe9   :  { %4741 = vmatmul.mubr.msk.bf16.gmra.mxu0 %vm461_vm2, %v7310_v5  ;;  %v6136_v16 = vpop.f32.mrf.mxu0  ;;  %v2762_v5 = vrot.slane %v2760_v29, 1 }
  0xea   :  { %4744 = vmatprep.mubr.msk.bf16.mxu0 %vm461_vm2, %v7311_v33  ;;  %v6134_v23 = vpop.f32.mrf.mxu1  ;;  %v3160_v33 = vsel %vm901_vm3, %v3157_v51, %v3159_v24  ;;  %v4921_v51 = vld [vmem:[#allocation2 + $0x38] sm:$0xff]  }
  0xec   :  { %v6138_v53 = vpop.f32.mrf.mxu1  ;;  %4701 = vmatmul.mubr.msk.bf16.gmra.mxu1 %vm461_vm2, %v7312_v35  ;;  %v2766_v35 = vor.u32 %v2764_v21, %v2762_v5 }
  0xed   :  { %4704 = vmatprep.mubr.msk.bf16.mxu1 %vm461_vm2, %v5687_v9  ;;  %v3154_v9 = vrot.slane %v4271_v58, 1  ;;  %v2770_v58 = vrot.slane %v2768_v2, 1 }
  0xef   :  { %v3156_v37 = vsel %vm901_vm3, %v3154_v9, %v3155_v27  ;;  %v2763_v9 = vsel %vm304_vm1, %v2758_v49, %v2762_v5  ;;  %v2772_v27 = vshrl.u32 %v4918_v56, 16  ;;  %v2771_v20 = vsel %vm304_vm1, %v2766_v35, %v2770_v58 }
  0xf0   :  { %v2792_v49 = vshll.u32 %v4921_v51, 16 }
  0xf1   :  { %v6144_v32 = vpop.f32.mrf.mxu0  ;;  %4745 = vmatmul.mubr.msk.bf16.gmra.mxu0 %vm461_vm2, %v7313_v17  ;;  %v4920_v17 = vld [vmem:[#allocation2 + $0x30] sm:$0xff]   ;;  %v2774_v56 = vor.u32 %v2772_v27, %v2770_v58 }
  0xf2   :  { %v6150_v47 = vpop.f32.mrf.mxu1  ;;  %4748 = vmatprep.mubr.msk.bf16.mxu0 %vm461_vm2, %v7314_v40  ;;  %v2776_v40 = vshll.u32 %v4919_v48, 16  ;;  %v3163_v50 = vrot.slane %v4920_v17, 1  ;;  %v2784_v60 = vshll.u32 %v4920_v17, 16 }
  0xf3   :  { %v6156_v13 = vpop.f32.mrf.mxu0 }
  0xf4   :  { %v6158_v28 = vpop.f32.mrf.mxu1  ;;  %4705 = vmatmul.mubr.msk.bf16.gmra.mxu1 %vm461_vm2, %v7316_v57  ;;  %v2786_v2 = vrot.slane %v2784_v60, 1 }
  0xf5   :  { %v6160_v45 = vpop.f32.mrf.mxu0  ;;  %4708 = vmatprep.mubr.msk.bf16.mxu1 %vm461_vm2, %v5723_v18  ;;  %v2755_v18 = vsel %vm304_vm1, %v2750_v54, %v2754_v43  ;;  %v2778_v54 = vrot.slane %v2776_v40, 1 }
  0xf6   :  { %v6165_v39 = vpop.f32.mrf.mxu1 }
  0xf7   :  { %v6167_v3 = vpop.f32.mrf.mxu0  ;;  %v2782_v21 = vor.u32 %v2780_v62, %v2778_v54  ;;  %v2779_v40 = vsel %vm304_vm1, %v2774_v56, %v2778_v54  ;;  %v4923_v54 = vld [vmem:[#allocation2 + $0x48] sm:$0xff]  }
  0xf8   :  { %v6176_v42 = vpop.f32.mrf.mxu1 }
  0xf9   :  { %v6172_v12 = vpop.f32.mrf.mxu0  ;;  %4749 = vmatmul.mubr.msk.bf16.gmra.mxu0 %vm461_vm2, %v4197_v44 }
  0xfa   :  { %4800 = vmatprep.mubr.msk.bf16.mxu0 %vm461_vm2, %v3156_v37  ;;  %v6184_v55 = vpop.f32.mrf.mxu1 }
  0xfb   :  { %v6178_v14 = vpop.f32.mrf.mxu0 }
  0xfc   :  { %4709 = vmatmul.mubr.msk.bf16.gmra.mxu1 %vm461_vm2, %v5730_v46  ;;  %v6192_v19 = vpop.f32.mrf.mxu1  ;;  %v3161_v46 = vrot.slane %v4919_v48, 1 }
  0xfd   :  { %v6180_v10 = vpop.f32.mrf.mxu0  ;;  %4760 = vmatprep.mubr.msk.bf16.mxu1 %vm461_vm2, %v2755_v18 }
  0xfe   :  { %v6196_v52 = vpop.f32.mrf.mxu1  ;;  %v3162_v57 = vsel %vm901_vm3, %v3159_v24, %v3161_v46  ;;  %v3164_v43 = vsel %vm901_vm3, %v3161_v46, %v3163_v50  ;;  %v6208_v24 = vld [vmem:[#allocation2 + $0x40] sm:$0xff]  }
  0xff   :  { %v6188_v36 = vpop.f32.mrf.mxu0  ;;  %v3167_v35 = vrot.slane %v6208_v24, 1  ;;  %v2800_v62 = vshll.u32 %v6208_v24, 16 }
 0x100   :  { %v6199_v7 = vpop.f32.mrf.mxu1 }
 0x101   :  { %v4562_v61 = vpop.f32.mrf.mxu0  ;;  %4801 = vmatmul.mubr.msk.bf16.vlgmr.msra.gmra.mxu0 %vm461_vm2, %v3158_v4 }
 0x102   :  { %4804 = vmatprep.mubr.msk.bf16.mxu0 %vm461_vm2, %v3160_v33  ;;  %v3165_v33 = vrot.slane %v4921_v51, 1 }
 0x103   :  { %v1041_v6 = vpop.f32.mrf.mxu0  ;;  %v4522_v37 = vpop.f32.mrf.mxu1 }
 0x104   :  { %4761 = vmatmul.mubr.msk.bf16.vlgmr.msra.gmra.mxu1 %vm461_vm2, %v2763_v9  ;;  %v770_v29 = vadd.f32 %v4522_v37, %v6084_v1  ;;  %v2788_v9 = vshrl.u32 %v4920_v17, 16  ;;  %v3166_v37 = vsel %vm901_vm3, %v3163_v50, %v3165_v33  ;;  %v3168_v17 = vsel %vm901_vm3, %v3165_v33, %v3167_v35 }
 0x105   :  { %v4563_v44 = vpop.f32.mrf.mxu0  ;;  %4764 = vmatprep.mubr.msk.bf16.mxu1 %vm461_vm2, %v2771_v20  ;;  %v761_v8 = vpop.f32.mrf.mxu1  ;;  %v2787_v20 = vsel %vm304_vm1, %v2782_v21, %v2786_v2  ;;  %v2802_v50 = vrot.slane %v2800_v62, 1  ;;  %v6232_v21 = vld [vmem:[#allocation2 + $0x50] sm:$0xff]  }
 0x106   :  { %v6210_v4 = vadd.f32 %v4562_v61, %v770_v29  ;;  %v762_v5 = vadd.f32 %v761_v8, %v6090_v15  ;;  %v2796_v15 = vshrl.u32 %v4921_v51, 16  ;;  %v2790_v56 = vor.u32 %v2788_v9, %v2786_v2 }
 0x107   :  { %v1044_v34 = vpop.f32.mrf.mxu0  ;;  %v4523_v48 = vpop.f32.mrf.mxu1  ;;  %v2808_v2 = vshll.u32 %v4923_v54, 16  ;;  %v2816_v62 = vshll.u32 %v6232_v21, 16 }
 0x108   :  { %v6215_v58 = vadd.f32 %v1041_v6, %v762_v5  ;;  %v773_v46 = vadd.f32 %v4523_v48, %v6100_v59 }
 0x109   :  { %v4566_v18 = vpop.f32.mrf.mxu0  ;;  %4805 = vmatmul.mubr.msk.bf16.gmra.mxu0 %vm461_vm2, %v3162_v57  ;;  %v764_v27 = vpop.f32.mrf.mxu1 }
 0x10a   :  { %4808 = vmatprep.mubr.msk.bf16.mxu0 %vm461_vm2, %v3164_v43  ;;  %v6221_v60 = vadd.f32 %v4563_v44, %v773_v46  ;;  %v765_v57 = vadd.f32 %v764_v27, %v6108_v0  ;;  %v2794_v43 = vrot.slane %v2792_v49, 1  ;;  %v3171_v49 = vrot.slane %v6232_v21, 1 }
 0x10b   :  { %v1057_v1 = vpop.f32.mrf.mxu0  ;;  %v4526_v6 = vpop.f32.mrf.mxu1  ;;  %v2804_v27 = vshrl.u32 %v6208_v24, 16 }
 0x10c   :  { %4765 = vmatmul.mubr.msk.bf16.gmra.mxu1 %vm461_vm2, %v2779_v40  ;;  %v6227_v29 = vadd.f32 %v1044_v34, %v765_v57  ;;  %v786_v51 = vadd.f32 %v4526_v6, %v6112_v31  ;;  %v2798_v0 = vor.u32 %v2796_v15, %v2794_v43  ;;  %v3169_v34 = vrot.slane %v4923_v54, 1 }
 0x10d   :  { %v4567_v61 = vpop.f32.mrf.mxu0  ;;  %4768 = vmatprep.mubr.msk.bf16.mxu1 %vm461_vm2, %v2787_v20  ;;  %v777_v44 = vpop.f32.mrf.mxu1  ;;  %v2795_v9 = vsel %vm304_vm1, %v2790_v56, %v2794_v43  ;;  %v2812_v15 = vshrl.u32 %v4923_v54, 16  ;;  %v2810_v43 = vrot.slane %v2808_v2, 1  ;;  %v2806_v56 = vor.u32 %v2804_v27, %v2802_v50 }
 0x10e   :  { %v6234_v5 = vadd.f32 %v4566_v18, %v786_v51  ;;  %v778_v33 = vadd.f32 %v777_v44, %v6118_v41  ;;  %v2803_v41 = vsel %vm304_vm1, %v2798_v0, %v2802_v50  ;;  %v3172_v24 = vsel %vm901_vm3, %v3169_v34, %v3171_v49  ;;  %v6257_v0 = vld [vmem:[#allocation2 + $0x60] sm:$0xff]  }
 0x10f   :  { %v1060_v59 = vpop.f32.mrf.mxu0  ;;  %v4527_v48 = vpop.f32.mrf.mxu1  ;;  %v3175_v2 = vrot.slane %v6257_v0, 1  ;;  %v2811_v27 = vsel %vm304_vm1, %v2806_v56, %v2810_v43 }
 0x110   :  { %v6239_v46 = vadd.f32 %v1057_v1, %v778_v33  ;;  %v789_v40 = vadd.f32 %v4527_v48, %v6128_v26  ;;  %v3170_v1 = vsel %vm901_vm3, %v3167_v35, %v3169_v34  ;;  %v2818_v35 = vrot.slane %v2816_v62, 1 }
 0x111   :  { %v4570_v8 = vpop.f32.mrf.mxu0  ;;  %4809 = vmatmul.mubr.msk.bf16.gmra.mxu0 %vm461_vm2, %v3166_v37  ;;  %v780_v18 = vpop.f32.mrf.mxu1  ;;  %v2832_v62 = vshll.u32 %v6257_v0, 16 }
 0x112   :  { %4812 = vmatprep.mubr.msk.bf16.mxu0 %vm461_vm2, %v3168_v17  ;;  %v6246_v57 = vadd.f32 %v4567_v61, %v789_v40  ;;  %v781_v37 = vadd.f32 %v780_v18, %v6136_v16  ;;  %v4925_v17 = vld [vmem:[#allocation2 + $0x58] sm:$0xff]   ;;  %v2814_v16 = vor.u32 %v2812_v15, %v2810_v43  ;;  %v2820_v18 = vshrl.u32 %v6232_v21, 16 }
 0x113   :  { %v1073_v31 = vpop.f32.mrf.mxu0  ;;  %v4530_v6 = vpop.f32.mrf.mxu1  ;;  %v2824_v50 = vshll.u32 %v4925_v17, 16  ;;  %v2828_v15 = vshrl.u32 %v4925_v17, 16 }
 0x114   :  { %4769 = vmatmul.mubr.msk.bf16.gmra.mxu1 %vm461_vm2, %v2795_v9  ;;  %v6252_v51 = vadd.f32 %v1060_v59, %v781_v37  ;;  %v802_v54 = vadd.f32 %v4530_v6, %v6144_v32  ;;  %v3173_v59 = vrot.slane %v4925_v17, 1  ;;  %v2822_v56 = vor.u32 %v2820_v18, %v2818_v35 }
 0x115   :  { %v4571_v20 = vpop.f32.mrf.mxu0  ;;  %4772 = vmatprep.mubr.msk.bf16.mxu1 %vm461_vm2, %v2803_v41  ;;  %v793_v61 = vpop.f32.mrf.mxu1  ;;  %v2826_v43 = vrot.slane %v2824_v50, 1 }
 0x116   :  { %v6259_v33 = vadd.f32 %v4570_v8, %v802_v54  ;;  %v794_v34 = vadd.f32 %v793_v61, %v6156_v13  ;;  %v2819_v13 = vsel %vm304_vm1, %v2814_v16, %v2818_v35  ;;  %v3176_v21 = vsel %vm901_vm3, %v3173_v59, %v3175_v2  ;;  %v4928_v16 = vld [vmem:[#allocation2 + $0x70] sm:$0xff]  }
 0x117   :  { %v1076_v26 = vpop.f32.mrf.mxu0  ;;  %v4531_v48 = vpop.f32.mrf.mxu1  ;;  %v3179_v35 = vrot.slane %v4928_v16, 1  ;;  %v2827_v18 = vsel %vm304_vm1, %v2822_v56, %v2826_v43 }
 0x118   :  { %v6264_v40 = vadd.f32 %v1073_v31, %v794_v34  ;;  %v805_v9 = vadd.f32 %v4531_v48, %v6160_v45  ;;  %v3174_v31 = vsel %vm901_vm3, %v3171_v49, %v3173_v59  ;;  %v2834_v49 = vrot.slane %v2832_v62, 1 }
 0x119   :  { %v4574_v44 = vpop.f32.mrf.mxu0  ;;  %4813 = vmatmul.mubr.msk.bf16.gmra.mxu0 %vm461_vm2, %v3170_v1  ;;  %v796_v8 = vpop.f32.mrf.mxu1  ;;  %v2848_v62 = vshll.u32 %v4928_v16, 16 }
 0x11a   :  { %4816 = vmatprep.mubr.msk.bf16.mxu0 %vm461_vm2, %v3172_v24  ;;  %v6271_v37 = vadd.f32 %v4571_v20, %v805_v9  ;;  %v797_v1 = vadd.f32 %v796_v8, %v6167_v3  ;;  %v4927_v24 = vld [vmem:[#allocation2 + $0x68] sm:$0xff]   ;;  %v2830_v3 = vor.u32 %v2828_v15, %v2826_v43  ;;  %v2836_v8 = vshrl.u32 %v6257_v0, 16  ;;  %v4929_v0 = vld [vmem:[#allocation2 + $0x78] sm:$0xff]  }
 0x11b   :  { %v1089_v32 = vpop.f32.mrf.mxu0  ;;  %v4534_v6 = vpop.f32.mrf.mxu1 }
 0x11c   :  { %4773 = vmatmul.mubr.msk.bf16.gmra.mxu1 %vm461_vm2, %v2811_v27  ;;  %v6277_v54 = vadd.f32 %v1076_v26, %v797_v1  ;;  %v818_v17 = vadd.f32 %v4534_v6, %v6172_v12  ;;  %v3177_v26 = vrot.slane %v4927_v24, 1  ;;  %v2840_v12 = vshll.u32 %v4927_v24, 16 }
 0x11d   :  { %v4575_v41 = vpop.f32.mrf.mxu0  ;;  %4776 = vmatprep.mubr.msk.bf16.mxu1 %vm461_vm2, %v2819_v13  ;;  %v809_v20 = vpop.f32.mrf.mxu1  ;;  %v2835_v15 = vsel %vm304_vm1, %v2830_v3, %v2834_v49  ;;  %v4930_v3 = vld [vmem:[#allocation2 + $0x80] sm:$0xff]  }
 0x11e   :  { %v6282_v34 = vadd.f32 %v4574_v44, %v818_v17  ;;  %v810_v48 = vadd.f32 %v809_v20, %v6178_v14  ;;  %v2844_v14 = vshrl.u32 %v4927_v24, 16  ;;  %v3178_v6 = vsel %vm901_vm3, %v3175_v2, %v3177_v26 }
 0x11f   :  { %v1092_v45 = vpop.f32.mrf.mxu0  ;;  %v4535_v59 = vpop.f32.mrf.mxu1  ;;  %v3180_v43 = vsel %vm901_vm3, %v3177_v26, %v3179_v35  ;;  %v2838_v24 = vor.u32 %v2836_v8, %v2834_v49  ;;  %v2850_v2 = vrot.slane %v2848_v62, 1  ;;  %v2856_v49 = vshll.u32 %v4929_v0, 16 }
 0x120   :  { %v6286_v9 = vadd.f32 %v1089_v32, %v810_v48  ;;  %v821_v27 = vadd.f32 %v4535_v59, %v6180_v10  ;;  %v2860_v62 = vshrl.u32 %v4929_v0, 16 }
 0x121   :  { %v4578_v61 = vpop.f32.mrf.mxu0  ;;  %4817 = vmatmul.mubr.msk.bf16.gmra.mxu0 %vm461_vm2, %v3174_v31  ;;  %v812_v13 = vpop.f32.mrf.mxu1 }
 0x122   :  { %4820 = vmatprep.mubr.msk.bf16.mxu0 %vm461_vm2, %v3176_v21  ;;  %v6292_v1 = vadd.f32 %v4575_v41, %v821_v27  ;;  %v813_v31 = vadd.f32 %v812_v13, %v6188_v36  ;;  %v2842_v21 = vrot.slane %v2840_v12, 1  ;;  %v3183_v27 = vrot.slane %v4930_v3, 1 }
 0x123   :  { %v1105_v50 = vpop.f32.mrf.mxu0  ;;  %v4538_v32 = vpop.f32.mrf.mxu1 }
 0x124   :  { %4777 = vmatmul.mubr.msk.bf16.gmra.mxu1 %vm461_vm2, %v2827_v18  ;;  %v6298_v17 = vadd.f32 %v1092_v45, %v813_v31  ;;  %v834_v56 = vadd.f32 %v4538_v32, %v6088_v30  ;;  %v2846_v36 = vor.u32 %v2844_v14, %v2842_v21  ;;  %v3181_v45 = vrot.slane %v4929_v0, 1 }
 0x125   :  { %v4579_v44 = vpop.f32.mrf.mxu0  ;;  %4780 = vmatprep.mubr.msk.bf16.mxu1 %vm461_vm2, %v2835_v15  ;;  %v825_v41 = vpop.f32.mrf.mxu1  ;;  %v2852_v30 = vshrl.u32 %v4928_v16, 16  ;;  %v2843_v13 = vsel %vm304_vm1, %v2838_v24, %v2842_v21 }
 0x126   :  { %v6303_v48 = vadd.f32 %v4578_v61, %v834_v56  ;;  %v826_v59 = vadd.f32 %v825_v41, %v6098_v63  ;;  %v2851_v61 = vsel %vm304_vm1, %v2846_v36, %v2850_v2  ;;  %v2864_v63 = vshll.u32 %v4930_v3, 16 }
 0x127   :  { %v1108_v10 = vpop.f32.mrf.mxu0  ;;  %v4539_v26 = vpop.f32.mrf.mxu1  ;;  %v3182_v16 = vsel %vm901_vm3, %v3179_v35, %v3181_v45  ;;  %v3184_v21 = vsel %vm901_vm3, %v3181_v45, %v3183_v27 }
 0x128   :  { %v6307_v18 = vadd.f32 %v1105_v50, %v826_v59  ;;  %v837_v8 = vadd.f32 %v4539_v26, %v6106_v11  ;;  %v2858_v11 = vrot.slane %v2856_v49, 1  ;;  %v2866_v35 = vrot.slane %v2864_v63, 1 }
 0x129   :  { %v4582_v20 = vpop.f32.mrf.mxu0  ;;  %4821 = vmatmul.mubr.msk.bf16.gmra.mxu0 %vm461_vm2, %v3178_v6  ;;  %v828_v15 = vpop.f32.mrf.mxu1  ;;  %v2868_v49 = vshrl.u32 %v4930_v3, 16 }
 0x12a   :  { %4824 = vmatprep.mubr.msk.bf16.mxu0 %vm461_vm2, %v3180_v43  ;;  %v6312_v31 = vadd.f32 %v4579_v44, %v837_v8  ;;  %v829_v6 = vadd.f32 %v828_v15, %v6110_v22  ;;  %v2854_v43 = vor.u32 %v2852_v30, %v2850_v2  ;;  %v4931_v44 = vld [vmem:[#allocation2 + $0x88] ss:$0 sps:$4 sm:$0x11]   ;;  %v2862_v22 = vor.u32 %v2860_v62, %v2858_v11 }
 0x12b   :  { %v1121_v12 = vpop.f32.mrf.mxu0  ;;  %v4542_v32 = vpop.f32.mrf.mxu1  ;;  %v3185_v59 = vrot.slane %v4931_v44, 1  ;;  %v2872_v8 = vshll.u32 %v4931_v44, 16  ;;  %v2870_v3 = vor.u32 %v2868_v49, %v2866_v35 }
 0x12c   :  { %4781 = vmatmul.mubr.msk.bf16.gmra.mxu1 %vm461_vm2, %v2843_v13  ;;  %v6318_v56 = vadd.f32 %v1108_v10, %v829_v6  ;;  %v850_v24 = vadd.f32 %v4542_v32, %v6116_v38  ;;  %v2859_v45 = vsel %vm304_vm1, %v2854_v43, %v2858_v11 }
 0x12d   :  { %v4583_v14 = vpop.f32.mrf.mxu0  ;;  %4784 = vmatprep.mubr.msk.bf16.mxu1 %vm461_vm2, %v2851_v61  ;;  %v841_v0 = vpop.f32.mrf.mxu1  ;;  %v3186_v62 = vsel %vm901_vm3, %v3183_v27, %v3185_v59 }
 0x12e   :  { %v6323_v36 = vadd.f32 %v4582_v20, %v850_v24  ;;  %v842_v2 = vadd.f32 %v841_v0, %v6126_v25  ;;  %v2867_v20 = vsel %vm304_vm1, %v2862_v22, %v2866_v35 }
 0x12f   :  { %v1124_v50 = vpop.f32.mrf.mxu0  ;;  %v4543_v10 = vpop.f32.mrf.mxu1 }
 0x130   :  { %v6328_v26 = vadd.f32 %v1121_v12, %v842_v2  ;;  %v853_v30 = vadd.f32 %v4543_v10, %v6134_v23 }
 0x131   :  { %v4586_v41 = vpop.f32.mrf.mxu0  ;;  %4825 = vmatmul.mubr.msk.bf16.gmra.mxu0 %vm461_vm2, %v3182_v16  ;;  %v844_v13 = vpop.f32.mrf.mxu1  ;;  %v2874_v16 = vrot.slane %v2872_v8, 1 }
 0x132   :  { %4828 = vmatprep.mubr.msk.bf16.mxu0 %vm461_vm2, %v3184_v21  ;;  %v6332_v61 = vadd.f32 %v4583_v14, %v853_v30  ;;  %v845_v25 = vadd.f32 %v844_v13, %v6138_v53 }
 0x133   :  { %v1137_v38 = vpop.f32.mrf.mxu0  ;;  %v4546_v63 = vpop.f32.mrf.mxu1 }
 0x134   :  { %4785 = vmatmul.mubr.msk.bf16.gmra.mxu1 %vm461_vm2, %v2859_v45  ;;  %v6337_v12 = vadd.f32 %v1124_v50, %v845_v25  ;;  %v866_v23 = vadd.f32 %v4546_v63, %v6150_v47  ;;  %v2875_v47 = vsel %vm304_vm1, %v2870_v3, %v2874_v16 }
 0x135   :  { %v4587_v15 = vpop.f32.mrf.mxu0  ;;  %4788 = vmatprep.mubr.msk.bf16.mxu1 %vm461_vm2, %v2867_v20  ;;  %v857_v32 = vpop.f32.mrf.mxu1 }
 0x136   :  { %v6342_v14 = vadd.f32 %v4586_v41, %v866_v23  ;;  %v858_v53 = vadd.f32 %v857_v32, %v6158_v28 }
 0x137   :  { %v1140_v6 = vpop.f32.mrf.mxu0  ;;  %v4547_v27 = vpop.f32.mrf.mxu1 }
 0x138   :  { %v6345_v21 = vadd.f32 %v1137_v38, %v858_v53  ;;  %v869_v50 = vadd.f32 %v4547_v27, %v6165_v39 }
 0x139   :  { %v4590_v43 = vpop.f32.mrf.mxu0  ;;  %4829 = vmatmul.mubr.msk.bf16.gmra.mxu0 %vm461_vm2, %v3186_v62  ;;  %v860_v24 = vpop.f32.mrf.mxu1 }
 0x13a   :  { %v6349_v0 = vadd.f32 %v4587_v15, %v869_v50  ;;  %v861_v22 = vadd.f32 %v860_v24, %v6176_v42 }
 0x13b   :  { %v1153_v11 = vpop.f32.mrf.mxu0  ;;  %v4550_v35 = vpop.f32.mrf.mxu1 }
 0x13c   :  { %4789 = vmatmul.mubr.msk.bf16.gmra.mxu1 %vm461_vm2, %v2875_v47  ;;  %v6353_v2 = vadd.f32 %v1140_v6, %v861_v22  ;;  %v882_v28 = vadd.f32 %v4550_v35, %v6184_v55  ;;  %vm3708_vm2 = vcmask 261120  }
 0x13d   :  { %v4591_v44 = vpop.f32.mrf.mxu0  ;;  %v873_v59 = vpop.f32.mrf.mxu1 }
 0x13e   :  { %v6356_v45 = vadd.f32 %v4590_v43, %v882_v28  ;;  %v874_v39 = vadd.f32 %v873_v59, %v6192_v19 }
 0x13f   :  { %v1156_v41 = vpop.f32.mrf.mxu0  ;;  %v4551_v38 = vpop.f32.mrf.mxu1 }
 0x140   :  { %v6359_v49 = vadd.f32 %v1153_v11, %v874_v39  ;;  %v885_v42 = vadd.f32 %v4551_v38, %v6196_v52 }
 0x141   :  { %v4642_v10 = vpop.f32.mrf.mxu0  ;;  %v876_v8 = vpop.f32.mrf.mxu1 }
 0x142   :  { %v6362_v15 = vadd.f32 %v4591_v44, %v885_v42  ;;  %v877_v20 = vadd.f32 %v876_v8, %v6199_v7 }
 0x143   :  { %v1856_v30 = vpop.f32.mrf.mxu0  ;;  %v4602_v25 = vpop.f32.mrf.mxu1 }
 0x144   :  { %v6365_v62 = vadd.f32 %v1156_v41, %v877_v20  ;;  %v1463_v63 = vadd.f32 %v4602_v25, %v6210_v4 }
 0x145   :  { %v4643_v13 = vpop.f32.mrf.mxu0  ;;  %v1334_v6 = vpop.f32.mrf.mxu1 }
 0x146   :  { %v6368_v23 = vadd.f32 %v4642_v10, %v1463_v63  ;;  %v1461_v3 = vadd.f32 %v1334_v6, %v6215_v58 }
 0x147   :  { %v1859_v55 = vpop.f32.mrf.mxu0  ;;  %v4603_v16 = vpop.f32.mrf.mxu1 }
 0x148   :  { %v6371_v32 = vadd.f32 %v1856_v30, %v1461_v3  ;;  %v1464_v43 = vadd.f32 %v4603_v16, %v6221_v60 }
 0x149   :  { %v4646_v19 = vpop.f32.mrf.mxu0  ;;  %v1337_v53 = vpop.f32.mrf.mxu1 }
 0x14a   :  { %v6374_v27 = vadd.f32 %v4643_v13, %v1464_v43  ;;  %v1462_v11 = vadd.f32 %v1337_v53, %v6227_v29 }
 0x14b   :  { %v1872_v52 = vpop.f32.mrf.mxu0  ;;  %v4606_v50 = vpop.f32.mrf.mxu1 }
 0x14c   :  { %v6377_v47 = vadd.f32 %v1859_v55, %v1462_v11  ;;  %v1467_v24 = vadd.f32 %v4606_v50, %v6234_v5 }
 0x14d   :  { %v4647_v7 = vpop.f32.mrf.mxu0  ;;  %v1350_v44 = vpop.f32.mrf.mxu1 }
 0x14e   :  { %v6380_v22 = vadd.f32 %v4646_v19, %v1467_v24  ;;  %v1465_v35 = vadd.f32 %v1350_v44, %v6239_v46 }
 0x14f   :  { %v1875_v4 = vpop.f32.mrf.mxu0  ;;  %v4607_v41 = vpop.f32.mrf.mxu1 }
 0x150   :  { %v6383_v28 = vadd.f32 %v1872_v52, %v1465_v35  ;;  %v1468_v59 = vadd.f32 %v4607_v41, %v6246_v57 }
 0x151   :  { %v4650_v58 = vpop.f32.mrf.mxu0  ;;  %v1353_v10 = vpop.f32.mrf.mxu1 }
 0x152   :  { %v6386_v39 = vadd.f32 %v4647_v7, %v1468_v59  ;;  %v1466_v38 = vadd.f32 %v1353_v10, %v6252_v51 }
 0x153   :  { %v1888_v60 = vpop.f32.mrf.mxu0  ;;  %v4610_v30 = vpop.f32.mrf.mxu1 }
 0x154   :  { %v6389_v42 = vadd.f32 %v1875_v4, %v1466_v38  ;;  %v1471_v8 = vadd.f32 %v4610_v30, %v6259_v33 }
 0x155   :  { %v4651_v29 = vpop.f32.mrf.mxu0  ;;  %v1366_v13 = vpop.f32.mrf.mxu1 }
 0x156   :  { %v6392_v20 = vadd.f32 %v4650_v58, %v1471_v8  ;;  %v1469_v25 = vadd.f32 %v1366_v13, %v6264_v40 }
 0x157   :  { %v1891_v5 = vpop.f32.mrf.mxu0  ;;  %v4611_v55 = vpop.f32.mrf.mxu1 }
 0x158   :  { %v6395_v63 = vadd.f32 %v1888_v60, %v1469_v25  ;;  %v1472_v6 = vadd.f32 %v4611_v55, %v6271_v37 }
 0x159   :  { %v4654_v46 = vpop.f32.mrf.mxu0  ;;  %v1369_v19 = vpop.f32.mrf.mxu1 }
 0x15a   :  { %v6398_v3 = vadd.f32 %v4651_v29, %v1472_v6  ;;  %v1470_v16 = vadd.f32 %v1369_v19, %v6277_v54 }
 0x15b   :  { %v1904_v57 = vpop.f32.mrf.mxu0  ;;  %v4614_v52 = vpop.f32.mrf.mxu1 }
 0x15c   :  { %v6401_v43 = vadd.f32 %v1891_v5, %v1470_v16  ;;  %v1475_v53 = vadd.f32 %v4614_v52, %v6282_v34 }
 0x15d   :  { %v4655_v51 = vpop.f32.mrf.mxu0  ;;  %v1382_v7 = vpop.f32.mrf.mxu1 }
 0x15e   :  { %v6404_v11 = vadd.f32 %v4654_v46, %v1475_v53  ;;  %v1473_v50 = vadd.f32 %v1382_v7, %v6286_v9 }
 0x15f   :  { %v1907_v33 = vpop.f32.mrf.mxu0  ;;  %v4615_v4 = vpop.f32.mrf.mxu1 }
 0x160   :  { %v6407_v24 = vadd.f32 %v1904_v57, %v1473_v50  ;;  %v1476_v44 = vadd.f32 %v4615_v4, %v6292_v1 }
 0x161   :  { %v4658_v40 = vpop.f32.mrf.mxu0  ;;  %v1385_v58 = vpop.f32.mrf.mxu1 }
 0x162   :  { %v6410_v35 = vadd.f32 %v4655_v51, %v1476_v44  ;;  %v1474_v41 = vadd.f32 %v1385_v58, %v6298_v17 }
 0x163   :  { %v1920_v37 = vpop.f32.mrf.mxu0  ;;  %v4618_v60 = vpop.f32.mrf.mxu1 }
 0x164   :  { %v6413_v59 = vadd.f32 %v1907_v33, %v1474_v41  ;;  %v1479_v10 = vadd.f32 %v4618_v60, %v6303_v48 }
 0x165   :  { %v4659_v54 = vpop.f32.mrf.mxu0  ;;  %v1398_v29 = vpop.f32.mrf.mxu1 }
 0x166   :  { %v6416_v38 = vadd.f32 %v4658_v40, %v1479_v10  ;;  %v1477_v30 = vadd.f32 %v1398_v29, %v6307_v18 }
 0x167   :  { %v1923_v34 = vpop.f32.mrf.mxu0  ;;  %v4619_v5 = vpop.f32.mrf.mxu1 }
 0x168   :  { %v6419_v8 = vadd.f32 %v1920_v37, %v1477_v30  ;;  %v1480_v13 = vadd.f32 %v4619_v5, %v6312_v31 }
 0x169   :  { %v4662_v9 = vpop.f32.mrf.mxu0  ;;  %v1401_v46 = vpop.f32.mrf.mxu1 }
 0x16a   :  { %v6422_v25 = vadd.f32 %v4659_v54, %v1480_v13  ;;  %v1478_v55 = vadd.f32 %v1401_v46, %v6318_v56 }
 0x16b   :  { %v1936_v1 = vpop.f32.mrf.mxu0  ;;  %v4622_v57 = vpop.f32.mrf.mxu1 }
 0x16c   :  { %v6425_v6 = vadd.f32 %v1923_v34, %v1478_v55  ;;  %v1483_v19 = vadd.f32 %v4622_v57, %v6323_v36 }
 0x16d   :  { %v4663_v17 = vpop.f32.mrf.mxu0  ;;  %v1414_v51 = vpop.f32.mrf.mxu1 }
 0x16e   :  { %v6428_v16 = vadd.f32 %v4662_v9, %v1483_v19  ;;  %v1481_v52 = vadd.f32 %v1414_v51, %v6328_v26 }
 0x16f   :  { %v1939_v48 = vpop.f32.mrf.mxu0  ;;  %v4623_v33 = vpop.f32.mrf.mxu1 }
 0x170   :  { %7317 = vst [vmem:[#allocation17_spill] sm:$0xff] %v6428_v16  ;;  %v6431_v53 = vadd.f32 %v1936_v1, %v1481_v52  ;;  %v1484_v7 = vadd.f32 %v4623_v33, %v6332_v61 }
 0x171   :  { %v4666_v18 = vpop.f32.mrf.mxu0  ;;  %v1417_v40 = vpop.f32.mrf.mxu1 }
 0x172   :  { %7318 = vst [vmem:[#allocation18_spill] sm:$0xff] %v6431_v53  ;;  %v6434_v50 = vadd.f32 %v4663_v17, %v1484_v7  ;;  %v1482_v4 = vadd.f32 %v1417_v40, %v6337_v12 }
 0x173   :  { %v1952_v31 = vpop.f32.mrf.mxu0  ;;  %v4626_v37 = vpop.f32.mrf.mxu1 }
 0x174   :  { %7319 = vst [vmem:[#allocation3_spill] sm:$0xff] %v6434_v50  ;;  %v6437_v44 = vadd.f32 %v1939_v48, %v1482_v4  ;;  %v1487_v58 = vadd.f32 %v4626_v37, %v6342_v14  ;;  %v6539_v50 = vpop.permute.xlu1 %3555 }
 0x175   :  { %v4667_v56 = vpop.f32.mrf.mxu0  ;;  %v1430_v54 = vpop.f32.mrf.mxu1  ;;  %vm3646_vm1 = vcmp.eq.s32.totalorder %v6539_v50, 1 }
 0x176   :  { %7320 = vst [vmem:[#allocation4_spill] sm:$0xff] %v6437_v44  ;;  %v6440_v41 = vadd.f32 %v4666_v18, %v1487_v58  ;;  %v1485_v60 = vadd.f32 %v1430_v54, %v6345_v21 }
 0x177   :  { %v1955_v36 = vpop.f32.mrf.mxu0  ;;  %v4627_v34 = vpop.f32.mrf.mxu1 }
 0x178   :  { %7321 = vst [vmem:[#allocation5_spill] sm:$0xff] %v6440_v41  ;;  %v6443_v10 = vadd.f32 %v1952_v31, %v1485_v60  ;;  %v1488_v29 = vadd.f32 %v4627_v34, %v6349_v0 }
 0x179   :  { %v4670_v26 = vpop.f32.mrf.mxu0  ;;  %v1433_v9 = vpop.f32.mrf.mxu1 }
 0x17a   :  { %7322 = vst [vmem:[#allocation6_spill] sm:$0xff] %v6443_v10  ;;  %v6446_v30 = vadd.f32 %v4667_v56, %v1488_v29  ;;  %v1486_v5 = vadd.f32 %v1433_v9, %v6353_v2 }
 0x17b   :  { %v1968_v61 = vpop.f32.mrf.mxu0  ;;  %v4630_v1 = vpop.f32.mrf.mxu1 }
 0x17c   :  { %7323 = vst [vmem:[#allocation7_spill] sm:$0xff] %v6446_v30  ;;  %v6449_v13 = vadd.f32 %v1955_v36, %v1486_v5  ;;  %v1491_v46 = vadd.f32 %v4630_v1, %v6356_v45 }
 0x17d   :  { %v4671_v12 = vpop.f32.mrf.mxu0  ;;  %v1446_v17 = vpop.f32.mrf.mxu1 }
 0x17e   :  { %7324 = vst [vmem:[#allocation8_spill] sm:$0xff] %v6449_v13  ;;  %v6454_v55 = vadd.f32 %v4670_v26, %v1491_v46  ;;  %v1489_v57 = vadd.f32 %v1446_v17, %v6359_v49 }
 0x17f   :  { %v1971_v14 = vpop.f32.mrf.mxu0  ;;  %v4631_v0 = vpop.f32.mrf.mxu1 }
 0x180   :  { %7325 = vst [vmem:[#allocation9_spill] sm:$0xff] %v6454_v55  ;;  %v6459_v19 = vadd.f32 %v1968_v61, %v1489_v57  ;;  %v1492_v2 = vadd.f32 %v4631_v0, %v6362_v15 }
 0x181   :  { %v6452_v21 = vpop.f32.mrf.mxu0  ;;  %v1449_v51 = vpop.f32.mrf.mxu1 }
 0x182   :  { %7326 = vst [vmem:[#allocation10_spill] sm:$0xff] %v6459_v19  ;;  %v6464_v52 = vadd.f32 %v4671_v12, %v1492_v2  ;;  %v1490_v45 = vadd.f32 %v1449_v51, %v6365_v62  ;;  %v6515_v2 = vpop.permute.xlu0 %3549 }
 0x183   :  { %v6457_v48 = vpop.f32.mrf.mxu0  ;;  %vm3644_vm3 = vcmp.eq.s32.totalorder %v6515_v2, 1 }
 0x184   :  { %7327 = vst [vmem:[#allocation11_spill] sm:$0xff] %v6464_v52  ;;  %v6467_v33 = vpop.f32.mrf.mxu1  ;;  %v6471_v7 = vadd.f32 %v1971_v14, %v1490_v45 }
 0x185   :  { %v6462_v18 = vpop.f32.mrf.mxu0 }
 0x186   :  { %7328 = vst [vmem:[#allocation12_spill] sm:$0xff] %v6471_v7  ;;  %v2167_v49 = vpop.f32.mrf.mxu1  ;;  %v6529_v13 = vpop.permute.xlu0 %3552 }
 0x187   :  { %v6469_v31 = vpop.f32.mrf.mxu0  ;;  %7338 = vst [vmem:[#allocation24_spill] sm:$0xff] %v6529_v13 }
 0x188   :  { %v4683_v56 = vpop.f32.mrf.mxu1 }
 0x189   :  { %v6473_v40 = vpop.f32.mrf.mxu0 }
 0x18a   :  { %v2170_v15 = vpop.f32.mrf.mxu1 }
 0x18b   :  { %v6475_v4 = vpop.f32.mrf.mxu0 }
 0x18c   :  { %v6479_v36 = vpop.f32.mrf.mxu1 }
 0x18d   :  { %v6477_v37 = vpop.f32.mrf.mxu0 }
 0x18e   :  { %v6483_v62 = vpop.f32.mrf.mxu1 }
 0x18f   :  { %v6481_v58 = vpop.f32.mrf.mxu0 }
 0x190   :  { %v6487_v26 = vpop.f32.mrf.mxu1 }
 0x191   :  { %v6485_v54 = vpop.f32.mrf.mxu0 }
 0x192   :  { %v6491_v34 = vpop.f32.mrf.mxu1 }
 0x193   :  { %v6489_v60 = vpop.f32.mrf.mxu0 }
 0x194   :  { %v6495_v29 = vpop.f32.mrf.mxu1 }
 0x195   :  { %v6493_v61 = vpop.f32.mrf.mxu0 }
 0x196   :  { %7329 = vst [vmem:[#allocation13_spill] sm:$0xff] %v6493_v61  ;;  %v6499_v12 = vpop.f32.mrf.mxu1 }
 0x197   :  { %v6497_v9 = vpop.f32.mrf.mxu0 }
 0x198   :  { %7330 = vst [vmem:[#allocation14_spill] sm:$0xff] %v6497_v9  ;;  %v6503_v1 = vpop.f32.mrf.mxu1 }
 0x199   :  { %v6501_v5 = vpop.f32.mrf.mxu0 }
 0x19a   :  { %7331 = vst [vmem:[#allocation15_spill] sm:$0xff] %v6501_v5  ;;  %v6507_v46 = vpop.f32.mrf.mxu1 }
 0x19b   :  { %v6505_v14 = vpop.f32.mrf.mxu0 }
 0x19c   :  { %7332 = vst [vmem:[#allocation16_spill] sm:$0xff] %v6505_v14  ;;  %v6511_v57 = vpop.f32.mrf.mxu1 }
 0x19d   :  { %v6509_v17 = vpop.f32.mrf.mxu0 }
 0x19e   :  { %7333 = vst [vmem:[#allocation19_spill] sm:$0xff] %v6509_v17  ;;  %v6517_v51 = vpop.f32.mrf.mxu1 }
 0x19f   :  { %v6513_v0 = vpop.f32.mrf.mxu0 }
 0x1a0   :  { %7334 = vst [vmem:[#allocation20_spill] sm:$0xff] %v6513_v0  ;;  %v6521_v7 = vpop.f32.mrf.mxu1 }
 0x1a1   :  { %v6519_v45 = vpop.f32.mrf.mxu0 }
 0x1a2   :  { %7335 = vst [vmem:[#allocation23_spill] sm:$0xff] %v6519_v45  ;;  %v6525_v19 = vpop.f32.mrf.mxu1 }
 0x1a3   :  { %v6523_v52 = vpop.f32.mrf.mxu0 }
 0x1a4   :  { %7336 = vst [vmem:[#allocation21_spill] sm:$0xff] %v6523_v52  ;;  %v6531_v30 = vpop.f32.mrf.mxu1  ;;  %v6545_v52 = vpop.permute.xlu0 %3561 }
 0x1a5   :  { %v6527_v55 = vpop.f32.mrf.mxu0  ;;  %7342 = vst [vmem:[#allocation27_spill] sm:$0xff] %v6545_v52 }
 0x1a6   :  { %7337 = vst [vmem:[#allocation22_spill] sm:$0xff] %v6527_v55  ;;  %v6535_v41 = vpop.f32.mrf.mxu1 }
 0x1a7   :  { %v6533_v10 = vpop.f32.mrf.mxu0 }
 0x1a8   :  { %7339 = vst [vmem:[#allocation25_spill] sm:$0xff] %v6533_v10  ;;  %v6541_v53 = vpop.f32.mrf.mxu1  ;;  %v6555_v10 = vpop.permute.xlu1 %3558 }
 0x1a9   :  { %v6537_v44 = vpop.f32.mrf.mxu0  ;;  %v6561_v14 = vpop.permute.xlu0 %3567  ;;  %vm3647_vm10 = vcmp.eq.s32.totalorder %v6555_v10, 1 }
 0x1aa   :  { %7340 = vst [vmem:[#allocation41_spill] sm:$0xff] %v6537_v44  ;;  %v6547_v45 = vpop.f32.mrf.mxu1  ;;  %7348 = vst [vmem:[#allocation33_spill] sm:$0xff] %v6561_v14 }
 0x1ab   :  { %v6543_v16 = vpop.f32.mrf.mxu0 }
 0x1ac   :  { %7341 = vst [vmem:[#allocation26_spill] sm:$0xff] %v6543_v16  ;;  %v6551_v13 = vpop.f32.mrf.mxu1 }
 0x1ad   :  { %v6549_v55 = vpop.f32.mrf.mxu0  ;;  %7344 = vst [vmem:[#allocation29_spill] sm:$0xff] %v6551_v13  ;;  %v6577_v61 = vpop.permute.xlu0 %3573 }
 0x1ae   :  { %7343 = vst [vmem:[#allocation28_spill] sm:$0xff] %v6549_v55  ;;  %v6557_v17 = vpop.f32.mrf.mxu1  ;;  %v6571_v55 = vpop.permute.xlu1 %3564  ;;  %7355 = vst [vmem:[#allocation39_spill] sm:$0xff] %v6577_v61 }
 0x1af   :  { %v6553_v0 = vpop.f32.mrf.mxu0  ;;  %7346 = vst [vmem:[#allocation31_spill] sm:$0xff] %v6557_v17  ;;  %7352 = vst [vmem:[#allocation36_spill] sm:$0xff] %v6571_v55  ;;  %v2294_v55 = vadd.f32 %v2167_v49, %v6371_v32  ;;  %v2298_v49 = vadd.f32 %v6483_v62, %v6383_v28  ;;  %v2302_v28 = vadd.f32 %v6499_v12, %v6395_v63  ;;  %v7365_v12 = vld [vmem:[#allocation20_spill] sm:$0xff] }
 0x1b0   :  { %7345 = vst [vmem:[#allocation30_spill] sm:$0xff] %v6553_v0  ;;  %v6563_v5 = vpop.f32.mrf.mxu1 }
 0x1b1   :  { %v6559_v44 = vpop.f32.mrf.mxu0  ;;  %7349 = vst [vmem:[#allocation34_spill] sm:$0xff] %v6563_v5  ;;  %v2587_v32 = vadd.f32 %v6457_v48, %v2294_v55  ;;  %v2303_v55 = vadd.f32 %v6507_v46, %v6401_v43  ;;  %v2312_v43 = vadd.f32 %v6531_v30, %v6416_v38 }
 0x1b2   :  { %7347 = vst [vmem:[#allocation32_spill] sm:$0xff] %v6559_v44  ;;  %v6567_v52 = vpop.f32.mrf.mxu1 }
 0x1b3   :  { %v6565_v16 = vpop.f32.mrf.mxu0 }
 0x1b4   :  { %7350 = vst [vmem:[#allocation35_spill] sm:$0xff] %v6565_v16  ;;  %v6573_v13 = vpop.f32.mrf.mxu1  ;;  %v2296_v16 = vadd.f32 %v6467_v33, %v6368_v23  ;;  %v2300_v33 = vadd.f32 %v6479_v36, %v6380_v22  ;;  %v2299_v22 = vadd.f32 %v6491_v34, %v6389_v42  ;;  %v2308_v42 = vadd.f32 %v6511_v57, %v6404_v11 }
 0x1b5   :  { %v6569_v9 = vpop.f32.mrf.mxu0  ;;  %7353 = vst [vmem:[#allocation37_spill] sm:$0xff] %v6573_v13  ;;  %v2297_v13 = vadd.f32 %v4683_v56, %v6374_v27  ;;  %v6652_v11 = vadd.f32 %v6475_v4, %v2298_v49  ;;  %v2311_v4 = vadd.f32 %v6547_v45, %v6425_v6  ;;  %v7366_v6 = vld [vmem:[#allocation23_spill] sm:$0xff]  ;;  %v7368_v45 = vld [vmem:[#allocation21_spill] sm:$0xff]  ;;  %v7369_v49 = vld [vmem:[#allocation22_spill] sm:$0xff] }
 0x1b6   :  { %7351 = vst [vmem:[#allocation43_spill] sm:$0xff] %v6569_v9  ;;  %v6579_v17 = vpop.f32.mrf.mxu1  ;;  %v6589_v9 = vpop.permute.xlu1 %3570  ;;  %v2589_v23 = vadd.f32 %v6452_v21, %v2296_v16  ;;  %v6665_v38 = vadd.f32 %v6481_v58, %v2299_v22  ;;  %v7363_v58 = vld [vmem:[#allocation16_spill] sm:$0xff]  ;;  %v6694_v46 = vadd.f32 %v7366_v6, %v2312_v43  ;;  %v7371_v22 = vld [vmem:[#allocation17_spill] sm:$0xff] }
 0x1b7   :  { %v6575_v0 = vpop.f32.mrf.mxu0  ;;  %7356 = vst [vmem:[#allocation44_spill] sm:$0xff] %v6579_v17  ;;  %v2295_v17 = vadd.f32 %v2170_v15, %v6377_v47  ;;  %v6609_v27 = vadd.f32 %v6462_v18, %v2297_v13  ;;  %v2301_v47 = vadd.f32 %v6487_v26, %v6386_v39  ;;  %v2304_v13 = vadd.f32 %v6495_v29, %v6392_v20  ;;  %v7364_v29 = vld [vmem:[#allocation19_spill] sm:$0xff]  ;;  %v7375_v43 = vld [vmem:[#allocation25_spill] sm:$0xff] }
 0x1b8   :  { %7354 = vst [vmem:[#allocation38_spill] sm:$0xff] %v6575_v0  ;;  %v6583_v14 = vpop.f32.mrf.mxu1  ;;  %v2305_v39 = vadd.f32 %v6503_v1, %v6398_v3  ;;  %v2306_v20 = vadd.f32 %v6517_v51, %v6407_v24  ;;  %v6641_v18 = vadd.f32 %v6473_v40, %v2300_v33  ;;  %v2307_v3 = vadd.f32 %v6525_v19, %v6413_v59  ;;  %v7367_v51 = vld [vmem:[#allocation24_spill] sm:$0xff] }
 0x1b9   :  { %v6581_v44 = vpop.f32.mrf.mxu0  ;;  %7358 = vst [vmem:[#allocation40_spill] sm:$0xff] %v6583_v14  ;;  %v6619_v16 = vadd.f32 %v6469_v31, %v2295_v17  ;;  %v2309_v31 = vadd.f32 %v6521_v7, %v6410_v35  ;;  %v6655_v24 = vadd.f32 %v6477_v37, %v2301_v47  ;;  %v2310_v40 = vadd.f32 %v6535_v41, %v6419_v8  ;;  %v7360_v37 = vld [vmem:[#allocation13_spill] sm:$0xff]  ;;  %v7361_v41 = vld [vmem:[#allocation14_spill] sm:$0xff] }
 0x1ba   :  { %7357 = vst [vmem:[#allocation45_spill] sm:$0xff] %v6581_v44  ;;  %v6593_v0 = vpop.f32.mrf.mxu1  ;;  %v6598_v44 = vpop.permute.xlu0 %3579  ;;  %v2313_v35 = vadd.f32 %v6541_v53, %v6422_v25  ;;  %v6668_v30 = vadd.f32 %v6485_v54, %v2304_v13  ;;  %v6671_v7 = vadd.f32 %v6489_v60, %v2302_v28  ;;  %v6676_v8 = vadd.f32 %v7360_v37, %v2305_v39  ;;  %v7362_v53 = vld [vmem:[#allocation15_spill] sm:$0xff]  ;;  %v7372_v13 = vld [vmem:[#allocation29_spill] sm:$0xff]  ;;  %v7373_v39 = vld [vmem:[#allocation18_spill] sm:$0xff] }
 0x1bb   :  { %v6585_v5 = vpop.f32.mrf.mxu0  ;;  %v6627_v21 = vpop.permute.xlu1 %3576  ;;  %v6679_v25 = vadd.f32 %v7361_v41, %v2303_v55  ;;  %v6682_v62 = vadd.f32 %v7362_v53, %v2308_v42  ;;  %v6685_v26 = vadd.f32 %v7363_v58, %v2306_v20  ;;  %v6688_v60 = vadd.f32 %v7364_v29, %v2309_v31  ;;  %v7374_v55 = vld [vmem:[#allocation31_spill] sm:$0xff]  ;;  %v7378_v41 = vld [vmem:[#allocation34_spill] sm:$0xff] }
 0x1bc   :  { %7359 = vst [vmem:[#allocation42_spill] sm:$0xff] %v6585_v5  ;;  %v6600_v14 = vpop.f32.mrf.mxu1  ;;  %v6691_v1 = vadd.f32 %v7365_v12, %v2307_v3  ;;  %vm3645_vm11 = vcmp.eq.s32.totalorder %v7367_v51, 1  ;;  %v6700_v33 = vadd.f32 %v7368_v45, %v2310_v40  ;;  %v6703_v47 = vadd.f32 %v7369_v49, %v2313_v35  ;;  %v7377_v37 = vld [vmem:[#allocation3_spill] sm:$0xff]  ;;  %v7379_v35 = vld [vmem:[#allocation33_spill] sm:$0xff]  ;;  %v7383_v49 = vld [vmem:[#allocation6_spill] sm:$0xff] }
 0x1bd   :  { %v6595_v61 = vpop.f32.mrf.mxu0  ;;  %v2316_v28 = vadd.f32 %v7372_v13, %v7371_v22  ;;  %v2314_v42 = vadd.f32 %v7374_v55, %v7373_v39  ;;  %v2317_v40 = vadd.f32 %v7378_v41, %v7377_v37  ;;  %vm3650_vm12 = vcmp.eq.s32.totalorder %v7379_v35, 1  ;;  %v7381_v12 = vld [vmem:[#allocation5_spill] sm:$0xff]  ;;  %v7385_v39 = vld [vmem:[#allocation7_spill] sm:$0xff] }
 0x1be   :  { %v6616_v56 = vpop.f32.mrf.mxu1  ;;  %v6649_v36 = vpop.permute.xlu0 %3585  ;;  %7370 = vst [vmem:[#allocation46_spill] sm:$0xff] %v6703_v47  ;;  %v7382_v6 = vld [vmem:[#allocation37_spill] sm:$0xff]  ;;  %v7384_v22 = vld [vmem:[#allocation44_spill] sm:$0xff]  ;;  %vm3651_vm14 = vcmp.eq.s32.totalorder %v6589_v9, 1  ;;  %vm3654_vm4 = vcmp.eq.s32.totalorder %v6598_v44, 1  ;;  %v7404_v35 = vld [vmem:[#allocation39_spill] sm:$0xff] }
 0x1bf   :  { %v6602_v5 = vpop.f32.mrf.mxu0  ;;  %v6696_v17 = vpop.permute.xlu1 %3582  ;;  %v2320_v45 = vadd.f32 %v7382_v6, %v7381_v12  ;;  %v2318_v13 = vadd.f32 %v7384_v22, %v7383_v49  ;;  %v7387_v47 = vld [vmem:[#allocation8_spill] sm:$0xff]  ;;  %v7389_v37 = vld [vmem:[#allocation41_spill] sm:$0xff]  ;;  %v7392_v22 = vld [vmem:[#allocation10_spill] sm:$0xff]  ;;  %vm3652_vm5 = vcmp.eq.s32.totalorder %v7404_v35, 1  ;;  %vm3653_vm6 = vcmp.eq.s32.totalorder %v6627_v21, 1 }
 0x1c0   :  { %v6638_v48 = vpop.f32.mrf.mxu1  ;;  %v7386_v55 = vld [vmem:[#allocation40_spill] sm:$0xff]  ;;  %v6732_v41 = vadd.f32 %v7389_v37, %v2316_v28  ;;  %v7391_v6 = vld [vmem:[#allocation9_spill] sm:$0xff]  ;;  %vm3655_vm7 = vcmp.eq.s32.totalorder %v6696_v17, 1  ;;  %vm3656_vm8 = vcmp.eq.s32.totalorder %v6649_v36, 1 }
 0x1c1   :  { %v4802_v15 = vpop.f32.mrf.mxu0  ;;  %v2324_v49 = vadd.f32 %v6600_v14, %v7391_v6 }
 0x1c2   :  { %v6662_v59 = vpop.f32.mrf.mxu1  ;;  %v6709_v3 = vpop.permute.xlu0 %3591 }
 0x1c3   :  { %v3293_v63 = vpop.f32.mrf.mxu0  ;;  %vm3658_vm0 = vcmp.eq.s32.totalorder %v6709_v3, 1 }
 0x1c4   :  { %v4762_v54 = vpop.f32.mrf.mxu1 }
 0x1c5   :  { %v4803_v19 = vpop.f32.mrf.mxu0  ;;  %v3111_v57 = vadd.f32 %v4762_v54, %v2589_v23  ;;  %v6712_v23 = vadd.f32 %v7375_v43, %v2311_v4  ;;  %v7380_v54 = vld [vmem:[#allocation4_spill] sm:$0xff]  ;;  %v2321_v4 = vadd.f32 %v7386_v55, %v7385_v39 }
 0x1c6   :  { %v2982_v20 = vpop.f32.mrf.mxu1  ;;  %v2315_v29 = vadd.f32 %v6567_v52, %v7380_v54  ;;  %v7390_v54 = vld [vmem:[#allocation26_spill] sm:$0xff]  ;;  %v7395_v39 = vld [vmem:[#allocation32_spill] sm:$0xff] }
 0x1c7   :  { %v3296_v34 = vpop.f32.mrf.mxu0  ;;  %7376 = vst [vmem:[#allocation47_spill] sm:$0xff] %v6712_v23  ;;  %v3422_v53 = vadd.f32 %v4802_v15, %v3111_v57  ;;  %v3109_v58 = vadd.f32 %v2982_v20, %v2587_v32  ;;  %v2319_v15 = vadd.f32 %v6593_v0, %v7387_v47  ;;  %v7388_v20 = vld [vmem:[#allocation27_spill] sm:$0xff]  ;;  %v6735_v12 = vadd.f32 %v7390_v54, %v2314_v42  ;;  %v7393_v47 = vld [vmem:[#allocation28_spill] sm:$0xff] }
 0x1c8   :  { %v4763_v43 = vpop.f32.mrf.mxu1  ;;  %vm3648_vm13 = vcmp.eq.s32.totalorder %v7388_v20, 1  ;;  %v2322_v0 = vadd.f32 %v6616_v56, %v7392_v22  ;;  %v6748_v28 = vadd.f32 %v7393_v47, %v2317_v40  ;;  %v7394_v56 = vld [vmem:[#allocation30_spill] sm:$0xff]  ;;  %v6758_v55 = vadd.f32 %v7395_v39, %v2320_v45  ;;  %v7397_v54 = vld [vmem:[#allocation43_spill] sm:$0xff] }
 0x1c9   :  { %v4806_v31 = vpop.f32.mrf.mxu0  ;;  %v3678_v32 = vsel %vm3646_vm1, %v3422_v53, 0.0  ;;  %v3420_v57 = vadd.f32 %v3293_v63, %v3109_v58  ;;  %v3112_v52 = vadd.f32 %v4763_v43, %v6609_v27  ;;  %v6745_v63 = vpop.permute.xlu1 %3588  ;;  %v6755_v58 = vadd.f32 %v7394_v56, %v2315_v29  ;;  %v7396_v43 = vld [vmem:[#allocation35_spill] sm:$0xff]  ;;  %v7398_v29 = vld [vmem:[#allocation38_spill] sm:$0xff] }
 0x1ca   :  { %3711 = vst.msk [vmem:[%s7144_s4 + $0x10] sm:$0xff] %vm3708_vm2, %v3678_v32  ;;  %v2985_v50 = vpop.f32.mrf.mxu1  ;;  %v6761_v37 = vadd.f32 %v7396_v43, %v2318_v13  ;;  %v6764_v40 = vadd.f32 %v7397_v54, %v2321_v4  ;;  %v7399_v4 = vld [vmem:[#allocation45_spill] sm:$0xff]  ;;  %v7400_v22 = vld [vmem:[#allocation42_spill] sm:$0xff]  ;;  %v7401_v47 = vld [vmem:[#allocation11_spill] sm:$0xff]  ;;  %vm3657_vm9 = vcmp.eq.s32.totalorder %v6745_v63, 1 }
 0x1cb   :  { %v3309_v23 = vpop.f32.mrf.mxu0  ;;  %v3676_v42 = vsel %vm3644_vm3, %v3420_v57, 0.0  ;;  %v3423_v53 = vadd.f32 %v4803_v19, %v3112_v52  ;;  %v3110_v14 = vadd.f32 %v2985_v50, %v6619_v16  ;;  %v6770_v19 = vpop.permute.xlu0 %3597  ;;  %v6773_v57 = vadd.f32 %v7398_v29, %v2319_v15 }
 0x1cc   :  { %3709 = vst.msk [vmem:[%s7144_s4] sm:$0xff] %vm3708_vm2, %v3676_v42  ;;  %v4766_v2 = vpop.f32.mrf.mxu1  ;;  %v6779_v6 = vadd.f32 %v7399_v4, %v2324_v49  ;;  %v6782_v50 = vadd.f32 %v7400_v22, %v2322_v0  ;;  %v2325_v56 = vadd.f32 %v6638_v48, %v7401_v47  ;;  %v3810_v39 = vmul.f32 %v3676_v42, %v3676_v42 }
 0x1cd   :  { %v4807_v27 = vpop.f32.mrf.mxu0  ;;  %v3679_v45 = vsel %vm3647_vm10, %v3423_v53, 0.0  ;;  %v3421_v13 = vadd.f32 %v3296_v34, %v3110_v14  ;;  %v3115_v52 = vadd.f32 %v4766_v2, %v6641_v18  ;;  %v7402_v34 = vld [vmem:[#allocation36_spill] sm:$0xff]  ;;  %v3812_v14 = vmul.f32 %v3678_v32, %v3678_v32  ;;  %v6805_v51 = vpop.permute.xlu1 %3594 }
 0x1ce   :  { %3712 = vst.msk [vmem:[%s7144_s4 + $0x18] sm:$0xff] %vm3708_vm2, %v3679_v45  ;;  %v2998_v10 = vpop.f32.mrf.mxu1  ;;  %vm3649_vm15 = vcmp.eq.s32.totalorder %v7402_v34, 1  ;;  %v7403_v18 = vld [vmem:[#allocation12_spill] sm:$0xff]  ;;  %v3741_v43 = vsel %vm3708_vm2, %v3676_v42, 0.0  ;;  %v3744_v42 = vsel %vm3708_vm2, %v3678_v32, 0.0  ;;  %v3842_v4 = vsel %vm3708_vm2, %v3810_v39, 0.0 }
 0x1cf   :  { %v3312_v16 = vpop.f32.mrf.mxu0  ;;  %v6793_v49 = vadd.f32 %v6662_v59, %v7403_v18  ;;  %v3677_v0 = vsel %vm3645_vm11, %v3421_v13, 0.0  ;;  %v3426_v53 = vadd.f32 %v4806_v31, %v3115_v52  ;;  %v3113_v48 = vadd.f32 %v2998_v10, %v6652_v11 }
 0x1d0   :  { %3710 = vst.msk [vmem:[%s7144_s4 + $0x8] sm:$0xff] %vm3708_vm2, %v3677_v0  ;;  %v3742_v54 = vsel %vm3708_vm2, %v3677_v0, 0.0  ;;  %v3811_v59 = vmul.f32 %v3677_v0, %v3677_v0  ;;  %v4767_v2 = vpop.f32.mrf.mxu1  ;;  %v3813_v22 = vmul.f32 %v3679_v45, %v3679_v45  ;;  %vm3659_vm1 = vcmp.eq.s32.totalorder %v6805_v51, 1 }
 0x1d1   :  { %v4810_v15 = vpop.f32.mrf.mxu0  ;;  %v3743_v31 = vadd.f32 %v3742_v54, %v3741_v43  ;;  %v3682_v11 = vsel %vm3650_vm12, %v3426_v53, 0.0  ;;  %v3424_v13 = vadd.f32 %v3309_v23, %v3113_v48  ;;  %v3116_v52 = vadd.f32 %v4767_v2, %v6655_v24  ;;  %v6820_v23 = vpop.permute.xlu0 %3603 }
 0x1d2   :  { %v3843_v47 = vsel %vm3708_vm2, %v3811_v59, 0.0  ;;  %3715 = vst.msk [vmem:[%s7144_s4 + $0x30] sm:$0xff] %vm3708_vm2, %v3682_v11  ;;  %v3001_v10 = vpop.f32.mrf.mxu1  ;;  %v3845_v53 = vsel %vm3708_vm2, %v3812_v14, 0.0  ;;  %v3746_v48 = vsel %vm3708_vm2, %v3679_v45, 0.0  ;;  %v3847_v45 = vsel %vm3708_vm2, %v3813_v22, 0.0 }
 0x1d3   :  { %v3325_v29 = vpop.f32.mrf.mxu0  ;;  %v3745_v24 = vadd.f32 %v3744_v42, %v3743_v31  ;;  %v3844_v0 = vadd.f32 %v3843_v47, %v3842_v4  ;;  %v3680_v32 = vsel %vm3648_vm13, %v3424_v13, 0.0  ;;  %v3427_v39 = vadd.f32 %v4807_v27, %v3116_v52  ;;  %v6844_v4 = vpop.permute.xlu1 %3600 }
 0x1d4   :  { %3713 = vst.msk [vmem:[%s7144_s4 + $0x20] sm:$0xff] %vm3708_vm2, %v3680_v32  ;;  %v3814_v43 = vmul.f32 %v3680_v32, %v3680_v32  ;;  %v3114_v54 = vadd.f32 %v3001_v10, %v6665_v38  ;;  %v4770_v59 = vpop.f32.mrf.mxu1  ;;  %v3816_v14 = vmul.f32 %v3682_v11, %v3682_v11  ;;  %v3748_v13 = vsel %vm3708_vm2, %v3680_v32, 0.0 }
 0x1d5   :  { %v6817_v18 = vpop.f32.mrf.mxu0  ;;  %v3846_v31 = vadd.f32 %v3845_v53, %v3844_v0  ;;  %v3747_v42 = vadd.f32 %v3746_v48, %v3745_v24  ;;  %v3683_v20 = vsel %vm3651_vm14, %v3427_v39, 0.0  ;;  %v3119_v27 = vadd.f32 %v4770_v59, %v6668_v30  ;;  %v6853_v48 = vpop.permute.xlu0 %3609 }
 0x1d6   :  { %3716 = vst.msk [vmem:[%s7144_s4 + $0x38] sm:$0xff] %vm3708_vm2, %v3683_v20  ;;  %v3425_v38 = vadd.f32 %v3312_v16, %v3114_v54  ;;  %v3014_v52 = vpop.f32.mrf.mxu1  ;;  %v6848_v22 = vadd.f32 %v6595_v61, %v2325_v56  ;;  %v3849_v0 = vsel %vm3708_vm2, %v3814_v43, 0.0  ;;  %v3817_v32 = vmul.f32 %v3683_v20, %v3683_v20 }
 0x1d7   :  { %v3328_v2 = vpop.f32.mrf.mxu0  ;;  %v3749_v30 = vadd.f32 %v3748_v13, %v3747_v42  ;;  %v3848_v47 = vadd.f32 %v3847_v45, %v3846_v31  ;;  %v3430_v10 = vadd.f32 %v4810_v15, %v3119_v27  ;;  %v3117_v24 = vadd.f32 %v3014_v52, %v6671_v7 }
 0x1d8   :  { %v3681_v39 = vsel %vm3649_vm15, %v3425_v38, 0.0  ;;  %v4771_v16 = vpop.f32.mrf.mxu1  ;;  %v6866_v15 = vadd.f32 %v6602_v5, %v6793_v49  ;;  %v3752_v34 = vsel %vm3708_vm2, %v3682_v11, 0.0  ;;  %v3853_v42 = vsel %vm3708_vm2, %v3816_v14, 0.0 }
 0x1d9   :  { %v6842_v9 = vpop.f32.mrf.mxu0  ;;  %v3850_v54 = vadd.f32 %v3849_v0, %v3848_v47  ;;  %3714 = vst.msk [vmem:[%s7144_s4 + $0x28] sm:$0xff] %vm3708_vm2, %v3681_v39  ;;  %v3750_v7 = vsel %vm3708_vm2, %v3681_v39, 0.0  ;;  %v3815_v61 = vmul.f32 %v3681_v39, %v3681_v39  ;;  %v3686_v56 = vsel %vm3654_vm4, %v3430_v10, 0.0  ;;  %v6895_v39 = vpop.permute.xlu0 %3615 }
 0x1da   :  { %v3751_v43 = vadd.f32 %v3750_v7, %v3749_v30  ;;  %3719 = vst.msk [vmem:[%s7144_s4 + $0x50] sm:$0xff] %vm3708_vm2, %v3686_v56  ;;  %v3428_v59 = vadd.f32 %v3325_v29, %v3117_v24  ;;  %v3017_v31 = vpop.f32.mrf.mxu1  ;;  %v3120_v45 = vadd.f32 %v4771_v16, %v6676_v8  ;;  %v3754_v49 = vsel %vm3708_vm2, %v3683_v20, 0.0  ;;  %v6882_v30 = vpop.permute.xlu1 %3606 }
 0x1db   :  { %v3341_v53 = vpop.f32.mrf.mxu0  ;;  %v3851_v27 = vsel %vm3708_vm2, %v3815_v61, 0.0  ;;  %v3118_v5 = vadd.f32 %v3017_v31, %v6679_v25  ;;  %v3855_v47 = vsel %vm3708_vm2, %v3817_v32, 0.0  ;;  %v3820_v14 = vmul.f32 %v3686_v56, %v3686_v56 }
 0x1dc   :  { %v3753_v11 = vadd.f32 %v3752_v34, %v3751_v43  ;;  %v3852_v13 = vadd.f32 %v3851_v27, %v3850_v54  ;;  %v3684_v38 = vsel %vm3652_vm5, %v3428_v59, 0.0  ;;  %v4774_v52 = vpop.f32.mrf.mxu1  ;;  %v3431_v25 = vadd.f32 %v6817_v18, %v3120_v45 }
 0x1dd   :  { %v6873_v44 = vpop.f32.mrf.mxu0  ;;  %3717 = vst.msk [vmem:[%s7144_s4 + $0x40] sm:$0xff] %vm3708_vm2, %v3684_v38  ;;  %v3818_v8 = vmul.f32 %v3684_v38, %v3684_v38  ;;  %v3429_v20 = vadd.f32 %v3328_v2, %v3118_v5  ;;  %v3123_v24 = vadd.f32 %v4774_v52, %v6682_v62  ;;  %v3756_v16 = vsel %vm3708_vm2, %v3684_v38, 0.0 }
 0x1de   :  { %v3854_v35 = vadd.f32 %v3853_v42, %v3852_v13  ;;  %v3755_v10 = vadd.f32 %v3754_v49, %v3753_v11  ;;  %v3030_v0 = vpop.f32.mrf.mxu1  ;;  %v3687_v18 = vsel %vm3655_vm7, %v3431_v25, 0.0  ;;  %vm3660_vm3 = vcmp.eq.s32.totalorder %v6770_v19, 1  ;;  %v6920_v13 = vpop.permute.xlu1 %3612 }
 0x1df   :  { %v3344_v29 = vpop.f32.mrf.mxu0  ;;  %v3685_v2 = vsel %vm3653_vm6, %v3429_v20, 0.0  ;;  %v3121_v54 = vadd.f32 %v3030_v0, %v6685_v26  ;;  %v3857_v34 = vsel %vm3708_vm2, %v3818_v8, 0.0  ;;  %3720 = vst.msk [vmem:[%s7144_s4 + $0x58] sm:$0xff] %vm3708_vm2, %v3687_v18  ;;  %v3821_v62 = vmul.f32 %v3687_v18, %v3687_v18  ;;  %v6938_v25 = vpop.permute.xlu0 %3621 }
 0x1e0   :  { %v3757_v7 = vadd.f32 %v3756_v16, %v3755_v10  ;;  %v3856_v61 = vadd.f32 %v3855_v47, %v3854_v35  ;;  %3718 = vst.msk [vmem:[%s7144_s4 + $0x48] sm:$0xff] %vm3708_vm2, %v3685_v2  ;;  %v4775_v17 = vpop.f32.mrf.mxu1  ;;  %v3758_v43 = vsel %vm3708_vm2, %v3685_v2, 0.0  ;;  %v3819_v26 = vmul.f32 %v3685_v2, %v3685_v2 }
 0x1e1   :  { %v6893_v32 = vpop.f32.mrf.mxu0  ;;  %v3434_v59 = vadd.f32 %v6842_v9, %v3123_v24  ;;  %v3432_v31 = vadd.f32 %v3341_v53, %v3121_v54  ;;  %vm3662_vm10 = vcmp.eq.s32.totalorder %v6820_v23, 1  ;;  %v3760_v42 = vsel %vm3708_vm2, %v3686_v56, 0.0 }
 0x1e2   :  { %v3858_v27 = vadd.f32 %v3857_v34, %v3856_v61  ;;  %v3759_v45 = vadd.f32 %v3758_v43, %v3757_v7  ;;  %v3124_v5 = vadd.f32 %v4775_v17, %v6688_v60  ;;  %v3033_v49 = vpop.f32.mrf.mxu1  ;;  %v3859_v38 = vsel %vm3708_vm2, %v3819_v26, 0.0  ;;  %v6962_v17 = vpop.permute.xlu1 %3618 }
 0x1e3   :  { %v3357_v21 = vpop.f32.mrf.mxu0  ;;  %v3690_v9 = vsel %vm3658_vm0, %v3434_v59, 0.0  ;;  %v3688_v53 = vsel %vm3656_vm8, %v3432_v31, 0.0  ;;  %v3122_v52 = vadd.f32 %v3033_v49, %v6691_v1  ;;  %v3861_v56 = vsel %vm3708_vm2, %v3820_v14, 0.0 }
 0x1e4   :  { %v3762_v47 = vsel %vm3708_vm2, %v3687_v18, 0.0  ;;  %v3761_v60 = vadd.f32 %v3760_v42, %v3759_v45  ;;  %v3860_v8 = vadd.f32 %v3859_v38, %v3858_v27  ;;  %3723 = vst.msk [vmem:[%s7144_s4 + $0x70] sm:$0xff] %vm3708_vm2, %v3690_v9  ;;  %3721 = vst.msk [vmem:[%s7144_s4 + $0x60] sm:$0xff] %vm3708_vm2, %v3688_v53  ;;  %v4778_v36 = vpop.f32.mrf.mxu1  ;;  %v3863_v1 = vsel %vm3708_vm2, %v3821_v62, 0.0  ;;  %v7405_v45 = vld [vmem:[#allocation46_spill] sm:$0xff] }
 0x1e5   :  { %v6918_v11 = vpop.f32.mrf.mxu0  ;;  %v3822_v20 = vmul.f32 %v3688_v53, %v3688_v53  ;;  %v3435_v35 = vadd.f32 %v6873_v44, %v3124_v5  ;;  %v3433_v14 = vadd.f32 %v3344_v29, %v3122_v52  ;;  %vm3661_vm11 = vcmp.eq.s32.totalorder %v6844_v4, 1 }
 0x1e6   :  { %vm3663_vm12 = vcmp.eq.s32.totalorder %v6882_v30, 1  ;;  %v3862_v10 = vadd.f32 %v3861_v56, %v3860_v8  ;;  %v3824_v24 = vmul.f32 %v3690_v9, %v3690_v9  ;;  %v3763_v0 = vadd.f32 %v3762_v47, %v3761_v60  ;;  %v3046_v18 = vpop.f32.mrf.mxu1  ;;  %v7406_v56 = vld [vmem:[#allocation47_spill] sm:$0xff] }
 0x1e7   :  { %v3360_v3 = vpop.f32.mrf.mxu0  ;;  %v3127_v16 = vadd.f32 %v4778_v36, %v6694_v46  ;;  %v3764_v54 = vsel %vm3708_vm2, %v3688_v53, 0.0  ;;  %v3691_v7 = vsel %vm3659_vm1, %v3435_v35, 0.0  ;;  %v3689_v44 = vsel %vm3657_vm9, %v3433_v14, 0.0  ;;  %v6972_v53 = vpop.permute.xlu0 %3627 }
 0x1e8   :  { %v3125_v29 = vadd.f32 %v3046_v18, %v6700_v33  ;;  %v3765_v61 = vadd.f32 %v3764_v54, %v3763_v0  ;;  %v3864_v34 = vadd.f32 %v3863_v1, %v3862_v10  ;;  %v3865_v62 = vsel %vm3708_vm2, %v3822_v20, 0.0  ;;  %3724 = vst.msk [vmem:[%s7144_s4 + $0x78] sm:$0xff] %vm3708_vm2, %v3691_v7  ;;  %3722 = vst.msk [vmem:[%s7144_s4 + $0x68] sm:$0xff] %vm3708_vm2, %v3689_v44  ;;  %v4779_v51 = vpop.f32.mrf.mxu1 }
 0x1e9   :  { %v6945_v2 = vpop.f32.mrf.mxu0  ;;  %v3825_v46 = vmul.f32 %v3691_v7, %v3691_v7  ;;  %v3766_v33 = vsel %vm3708_vm2, %v3689_v44, 0.0  ;;  %v3823_v43 = vmul.f32 %v3689_v44, %v3689_v44  ;;  %v3438_v26 = vadd.f32 %v6893_v32, %v3127_v16 }
 0x1ea   :  { %v3436_v59 = vadd.f32 %v3357_v21, %v3125_v29  ;;  %vm3664_vm13 = vcmp.eq.s32.totalorder %v6853_v48, 1  ;;  %vm3666_vm14 = vcmp.eq.s32.totalorder %v6895_v39, 1  ;;  %v3768_v31 = vsel %vm3708_vm2, %v3690_v9, 0.0  ;;  %v3049_v49 = vpop.f32.mrf.mxu1 }
 0x1eb   :  { %v3373_v63 = vpop.f32.mrf.mxu0  ;;  %v3866_v42 = vadd.f32 %v3865_v62, %v3864_v34  ;;  %v3767_v27 = vadd.f32 %v3766_v33, %v3765_v61  ;;  %v3128_v5 = vadd.f32 %v4779_v51, %v7405_v45  ;;  %v3867_v52 = vsel %vm3708_vm2, %v3823_v43, 0.0 }
 0x1ec   :  { %v3694_v32 = vsel %vm3662_vm10, %v3438_v26, 0.0  ;;  %v3692_v21 = vsel %vm3660_vm3, %v3436_v59, 0.0  ;;  %v3126_v47 = vadd.f32 %v3049_v49, %v7406_v56  ;;  %v3869_v9 = vsel %vm3708_vm2, %v3824_v24, 0.0  ;;  %v4782_v19 = vpop.f32.mrf.mxu1 }
 0x1ed   :  { %v6970_v38 = vpop.f32.mrf.mxu0  ;;  %v3770_v60 = vsel %vm3708_vm2, %v3691_v7, 0.0  ;;  %v3769_v8 = vadd.f32 %v3768_v31, %v3767_v27  ;;  %v3868_v36 = vadd.f32 %v3867_v52, %v3866_v42  ;;  %3727 = vst.msk [vmem:[%s7144_s4 + $0x90] sm:$0xff] %vm3708_vm2, %v3694_v32  ;;  %3725 = vst.msk [vmem:[%s7144_s4 + $0x80] sm:$0xff] %vm3708_vm2, %v3692_v21  ;;  %v3871_v1 = vsel %vm3708_vm2, %v3825_v46, 0.0  ;;  %v6997_v7 = vpop.permute.xlu1 %3624 }
 0x1ee   :  { %v3826_v20 = vmul.f32 %v3692_v21, %v3692_v21  ;;  %v3439_v35 = vadd.f32 %v6918_v11, %v3128_v5  ;;  %v3437_v14 = vadd.f32 %v3360_v3, %v3126_v47  ;;  %vm3665_vm15 = vcmp.eq.s32.totalorder %v6920_v13, 1  ;;  %v3062_v18 = vpop.f32.mrf.mxu1  ;;  %v7014_v46 = vpop.permute.xlu0 %3633 }
 0x1ef   :  { %v3376_v23 = vpop.f32.mrf.mxu0  ;;  %vm3667_vm4 = vcmp.eq.s32.totalorder %v6962_v17, 1  ;;  %v3870_v10 = vadd.f32 %v3869_v9, %v3868_v36  ;;  %v3828_v24 = vmul.f32 %v3694_v32, %v3694_v32  ;;  %v3771_v0 = vadd.f32 %v3770_v60, %v3769_v8 }
 0x1f0   :  { %v3131_v16 = vadd.f32 %v4782_v19, %v6732_v41  ;;  %v3772_v44 = vsel %vm3708_vm2, %v3692_v21, 0.0  ;;  %v3695_v11 = vsel %vm3663_vm12, %v3439_v35, 0.0  ;;  %v3693_v3 = vsel %vm3661_vm11, %v3437_v14, 0.0  ;;  %v4783_v30 = vpop.f32.mrf.mxu1 }
 0x1f1   :  { %v6995_v54 = vpop.f32.mrf.mxu0  ;;  %v3129_v29 = vadd.f32 %v3062_v18, %v6735_v12  ;;  %v3773_v61 = vadd.f32 %v3772_v44, %v3771_v0  ;;  %v3872_v34 = vadd.f32 %v3871_v1, %v3870_v10  ;;  %v3873_v62 = vsel %vm3708_vm2, %v3826_v20, 0.0  ;;  %3728 = vst.msk [vmem:[%s7144_s4 + $0x98] sm:$0xff] %vm3708_vm2, %v3695_v11  ;;  %3726 = vst.msk [vmem:[%s7144_s4 + $0x88] sm:$0xff] %vm3708_vm2, %v3693_v3  ;;  %v3631_v39 = vpop.permute.xlu1 %3630 }
 0x1f2   :  { %v3829_v41 = vmul.f32 %v3695_v11, %v3695_v11  ;;  %v3774_v12 = vsel %vm3708_vm2, %v3693_v3, 0.0  ;;  %v3827_v51 = vmul.f32 %v3693_v3, %v3693_v3  ;;  %v3442_v33 = vadd.f32 %v6945_v2, %v3131_v16  ;;  %v3065_v27 = vpop.f32.mrf.mxu1  ;;  %v7044_v35 = vpop.permute.xlu0 %3639 }
 0x1f3   :  { %v3389_v4 = vpop.f32.mrf.mxu0  ;;  %v3440_v43 = vadd.f32 %v3373_v63, %v3129_v29  ;;  %vm3668_vm5 = vcmp.eq.s32.totalorder %v6938_v25, 1  ;;  %vm3670_vm6 = vcmp.eq.s32.totalorder %v6972_v53, 1  ;;  %v3776_v26 = vsel %vm3708_vm2, %v3694_v32, 0.0 }
 0x1f4   :  { %v3874_v59 = vadd.f32 %v3873_v62, %v3872_v34  ;;  %v3775_v31 = vadd.f32 %v3774_v12, %v3773_v61  ;;  %v3132_v42 = vadd.f32 %v4783_v30, %v6748_v28  ;;  %v3875_v5 = vsel %vm3708_vm2, %v3827_v51, 0.0  ;;  %v4786_v28 = vpop.f32.mrf.mxu1 }
 0x1f5   :  { %v7022_v45 = vpop.f32.mrf.mxu0  ;;  %v3698_v49 = vsel %vm3666_vm14, %v3442_v33, 0.0  ;;  %v3696_v2 = vsel %vm3664_vm13, %v3440_v43, 0.0  ;;  %v3130_v63 = vadd.f32 %v3065_v27, %v6755_v58  ;;  %v3877_v52 = vsel %vm3708_vm2, %v3828_v24, 0.0  ;;  %v3637_v53 = vpop.permute.xlu1 %3636 }
 0x1f6   :  { %v3778_v32 = vsel %vm3708_vm2, %v3695_v11, 0.0  ;;  %v3777_v21 = vadd.f32 %v3776_v26, %v3775_v31  ;;  %v3876_v56 = vadd.f32 %v3875_v5, %v3874_v59  ;;  %3731 = vst.msk [vmem:[%s7144_s4 + $0xb0] sm:$0xff] %vm3708_vm2, %v3698_v49  ;;  %3729 = vst.msk [vmem:[%s7144_s4 + $0xa0] sm:$0xff] %vm3708_vm2, %v3696_v2  ;;  %v3879_v58 = vsel %vm3708_vm2, %v3829_v41, 0.0  ;;  %v3078_v20 = vpop.f32.mrf.mxu1 }
 0x1f7   :  { %v3392_v48 = vpop.f32.mrf.mxu0  ;;  %v3830_v47 = vmul.f32 %v3696_v2, %v3696_v2  ;;  %v3443_v9 = vadd.f32 %v6970_v38, %v3132_v42  ;;  %v3441_v60 = vadd.f32 %v3376_v23, %v3130_v63  ;;  %vm3669_vm7 = vcmp.eq.s32.totalorder %v6997_v7, 1 }
 0x1f8   :  { %vm3671_vm8 = vcmp.eq.s32.totalorder %v3631_v39, 1  ;;  %v3878_v8 = vadd.f32 %v3877_v52, %v3876_v56  ;;  %v3832_v36 = vmul.f32 %v3698_v49, %v3698_v49  ;;  %v3779_v19 = vadd.f32 %v3778_v32, %v3777_v21  ;;  %v4787_v17 = vpop.f32.mrf.mxu1 }
 0x1f9   :  { %v3135_v1 = vadd.f32 %v4786_v28, %v6758_v55  ;;  %v3780_v14 = vsel %vm3708_vm2, %v3696_v2, 0.0  ;;  %v3699_v10 = vsel %vm3667_vm4, %v3443_v9, 0.0  ;;  %v3697_v38 = vsel %vm3665_vm15, %v3441_v60, 0.0  ;;  %v4830_v13 = vpop.f32.mrf.mxu0 }
 0x1fa   :  { %v3133_v23 = vadd.f32 %v3078_v20, %v6761_v37  ;;  %v3781_v24 = vadd.f32 %v3780_v14, %v3779_v19  ;;  %v3880_v0 = vadd.f32 %v3879_v58, %v3878_v8  ;;  %v3881_v16 = vsel %vm3708_vm2, %v3830_v47, 0.0  ;;  %3732 = vst.msk [vmem:[%s7144_s4 + $0xb8] sm:$0xff] %vm3708_vm2, %v3699_v10  ;;  %3730 = vst.msk [vmem:[%s7144_s4 + $0xa8] sm:$0xff] %vm3708_vm2, %v3697_v38  ;;  %v3081_v62 = vpop.f32.mrf.mxu1 }
 0x1fb   :  { %v3833_v55 = vmul.f32 %v3699_v10, %v3699_v10  ;;  %v3782_v18 = vsel %vm3708_vm2, %v3697_v38, 0.0  ;;  %v3831_v37 = vmul.f32 %v3697_v38, %v3697_v38  ;;  %v3446_v44 = vadd.f32 %v6995_v54, %v3135_v1  ;;  %v3405_v25 = vpop.f32.mrf.mxu0  ;;  %v3643_v1 = vpop.permute.xlu1 %3642 }
 0x1fc   :  { %v3444_v11 = vadd.f32 %v3389_v4, %v3133_v23  ;;  %vm3672_vm0 = vcmp.eq.s32.totalorder %v7014_v46, 1  ;;  %vm3674_vm9 = vcmp.eq.s32.totalorder %v7044_v35, 1  ;;  %v3784_v3 = vsel %vm3708_vm2, %v3698_v49, 0.0 }
 0x1fd   :  { %v3882_v29 = vadd.f32 %v3881_v16, %v3880_v0  ;;  %v3783_v61 = vadd.f32 %v3782_v18, %v3781_v24  ;;  %v3136_v34 = vadd.f32 %v4787_v17, %v6764_v40  ;;  %v3883_v41 = vsel %vm3708_vm2, %v3831_v37, 0.0  ;;  %v4790_v40 = vpop.f32.mrf.mxu1  ;;  %v4831_v7 = vpop.f32.mrf.mxu0 }
 0x1fe   :  { %v3702_v30 = vsel %vm3670_vm6, %v3446_v44, 0.0  ;;  %v3700_v54 = vsel %vm3668_vm5, %v3444_v11, 0.0  ;;  %v3134_v4 = vadd.f32 %v3081_v62, %v6773_v57  ;;  %v3885_v12 = vsel %vm3708_vm2, %v3832_v36, 0.0 }
 0x1ff   :  { %v3786_v51 = vsel %vm3708_vm2, %v3699_v10, 0.0  ;;  %v3785_v33 = vadd.f32 %v3784_v3, %v3783_v61  ;;  %v3884_v43 = vadd.f32 %v3883_v41, %v3882_v29  ;;  %3735 = vst.msk [vmem:[%s7144_s4 + $0xd0] sm:$0xff] %vm3708_vm2, %v3702_v30  ;;  %3733 = vst.msk [vmem:[%s7144_s4 + $0xc0] sm:$0xff] %vm3708_vm2, %v3700_v54  ;;  %v3887_v57 = vsel %vm3708_vm2, %v3833_v55, 0.0  ;;  %v3094_v2 = vpop.f32.mrf.mxu1 }
 0x200   :  { %v3834_v26 = vmul.f32 %v3700_v54, %v3700_v54  ;;  %v3447_v59 = vadd.f32 %v7022_v45, %v3136_v34  ;;  %v3445_v31 = vadd.f32 %v3392_v48, %v3134_v4  ;;  %v3792_v27 = vsel %vm3708_vm2, %v3702_v30, 0.0 }
 0x201   :  { %v3886_v42 = vadd.f32 %v3885_v12, %v3884_v43  ;;  %v3787_v5 = vadd.f32 %v3786_v51, %v3785_v33  ;;  %v3139_v49 = vadd.f32 %v4790_v40, %v6779_v6  ;;  %v3788_v63 = vsel %vm3708_vm2, %v3700_v54, 0.0  ;;  %v4791_v6 = vpop.f32.mrf.mxu1 }
 0x202   :  { %v3703_v52 = vsel %vm3671_vm8, %v3447_v59, 0.0  ;;  %v3701_v32 = vsel %vm3669_vm7, %v3445_v31, 0.0  ;;  %v3137_v21 = vadd.f32 %v3094_v2, %v6782_v50  ;;  %v3836_v56 = vmul.f32 %v3702_v30, %v3702_v30 }
 0x203   :  { %v3789_v28 = vadd.f32 %v3788_v63, %v3787_v5  ;;  %v3888_v45 = vadd.f32 %v3887_v57, %v3886_v42  ;;  %v3889_v48 = vsel %vm3708_vm2, %v3834_v26, 0.0  ;;  %3736 = vst.msk [vmem:[%s7144_s4 + $0xd8] sm:$0xff] %vm3708_vm2, %v3703_v52  ;;  %3734 = vst.msk [vmem:[%s7144_s4 + $0xc8] sm:$0xff] %vm3708_vm2, %v3701_v32  ;;  %v3790_v39 = vsel %vm3708_vm2, %v3701_v32, 0.0  ;;  %v3097_v19 = vpop.f32.mrf.mxu1 }
 0x204   :  { %v3835_v50 = vmul.f32 %v3701_v32, %v3701_v32  ;;  %v3450_v58 = vadd.f32 %v4830_v13, %v3139_v49  ;;  %v3448_v47 = vadd.f32 %v3405_v25, %v3137_v21  ;;  %v3837_v60 = vmul.f32 %v3703_v52, %v3703_v52 }
 0x205   :  { %v3890_v9 = vadd.f32 %v3889_v48, %v3888_v45  ;;  %v3791_v8 = vadd.f32 %v3790_v39, %v3789_v28  ;;  %v3140_v36 = vadd.f32 %v4791_v6, %v6848_v22  ;;  %v3138_v38 = vadd.f32 %v3097_v19, %v6866_v15  ;;  %v3408_v22 = vpop.f32.mrf.mxu0 }
 0x206   :  { %v3891_v20 = vsel %vm3708_vm2, %v3835_v50, 0.0  ;;  %v3706_v14 = vsel %vm3674_vm9, %v3450_v58, 0.0  ;;  %v3704_v10 = vsel %vm3672_vm0, %v3448_v47, 0.0  ;;  %v3893_v23 = vsel %vm3708_vm2, %v3836_v56, 0.0 }
 0x207   :  { %v3793_v24 = vadd.f32 %v3792_v27, %v3791_v8  ;;  %v3892_v0 = vadd.f32 %v3891_v20, %v3890_v9  ;;  %3739 = vst.msk [vmem:[%s7144_s4 + $0xf0] sm:$0xff] %vm3708_vm2, %v3706_v14  ;;  %3737 = vst.msk [vmem:[%s7144_s4 + $0xe0] sm:$0xff] %vm3708_vm2, %v3704_v10  ;;  %v3794_v46 = vsel %vm3708_vm2, %v3703_v52, 0.0  ;;  %v3838_v35 = vmul.f32 %v3704_v10, %v3704_v10 }
 0x208   :  { %v3451_v16 = vadd.f32 %v4831_v7, %v3140_v36  ;;  %v3449_v15 = vadd.f32 %v3408_v22, %v3138_v38  ;;  %vm3673_vm1 = vcmp.eq.s32.totalorder %v3637_v53, 1  ;;  %vm3675_vm3 = vcmp.eq.s32.totalorder %v3643_v1, 1 }
 0x209   :  { %v3894_v55 = vadd.f32 %v3893_v23, %v3892_v0  ;;  %v3795_v17 = vadd.f32 %v3794_v46, %v3793_v24  ;;  %v3895_v13 = vsel %vm3708_vm2, %v3837_v60, 0.0  ;;  %v3796_v18 = vsel %vm3708_vm2, %v3704_v10, 0.0 }
 0x20a   :  { %v3707_v37 = vsel %vm3675_vm3, %v3451_v16, 0.0  ;;  %v3705_v44 = vsel %vm3673_vm1, %v3449_v15, 0.0  ;;  %v3840_v29 = vmul.f32 %v3706_v14, %v3706_v14  ;;  %v3897_v61 = vsel %vm3708_vm2, %v3838_v35, 0.0 }
 0x20b   :  { %v3797_v11 = vadd.f32 %v3796_v18, %v3795_v17  ;;  %v3896_v3 = vadd.f32 %v3895_v13, %v3894_v55  ;;  %3740 = vst.msk [vmem:[%s7144_s4 + $0xf8] sm:$0xff] %vm3708_vm2, %v3707_v37  ;;  %3738 = vst.msk [vmem:[%s7144_s4 + $0xe8] sm:$0xff] %vm3708_vm2, %v3705_v44  ;;  %v3798_v34 = vsel %vm3708_vm2, %v3705_v44, 0.0  ;;  %v3839_v62 = vmul.f32 %v3705_v44, %v3705_v44 }
 0x20c   :  { %v3800_v54 = vsel %vm3708_vm2, %v3706_v14, 0.0  ;;  %v3841_v4 = vmul.f32 %v3707_v37, %v3707_v37  ;;  %v3901_v43 = vsel %vm3708_vm2, %v3840_v29, 0.0  ;;  %v3802_v40 = vsel %vm3708_vm2, %v3707_v37, 0.0 }
 0x20d   :  { %v3898_v41 = vadd.f32 %v3897_v61, %v3896_v3  ;;  %v3799_v30 = vadd.f32 %v3798_v34, %v3797_v11  ;;  %v3899_v12 = vsel %vm3708_vm2, %v3839_v62, 0.0  ;;  %vm3911_vm10 = vcmask 1040384  }
 0x20e   :  { %v3903_v57 = vsel %vm3708_vm2, %v3841_v4, 0.0  ;;  %vm3913_vm11 = vcmask 1041408  }
 0x20f   :  { %v3801_v51 = vadd.f32 %v3800_v54, %v3799_v30  ;;  %v3900_v33 = vadd.f32 %v3899_v12, %v3898_v41 }
 0x211   :  { %v3803_v25 = vadd.f32 %v3802_v40, %v3801_v51  ;;  %v3902_v53 = vadd.f32 %v3901_v43, %v3900_v33 }
 0x213   :  { %v3804_v26 = vrot.slane %v3803_v25, 4  ;;  %v3904_v59 = vadd.f32 %v3903_v57, %v3902_v53 }
 0x215   :  { %v3805_v31 = vadd.f32 %v3804_v26, %v3803_v25  ;;  %v3905_v42 = vrot.slane %v3904_v59, 4 }
 0x217   :  { %v3806_v27 = vrot.slane %v3805_v31, 2  ;;  %v3906_v5 = vadd.f32 %v3905_v42, %v3904_v59 }
 0x219   :  { %v3807_v49 = vadd.f32 %v3806_v27, %v3805_v31  ;;  %v3907_v2 = vrot.slane %v3906_v5, 2 }
 0x21b   :  { %v3808_v63 = vrot.slane %v3807_v49, 1  ;;  %v3908_v52 = vadd.f32 %v3907_v2, %v3906_v5 }
 0x21d   :  { %v3909_v32 = vrot.slane %v3908_v52, 1  ;;  %v3809_v21 = vadd.f32 %v3808_v63, %v3807_v49 }
 0x21f   :  { %v3910_v56 = vadd.f32 %v3909_v32, %v3908_v52 }
 0x221   :  { %v3912_v28 = vsel %vm3911_vm10, %v3809_v21, %v3910_v56 }
 0x222   :  { %v3914_v45 = vsel %vm3913_vm11, %v3912_v28, 0.0 }
 0x223   :  { %3915 = vst.msk [vmem:[%s7145_s5] sm:$0xff] %vm3708_vm2, %v3914_v45 }

</bundles_post_ra>
